<compile_context>
chip_gen: v7x
topology: tpu7x:2x2x1
jax: 0.10.0
libtpu: 0.0.40
codegen_flags: <defaults>
</compile_context>

<pallas_src>
import functools

import numpy as np
import jax
import jax.numpy as jnp
from jax.experimental import pallas as pl
from jax.experimental.pallas import tpu as pltpu

KSIZE = 5
STRIDE = 2


def _conv_size_out(size, kernel_size=KSIZE, stride=STRIDE):
    return (size - (kernel_size - 1) - 1) // stride + 1


# ------------------------------ Pallas kernel -------------------------------

def _dqn_fused_kernel(dims, x_ref,
                      r1_ref, v1_ref, b1_ref,
                      r2_ref, v2_ref, b2_ref,
                      r3_ref, v3_ref, b3_ref,
                      wh_ref, bh_ref, o_ref):
    """One image per grid step.  All activations stay in VMEM/vregs."""
    (oh1, owc1), (oh2, owc2), (oh3, owc3), opad = dims

    def conv_bn_relu(a, r_ref, v_ref, b_ref, oh, ow_co):
        # a: [IH, IW*Ci] bf16 ;  r_ref: [5, OH, IH] ;  v_ref: [5, IW*Ci, OW*Co]
        acc = jnp.zeros((oh, ow_co), jnp.float32)
        for kh in range(KSIZE):
            # Row selection (height stride) via 0/1 matmul -> exact.
            rows = jnp.dot(r_ref[kh], a, preferred_element_type=jnp.float32)
            # Width selection + channel contraction folded into V[kh].
            acc += jnp.dot(rows.astype(jnp.bfloat16), v_ref[kh],
                           preferred_element_type=jnp.float32)
        # BN bias (scale already folded into V) + ReLU in f32; bf16 for next MXU.
        return jnp.maximum(acc + b_ref[...], 0.0).astype(jnp.bfloat16)

    a = x_ref[...]                                   # [H, W*Cin] bf16
    a = conv_bn_relu(a, r1_ref, v1_ref, b1_ref, oh1, owc1)
    a = conv_bn_relu(a, r2_ref, v2_ref, b2_ref, oh2, owc2)
    a = conv_bn_relu(a, r3_ref, v3_ref, b3_ref, oh3, owc3)

    # Linear head: weight pre-permuted to [OH3, OW3*C3, OPAD] so the flatten is
    # just a sum of per-row matmuls (no in-kernel reshape needed).
    acc = jnp.zeros((1, opad), jnp.float32)
    for h in range(oh3):
        acc += jnp.dot(a[h:h + 1, :], wh_ref[h],
                       preferred_element_type=jnp.float32)
    y = acc + bh_ref[...]
    e = jnp.exp(-y)                                    # EUP
    o_ref[...] = pl.reciprocal(1.0 + e, approx=True)   # EUP; sigmoid(y)


# ---------------------------- operand preparation ---------------------------

def _fold_bn(conv_w, conv_b, bn, eps=1e-5):
    # PyTorch conv_w: [Co, Ci, KH, KW] -> folded [KH, KW, Ci, Co] with BN scale.
    scale = bn["g"] / jnp.sqrt(bn["v"] + eps)                     # [Co]
    w = jnp.transpose(conv_w, (2, 3, 1, 0)) * scale               # [KH,KW,Ci,Co]
    bias = bn["b"] + (conv_b - bn["m"]) * scale                   # [Co]
    return w, bias


def _selection_mats(ih, iw, oh, ow):
    r = np.zeros((KSIZE, oh, ih), np.float32)     # R[kh, oh, 2*oh+kh] = 1
    s = np.zeros((KSIZE, iw, ow), np.float32)     # S[kw, 2*ow+kw, ow] = 1
    for k in range(KSIZE):
        for o in range(oh):
            r[k, o, STRIDE * o + k] = 1.0
        for o in range(ow):
            s[k, STRIDE * o + k, o] = 1.0
    return r, s


def _layer_operands(conv_w, conv_b, bn, ih, iw):
    co, ci = int(conv_w.shape[0]), int(conv_w.shape[1])
    oh, ow = _conv_size_out(ih), _conv_size_out(iw)
    wf, bias = _fold_bn(conv_w, conv_b, bn)
    r_np, s_np = _selection_mats(ih, iw, oh, ow)
    # V[kh, iw*Ci+ci, ow*Co+co] = Wf[kh, iw-2*ow, ci, co] when the tap is valid.
    v = jnp.einsum("kio,hkcd->hicod", jnp.asarray(s_np), wf)
    v = v.reshape(KSIZE, iw * ci, ow * co)
    b_row = jnp.tile(bias, ow).reshape(1, ow * co)                # lane = ow*Co+co
    return (jnp.asarray(r_np, jnp.bfloat16), v.astype(jnp.bfloat16),
            b_row.astype(jnp.float32), oh, ow, co)


def _head_operands(head_w, head_b, h3, w3, c3):
    o = int(head_w.shape[0])
    opad = ((o + 127) // 128) * 128               # lane-dense output store
    wr = head_w.reshape(o, c3, h3, w3).transpose(2, 3, 1, 0)      # [H3,W3,C3,O]
    wr = wr.reshape(h3, w3 * c3, o)               # matches [h, w*C3+c] act layout
    wr = jnp.pad(wr, ((0, 0), (0, 0), (0, opad - o)))
    bh = jnp.pad(head_b, (0, opad - o)).reshape(1, opad)
    return wr.astype(jnp.bfloat16), bh.astype(jnp.float32), opad


# --------------------------------- forward ----------------------------------

def dqn_forward(params, x):
    # x: [N, 3, H, W] float32 (NCHW, as in PyTorch)
    n, c_in, h, w = x.shape
    r1, v1, b1, oh1, ow1, c1 = _layer_operands(
        params["conv1_w"], params["conv1_b"], params["bn1"], h, w)
    r2, v2, b2, oh2, ow2, c2 = _layer_operands(
        params["conv2_w"], params["conv2_b"], params["bn2"], oh1, ow1)
    r3, v3, b3, oh3, ow3, c3 = _layer_operands(
        params["conv3_w"], params["conv3_b"], params["bn3"], oh2, ow2)
    wh, bh, opad = _head_operands(params["head_w"], params["head_b"],
                                  oh3, ow3, c3)
    outputs = int(params["head_w"].shape[0])

    # One boundary layout change: NCHW -> [N, H, W*Cin] (channels on lanes), bf16.
    x_rows = jnp.transpose(x, (0, 2, 3, 1)).reshape(n, h, w * c_in)
    x_rows = x_rows.astype(jnp.bfloat16)

    dims = ((oh1, ow1 * c1), (oh2, ow2 * c2), (oh3, ow3 * c3), opad)
    kernel = functools.partial(_dqn_fused_kernel, dims)

    def full(a):  # weight-like operand: whole array resident in VMEM every step
        return pl.BlockSpec(a.shape, lambda i: (0,) * a.ndim)

    in_specs = [
        pl.BlockSpec((None, h, w * c_in), lambda i: (i, 0, 0)),   # per-image x
        full(r1), full(v1), full(b1),
        full(r2), full(v2), full(b2),
        full(r3), full(v3), full(b3),
        full(wh), full(bh),
    ]
    out_specs = pl.BlockSpec((None, 1, opad), lambda i: (i, 0, 0))

    # Advisory cost estimate for XLA scheduling around the custom call.
    flops_per_img = 0
    for (ih, iw, ci, oh, ow, co) in ((h, w, c_in, oh1, ow1, c1),
                                     (oh1, ow1, c1, oh2, ow2, c2),
                                     (oh2, ow2, c2, oh3, ow3, c3)):
        flops_per_img += 2 * KSIZE * (oh * ih * iw * ci + oh * iw * ci * ow * co)
    flops_per_img += 2 * oh3 * (ow3 * c3) * opad
    operands = (x_rows, r1, v1, b1, r2, v2, b2, r3, v3, b3, wh, bh)
    bytes_accessed = sum(int(np.prod(a.shape)) * a.dtype.itemsize
                         for a in operands) + n * opad * 4
    cost = pl.CostEstimate(flops=int(n * flops_per_img),
                           transcendentals=int(n * opad),
                           bytes_accessed=int(bytes_accessed))

    out = pl.pallas_call(
        kernel,
        out_shape=jax.ShapeDtypeStruct((n, 1, opad), jnp.float32),
        grid_spec=pltpu.PrefetchScalarGridSpec(
            num_scalar_prefetch=0,
            grid=(n,),
            in_specs=in_specs,
            out_specs=out_specs,
        ),
        compiler_params=pltpu.CompilerParams(
            dimension_semantics=("parallel",)),
        cost_estimate=cost,
    )(*operands)
    return out.reshape(n, opad)[:, :outputs]


# ----------------------------- pure-JAX reference ---------------------------

def dqn_reference(params, x, eps=1e-5):
    def conv_bn_relu(x, w, b, bn):
        y = jax.lax.conv_general_dilated(
            x, w, window_strides=(STRIDE, STRIDE), padding="VALID",
            dimension_numbers=("NCHW", "OIHW", "NCHW"))
        y = y + b.reshape(1, -1, 1, 1)
        scale = (bn["g"] / jnp.sqrt(bn["v"] + eps)).reshape(1, -1, 1, 1)
        y = (y - bn["m"].reshape(1, -1, 1, 1)) * scale + bn["b"].reshape(1, -1, 1, 1)
        return jnp.maximum(y, 0.0)

    y = conv_bn_relu(x, params["conv1_w"], params["conv1_b"], params["bn1"])
    y = conv_bn_relu(y, params["conv2_w"], params["conv2_b"], params["bn2"])
    y = conv_bn_relu(y, params["conv3_w"], params["conv3_b"], params["bn3"])
    y = y.reshape(y.shape[0], -1)                       # torch .view(N, -1) order
    logits = y @ params["head_w"].T + params["head_b"]
    return jax.nn.sigmoid(logits)


# --------------------------- parameters / example ---------------------------

def init_dqn_params(key, h, w, outputs):
    convw = _conv_size_out(_conv_size_out(_conv_size_out(w)))
    convh = _conv_size_out(_conv_size_out(_conv_size_out(h)))
    linear_input_size = convw * convh * 32

    keys = jax.random.split(key, 20)

    def nrm(k, shape, scale=0.05):
        return (scale * jax.random.normal(k, shape)).astype(jnp.float32)

    def bn(kg, kb, km, kv, c):
        return dict(
            g=(1.0 + nrm(kg, (c,))),
            b=nrm(kb, (c,)),
            m=nrm(km, (c,)),
            v=jnp.abs(1.0 + nrm(kv, (c,))),
        )

    return {
        "conv1_w": nrm(keys[0], (16, 3, 5, 5)),
        "conv1_b": nrm(keys[1], (16,)),
        "bn1": bn(keys[2], keys[3], keys[4], keys[5], 16),
        "conv2_w": nrm(keys[6], (32, 16, 5, 5)),
        "conv2_b": nrm(keys[7], (32,)),
        "bn2": bn(keys[8], keys[9], keys[10], keys[11], 32),
        "conv3_w": nrm(keys[12], (32, 32, 5, 5)),
        "conv3_b": nrm(keys[13], (32,)),
        "bn3": bn(keys[14], keys[15], keys[16], keys[17], 32),
        "head_w": nrm(keys[18], (outputs, linear_input_size)),
        "head_b": nrm(keys[19], (outputs,)),
    }


if __name__ == "__main__":
    H, W, OUTPUTS, BATCH = 40, 40, 2, 2

    key = jax.random.PRNGKey(0)
    k_params, k_x = jax.random.split(key)
    params = init_dqn_params(k_params, H, W, OUTPUTS)
    x = jax.random.normal(k_x, (BATCH, 3, H, W), dtype=jnp.float32)

    fwd = jax.jit(dqn_forward)
    out = fwd(params, x)
    jax.block_until_ready(out)

    assert out.shape == (BATCH, OUTPUTS), out.shape
    assert bool(jnp.all(jnp.isfinite(out)))
    assert bool(jnp.all((out > -1e-3) & (out < 1.0 + 1e-3)))

    ref = dqn_reference(params, x)
    assert bool(jnp.allclose(out, ref, atol=2e-2)), (out, ref)

    print("KERNEL_OK")
</pallas_src>

<mosaic_0001>
module attributes {stable_mosaic.version = 11 : i64} {
  func.func @_dqn_fused_kernel(%arg0: i32, %arg1: memref<1x40x120xbf16, #tpu.memory_space<vmem>>, %arg2: memref<5x18x40xbf16, #tpu.memory_space<vmem>>, %arg3: memref<5x120x288xbf16, #tpu.memory_space<vmem>>, %arg4: memref<1x288xf32, #tpu.memory_space<vmem>>, %arg5: memref<5x7x18xbf16, #tpu.memory_space<vmem>>, %arg6: memref<5x288x224xbf16, #tpu.memory_space<vmem>>, %arg7: memref<1x224xf32, #tpu.memory_space<vmem>>, %arg8: memref<5x2x7xbf16, #tpu.memory_space<vmem>>, %arg9: memref<5x224x64xbf16, #tpu.memory_space<vmem>>, %arg10: memref<1x64xf32, #tpu.memory_space<vmem>>, %arg11: memref<2x64x128xbf16, #tpu.memory_space<vmem>>, %arg12: memref<1x128xf32, #tpu.memory_space<vmem>>, %arg13: memref<1x1x128xf32, #tpu.memory_space<vmem>>) attributes {dimension_semantics = [#tpu.dimension_semantics<parallel>], iteration_bounds = array<i64: 2>, scalar_prefetch = 0 : i64, scratch_operands = 0 : i64, tpu.core_type = #tpu.core_type<tc>, window_params = [{transform_indices = @transform_0, window_bounds = array<i64: 1, 40, 120>}, {pipeline_mode = #tpu.pipeline_mode<synchronous>, transform_indices = @transform_1, window_bounds = array<i64: 5, 18, 40>}, {pipeline_mode = #tpu.pipeline_mode<synchronous>, transform_indices = @transform_2, window_bounds = array<i64: 5, 120, 288>}, {pipeline_mode = #tpu.pipeline_mode<synchronous>, transform_indices = @transform_3, window_bounds = array<i64: 1, 288>}, {pipeline_mode = #tpu.pipeline_mode<synchronous>, transform_indices = @transform_4, window_bounds = array<i64: 5, 7, 18>}, {pipeline_mode = #tpu.pipeline_mode<synchronous>, transform_indices = @transform_5, window_bounds = array<i64: 5, 288, 224>}, {pipeline_mode = #tpu.pipeline_mode<synchronous>, transform_indices = @transform_6, window_bounds = array<i64: 1, 224>}, {pipeline_mode = #tpu.pipeline_mode<synchronous>, transform_indices = @transform_7, window_bounds = array<i64: 5, 2, 7>}, {pipeline_mode = #tpu.pipeline_mode<synchronous>, transform_indices = @transform_8, window_bounds = array<i64: 5, 224, 64>}, {pipeline_mode = #tpu.pipeline_mode<synchronous>, transform_indices = @transform_9, window_bounds = array<i64: 1, 64>}, {pipeline_mode = #tpu.pipeline_mode<synchronous>, transform_indices = @transform_10, window_bounds = array<i64: 2, 64, 128>}, {pipeline_mode = #tpu.pipeline_mode<synchronous>, transform_indices = @transform_11, window_bounds = array<i64: 1, 128>}, {transform_indices = @transform_12, window_bounds = array<i64: 1, 1, 128>}]} {
    %c0 = arith.constant 0 : index
    %c0_0 = arith.constant 0 : index
    %c0_1 = arith.constant 0 : index
    %0 = vector.load %arg1[%c0, %c0_0, %c0_1] : memref<1x40x120xbf16, #tpu.memory_space<vmem>>, vector<1x40x120xbf16>
    %1 = vector.shape_cast %0 : vector<1x40x120xbf16> to vector<40x120xbf16>
    %cst = arith.constant 0.000000e+00 : f32
    %2 = vector.broadcast %cst : f32 to vector<18x288xf32>
    %c0_2 = arith.constant 0 : index
    %c0_3 = arith.constant 0 : index
    %c0_4 = arith.constant 0 : index
    %3 = vector.load %arg2[%c0_2, %c0_3, %c0_4] : memref<5x18x40xbf16, #tpu.memory_space<vmem>>, vector<1x18x40xbf16>
    %4 = vector.shape_cast %3 : vector<1x18x40xbf16> to vector<18x40xbf16>
    %cst_5 = arith.constant dense<0.000000e+00> : vector<18x120xf32>
    %5 = tpu.matmul %4, %1, %cst_5 {dimension_numbers = #tpu.dot_dimension_numbers<[1], [0], [0], [1], [0, 0, 1, 1], [], []>} : vector<18x40xbf16>, vector<40x120xbf16>, vector<18x120xf32> -> vector<18x120xf32>
    %6 = arith.truncf %5 : vector<18x120xf32> to vector<18x120xbf16>
    %c0_6 = arith.constant 0 : index
    %c0_7 = arith.constant 0 : index
    %c0_8 = arith.constant 0 : index
    %7 = vector.load %arg3[%c0_6, %c0_7, %c0_8] : memref<5x120x288xbf16, #tpu.memory_space<vmem>>, vector<1x120x288xbf16>
    %8 = vector.shape_cast %7 : vector<1x120x288xbf16> to vector<120x288xbf16>
    %cst_9 = arith.constant dense<0.000000e+00> : vector<18x288xf32>
    %9 = tpu.matmul %6, %8, %cst_9 {dimension_numbers = #tpu.dot_dimension_numbers<[1], [0], [0], [1], [0, 0, 1, 1], [], []>} : vector<18x120xbf16>, vector<120x288xbf16>, vector<18x288xf32> -> vector<18x288xf32>
    %10 = arith.addf %2, %9 : vector<18x288xf32>
    %c1 = arith.constant 1 : index
    %c0_10 = arith.constant 0 : index
    %c0_11 = arith.constant 0 : index
    %11 = vector.load %arg2[%c1, %c0_10, %c0_11] : memref<5x18x40xbf16, #tpu.memory_space<vmem>>, vector<1x18x40xbf16>
    %12 = vector.shape_cast %11 : vector<1x18x40xbf16> to vector<18x40xbf16>
    %cst_12 = arith.constant dense<0.000000e+00> : vector<18x120xf32>
    %13 = tpu.matmul %12, %1, %cst_12 {dimension_numbers = #tpu.dot_dimension_numbers<[1], [0], [0], [1], [0, 0, 1, 1], [], []>} : vector<18x40xbf16>, vector<40x120xbf16>, vector<18x120xf32> -> vector<18x120xf32>
    %14 = arith.truncf %13 : vector<18x120xf32> to vector<18x120xbf16>
    %c1_13 = arith.constant 1 : index
    %c0_14 = arith.constant 0 : index
    %c0_15 = arith.constant 0 : index
    %15 = vector.load %arg3[%c1_13, %c0_14, %c0_15] : memref<5x120x288xbf16, #tpu.memory_space<vmem>>, vector<1x120x288xbf16>
    %16 = vector.shape_cast %15 : vector<1x120x288xbf16> to vector<120x288xbf16>
    %cst_16 = arith.constant dense<0.000000e+00> : vector<18x288xf32>
    %17 = tpu.matmul %14, %16, %cst_16 {dimension_numbers = #tpu.dot_dimension_numbers<[1], [0], [0], [1], [0, 0, 1, 1], [], []>} : vector<18x120xbf16>, vector<120x288xbf16>, vector<18x288xf32> -> vector<18x288xf32>
    %18 = arith.addf %10, %17 : vector<18x288xf32>
    %c2 = arith.constant 2 : index
    %c0_17 = arith.constant 0 : index
    %c0_18 = arith.constant 0 : index
    %19 = vector.load %arg2[%c2, %c0_17, %c0_18] : memref<5x18x40xbf16, #tpu.memory_space<vmem>>, vector<1x18x40xbf16>
    %20 = vector.shape_cast %19 : vector<1x18x40xbf16> to vector<18x40xbf16>
    %cst_19 = arith.constant dense<0.000000e+00> : vector<18x120xf32>
    %21 = tpu.matmul %20, %1, %cst_19 {dimension_numbers = #tpu.dot_dimension_numbers<[1], [0], [0], [1], [0, 0, 1, 1], [], []>} : vector<18x40xbf16>, vector<40x120xbf16>, vector<18x120xf32> -> vector<18x120xf32>
    %22 = arith.truncf %21 : vector<18x120xf32> to vector<18x120xbf16>
    %c2_20 = arith.constant 2 : index
    %c0_21 = arith.constant 0 : index
    %c0_22 = arith.constant 0 : index
    %23 = vector.load %arg3[%c2_20, %c0_21, %c0_22] : memref<5x120x288xbf16, #tpu.memory_space<vmem>>, vector<1x120x288xbf16>
    %24 = vector.shape_cast %23 : vector<1x120x288xbf16> to vector<120x288xbf16>
    %cst_23 = arith.constant dense<0.000000e+00> : vector<18x288xf32>
    %25 = tpu.matmul %22, %24, %cst_23 {dimension_numbers = #tpu.dot_dimension_numbers<[1], [0], [0], [1], [0, 0, 1, 1], [], []>} : vector<18x120xbf16>, vector<120x288xbf16>, vector<18x288xf32> -> vector<18x288xf32>
    %26 = arith.addf %18, %25 : vector<18x288xf32>
    %c3 = arith.constant 3 : index
    %c0_24 = arith.constant 0 : index
    %c0_25 = arith.constant 0 : index
    %27 = vector.load %arg2[%c3, %c0_24, %c0_25] : memref<5x18x40xbf16, #tpu.memory_space<vmem>>, vector<1x18x40xbf16>
    %28 = vector.shape_cast %27 : vector<1x18x40xbf16> to vector<18x40xbf16>
    %cst_26 = arith.constant dense<0.000000e+00> : vector<18x120xf32>
    %29 = tpu.matmul %28, %1, %cst_26 {dimension_numbers = #tpu.dot_dimension_numbers<[1], [0], [0], [1], [0, 0, 1, 1], [], []>} : vector<18x40xbf16>, vector<40x120xbf16>, vector<18x120xf32> -> vector<18x120xf32>
    %30 = arith.truncf %29 : vector<18x120xf32> to vector<18x120xbf16>
    %c3_27 = arith.constant 3 : index
    %c0_28 = arith.constant 0 : index
    %c0_29 = arith.constant 0 : index
    %31 = vector.load %arg3[%c3_27, %c0_28, %c0_29] : memref<5x120x288xbf16, #tpu.memory_space<vmem>>, vector<1x120x288xbf16>
    %32 = vector.shape_cast %31 : vector<1x120x288xbf16> to vector<120x288xbf16>
    %cst_30 = arith.constant dense<0.000000e+00> : vector<18x288xf32>
    %33 = tpu.matmul %30, %32, %cst_30 {dimension_numbers = #tpu.dot_dimension_numbers<[1], [0], [0], [1], [0, 0, 1, 1], [], []>} : vector<18x120xbf16>, vector<120x288xbf16>, vector<18x288xf32> -> vector<18x288xf32>
    %34 = arith.addf %26, %33 : vector<18x288xf32>
    %c4 = arith.constant 4 : index
    %c0_31 = arith.constant 0 : index
    %c0_32 = arith.constant 0 : index
    %35 = vector.load %arg2[%c4, %c0_31, %c0_32] : memref<5x18x40xbf16, #tpu.memory_space<vmem>>, vector<1x18x40xbf16>
    %36 = vector.shape_cast %35 : vector<1x18x40xbf16> to vector<18x40xbf16>
    %cst_33 = arith.constant dense<0.000000e+00> : vector<18x120xf32>
    %37 = tpu.matmul %36, %1, %cst_33 {dimension_numbers = #tpu.dot_dimension_numbers<[1], [0], [0], [1], [0, 0, 1, 1], [], []>} : vector<18x40xbf16>, vector<40x120xbf16>, vector<18x120xf32> -> vector<18x120xf32>
    %38 = arith.truncf %37 : vector<18x120xf32> to vector<18x120xbf16>
    %c4_34 = arith.constant 4 : index
    %c0_35 = arith.constant 0 : index
    %c0_36 = arith.constant 0 : index
    %39 = vector.load %arg3[%c4_34, %c0_35, %c0_36] : memref<5x120x288xbf16, #tpu.memory_space<vmem>>, vector<1x120x288xbf16>
    %40 = vector.shape_cast %39 : vector<1x120x288xbf16> to vector<120x288xbf16>
    %cst_37 = arith.constant dense<0.000000e+00> : vector<18x288xf32>
    %41 = tpu.matmul %38, %40, %cst_37 {dimension_numbers = #tpu.dot_dimension_numbers<[1], [0], [0], [1], [0, 0, 1, 1], [], []>} : vector<18x120xbf16>, vector<120x288xbf16>, vector<18x288xf32> -> vector<18x288xf32>
    %42 = arith.addf %34, %41 : vector<18x288xf32>
    %c0_38 = arith.constant 0 : index
    %c0_39 = arith.constant 0 : index
    %43 = vector.load %arg4[%c0_38, %c0_39] : memref<1x288xf32, #tpu.memory_space<vmem>>, vector<1x288xf32>
    %44 = vector.broadcast %43 : vector<1x288xf32> to vector<18x288xf32>
    %45 = arith.addf %42, %44 : vector<18x288xf32>
    %cst_40 = arith.constant 0.000000e+00 : f32
    %46 = vector.broadcast %cst_40 : f32 to vector<18x288xf32>
    %47 = arith.maximumf %45, %46 : vector<18x288xf32>
    %48 = arith.truncf %47 : vector<18x288xf32> to vector<18x288xbf16>
    %cst_41 = arith.constant 0.000000e+00 : f32
    %49 = vector.broadcast %cst_41 : f32 to vector<7x224xf32>
    %c0_42 = arith.constant 0 : index
    %c0_43 = arith.constant 0 : index
    %c0_44 = arith.constant 0 : index
    %50 = vector.load %arg5[%c0_42, %c0_43, %c0_44] : memref<5x7x18xbf16, #tpu.memory_space<vmem>>, vector<1x7x18xbf16>
    %51 = vector.shape_cast %50 : vector<1x7x18xbf16> to vector<7x18xbf16>
    %cst_45 = arith.constant dense<0.000000e+00> : vector<7x288xf32>
    %52 = tpu.matmul %51, %48, %cst_45 {dimension_numbers = #tpu.dot_dimension_numbers<[1], [0], [0], [1], [0, 0, 1, 1], [], []>} : vector<7x18xbf16>, vector<18x288xbf16>, vector<7x288xf32> -> vector<7x288xf32>
    %53 = arith.truncf %52 : vector<7x288xf32> to vector<7x288xbf16>
    %c0_46 = arith.constant 0 : index
    %c0_47 = arith.constant 0 : index
    %c0_48 = arith.constant 0 : index
    %54 = vector.load %arg6[%c0_46, %c0_47, %c0_48] : memref<5x288x224xbf16, #tpu.memory_space<vmem>>, vector<1x288x224xbf16>
    %55 = vector.shape_cast %54 : vector<1x288x224xbf16> to vector<288x224xbf16>
    %cst_49 = arith.constant dense<0.000000e+00> : vector<7x224xf32>
    %56 = tpu.matmul %53, %55, %cst_49 {dimension_numbers = #tpu.dot_dimension_numbers<[1], [0], [0], [1], [0, 0, 1, 1], [], []>} : vector<7x288xbf16>, vector<288x224xbf16>, vector<7x224xf32> -> vector<7x224xf32>
    %57 = arith.addf %49, %56 : vector<7x224xf32>
    %c1_50 = arith.constant 1 : index
    %c0_51 = arith.constant 0 : index
    %c0_52 = arith.constant 0 : index
    %58 = vector.load %arg5[%c1_50, %c0_51, %c0_52] : memref<5x7x18xbf16, #tpu.memory_space<vmem>>, vector<1x7x18xbf16>
    %59 = vector.shape_cast %58 : vector<1x7x18xbf16> to vector<7x18xbf16>
    %cst_53 = arith.constant dense<0.000000e+00> : vector<7x288xf32>
    %60 = tpu.matmul %59, %48, %cst_53 {dimension_numbers = #tpu.dot_dimension_numbers<[1], [0], [0], [1], [0, 0, 1, 1], [], []>} : vector<7x18xbf16>, vector<18x288xbf16>, vector<7x288xf32> -> vector<7x288xf32>
    %61 = arith.truncf %60 : vector<7x288xf32> to vector<7x288xbf16>
    %c1_54 = arith.constant 1 : index
    %c0_55 = arith.constant 0 : index
    %c0_56 = arith.constant 0 : index
    %62 = vector.load %arg6[%c1_54, %c0_55, %c0_56] : memref<5x288x224xbf16, #tpu.memory_space<vmem>>, vector<1x288x224xbf16>
    %63 = vector.shape_cast %62 : vector<1x288x224xbf16> to vector<288x224xbf16>
    %cst_57 = arith.constant dense<0.000000e+00> : vector<7x224xf32>
    %64 = tpu.matmul %61, %63, %cst_57 {dimension_numbers = #tpu.dot_dimension_numbers<[1], [0], [0], [1], [0, 0, 1, 1], [], []>} : vector<7x288xbf16>, vector<288x224xbf16>, vector<7x224xf32> -> vector<7x224xf32>
    %65 = arith.addf %57, %64 : vector<7x224xf32>
    %c2_58 = arith.constant 2 : index
    %c0_59 = arith.constant 0 : index
    %c0_60 = arith.constant 0 : index
    %66 = vector.load %arg5[%c2_58, %c0_59, %c0_60] : memref<5x7x18xbf16, #tpu.memory_space<vmem>>, vector<1x7x18xbf16>
    %67 = vector.shape_cast %66 : vector<1x7x18xbf16> to vector<7x18xbf16>
    %cst_61 = arith.constant dense<0.000000e+00> : vector<7x288xf32>
    %68 = tpu.matmul %67, %48, %cst_61 {dimension_numbers = #tpu.dot_dimension_numbers<[1], [0], [0], [1], [0, 0, 1, 1], [], []>} : vector<7x18xbf16>, vector<18x288xbf16>, vector<7x288xf32> -> vector<7x288xf32>
    %69 = arith.truncf %68 : vector<7x288xf32> to vector<7x288xbf16>
    %c2_62 = arith.constant 2 : index
    %c0_63 = arith.constant 0 : index
    %c0_64 = arith.constant 0 : index
    %70 = vector.load %arg6[%c2_62, %c0_63, %c0_64] : memref<5x288x224xbf16, #tpu.memory_space<vmem>>, vector<1x288x224xbf16>
    %71 = vector.shape_cast %70 : vector<1x288x224xbf16> to vector<288x224xbf16>
    %cst_65 = arith.constant dense<0.000000e+00> : vector<7x224xf32>
    %72 = tpu.matmul %69, %71, %cst_65 {dimension_numbers = #tpu.dot_dimension_numbers<[1], [0], [0], [1], [0, 0, 1, 1], [], []>} : vector<7x288xbf16>, vector<288x224xbf16>, vector<7x224xf32> -> vector<7x224xf32>
    %73 = arith.addf %65, %72 : vector<7x224xf32>
    %c3_66 = arith.constant 3 : index
    %c0_67 = arith.constant 0 : index
    %c0_68 = arith.constant 0 : index
    %74 = vector.load %arg5[%c3_66, %c0_67, %c0_68] : memref<5x7x18xbf16, #tpu.memory_space<vmem>>, vector<1x7x18xbf16>
    %75 = vector.shape_cast %74 : vector<1x7x18xbf16> to vector<7x18xbf16>
    %cst_69 = arith.constant dense<0.000000e+00> : vector<7x288xf32>
    %76 = tpu.matmul %75, %48, %cst_69 {dimension_numbers = #tpu.dot_dimension_numbers<[1], [0], [0], [1], [0, 0, 1, 1], [], []>} : vector<7x18xbf16>, vector<18x288xbf16>, vector<7x288xf32> -> vector<7x288xf32>
    %77 = arith.truncf %76 : vector<7x288xf32> to vector<7x288xbf16>
    %c3_70 = arith.constant 3 : index
    %c0_71 = arith.constant 0 : index
    %c0_72 = arith.constant 0 : index
    %78 = vector.load %arg6[%c3_70, %c0_71, %c0_72] : memref<5x288x224xbf16, #tpu.memory_space<vmem>>, vector<1x288x224xbf16>
    %79 = vector.shape_cast %78 : vector<1x288x224xbf16> to vector<288x224xbf16>
    %cst_73 = arith.constant dense<0.000000e+00> : vector<7x224xf32>
    %80 = tpu.matmul %77, %79, %cst_73 {dimension_numbers = #tpu.dot_dimension_numbers<[1], [0], [0], [1], [0, 0, 1, 1], [], []>} : vector<7x288xbf16>, vector<288x224xbf16>, vector<7x224xf32> -> vector<7x224xf32>
    %81 = arith.addf %73, %80 : vector<7x224xf32>
    %c4_74 = arith.constant 4 : index
    %c0_75 = arith.constant 0 : index
    %c0_76 = arith.constant 0 : index
    %82 = vector.load %arg5[%c4_74, %c0_75, %c0_76] : memref<5x7x18xbf16, #tpu.memory_space<vmem>>, vector<1x7x18xbf16>
    %83 = vector.shape_cast %82 : vector<1x7x18xbf16> to vector<7x18xbf16>
    %cst_77 = arith.constant dense<0.000000e+00> : vector<7x288xf32>
    %84 = tpu.matmul %83, %48, %cst_77 {dimension_numbers = #tpu.dot_dimension_numbers<[1], [0], [0], [1], [0, 0, 1, 1], [], []>} : vector<7x18xbf16>, vector<18x288xbf16>, vector<7x288xf32> -> vector<7x288xf32>
    %85 = arith.truncf %84 : vector<7x288xf32> to vector<7x288xbf16>
    %c4_78 = arith.constant 4 : index
    %c0_79 = arith.constant 0 : index
    %c0_80 = arith.constant 0 : index
    %86 = vector.load %arg6[%c4_78, %c0_79, %c0_80] : memref<5x288x224xbf16, #tpu.memory_space<vmem>>, vector<1x288x224xbf16>
    %87 = vector.shape_cast %86 : vector<1x288x224xbf16> to vector<288x224xbf16>
    %cst_81 = arith.constant dense<0.000000e+00> : vector<7x224xf32>
    %88 = tpu.matmul %85, %87, %cst_81 {dimension_numbers = #tpu.dot_dimension_numbers<[1], [0], [0], [1], [0, 0, 1, 1], [], []>} : vector<7x288xbf16>, vector<288x224xbf16>, vector<7x224xf32> -> vector<7x224xf32>
    %89 = arith.addf %81, %88 : vector<7x224xf32>
    %c0_82 = arith.constant 0 : index
    %c0_83 = arith.constant 0 : index
    %90 = vector.load %arg7[%c0_82, %c0_83] : memref<1x224xf32, #tpu.memory_space<vmem>>, vector<1x224xf32>
    %91 = vector.broadcast %90 : vector<1x224xf32> to vector<7x224xf32>
    %92 = arith.addf %89, %91 : vector<7x224xf32>
    %cst_84 = arith.constant 0.000000e+00 : f32
    %93 = vector.broadcast %cst_84 : f32 to vector<7x224xf32>
    %94 = arith.maximumf %92, %93 : vector<7x224xf32>
    %95 = arith.truncf %94 : vector<7x224xf32> to vector<7x224xbf16>
    %cst_85 = arith.constant 0.000000e+00 : f32
    %96 = vector.broadcast %cst_85 : f32 to vector<2x64xf32>
    %c0_86 = arith.constant 0 : index
    %c0_87 = arith.constant 0 : index
    %c0_88 = arith.constant 0 : index
    %97 = vector.load %arg8[%c0_86, %c0_87, %c0_88] : memref<5x2x7xbf16, #tpu.memory_space<vmem>>, vector<1x2x7xbf16>
    %98 = vector.shape_cast %97 : vector<1x2x7xbf16> to vector<2x7xbf16>
    %cst_89 = arith.constant dense<0.000000e+00> : vector<2x224xf32>
    %99 = tpu.matmul %98, %95, %cst_89 {dimension_numbers = #tpu.dot_dimension_numbers<[1], [0], [0], [1], [0, 0, 1, 1], [], []>} : vector<2x7xbf16>, vector<7x224xbf16>, vector<2x224xf32> -> vector<2x224xf32>
    %100 = arith.truncf %99 : vector<2x224xf32> to vector<2x224xbf16>
    %c0_90 = arith.constant 0 : index
    %c0_91 = arith.constant 0 : index
    %c0_92 = arith.constant 0 : index
    %101 = vector.load %arg9[%c0_90, %c0_91, %c0_92] : memref<5x224x64xbf16, #tpu.memory_space<vmem>>, vector<1x224x64xbf16>
    %102 = vector.shape_cast %101 : vector<1x224x64xbf16> to vector<224x64xbf16>
    %cst_93 = arith.constant dense<0.000000e+00> : vector<2x64xf32>
    %103 = tpu.matmul %100, %102, %cst_93 {dimension_numbers = #tpu.dot_dimension_numbers<[1], [0], [0], [1], [0, 0, 1, 1], [], []>} : vector<2x224xbf16>, vector<224x64xbf16>, vector<2x64xf32> -> vector<2x64xf32>
    %104 = arith.addf %96, %103 : vector<2x64xf32>
    %c1_94 = arith.constant 1 : index
    %c0_95 = arith.constant 0 : index
    %c0_96 = arith.constant 0 : index
    %105 = vector.load %arg8[%c1_94, %c0_95, %c0_96] : memref<5x2x7xbf16, #tpu.memory_space<vmem>>, vector<1x2x7xbf16>
    %106 = vector.shape_cast %105 : vector<1x2x7xbf16> to vector<2x7xbf16>
    %cst_97 = arith.constant dense<0.000000e+00> : vector<2x224xf32>
    %107 = tpu.matmul %106, %95, %cst_97 {dimension_numbers = #tpu.dot_dimension_numbers<[1], [0], [0], [1], [0, 0, 1, 1], [], []>} : vector<2x7xbf16>, vector<7x224xbf16>, vector<2x224xf32> -> vector<2x224xf32>
    %108 = arith.truncf %107 : vector<2x224xf32> to vector<2x224xbf16>
    %c1_98 = arith.constant 1 : index
    %c0_99 = arith.constant 0 : index
    %c0_100 = arith.constant 0 : index
    %109 = vector.load %arg9[%c1_98, %c0_99, %c0_100] : memref<5x224x64xbf16, #tpu.memory_space<vmem>>, vector<1x224x64xbf16>
    %110 = vector.shape_cast %109 : vector<1x224x64xbf16> to vector<224x64xbf16>
    %cst_101 = arith.constant dense<0.000000e+00> : vector<2x64xf32>
    %111 = tpu.matmul %108, %110, %cst_101 {dimension_numbers = #tpu.dot_dimension_numbers<[1], [0], [0], [1], [0, 0, 1, 1], [], []>} : vector<2x224xbf16>, vector<224x64xbf16>, vector<2x64xf32> -> vector<2x64xf32>
    %112 = arith.addf %104, %111 : vector<2x64xf32>
    %c2_102 = arith.constant 2 : index
    %c0_103 = arith.constant 0 : index
    %c0_104 = arith.constant 0 : index
    %113 = vector.load %arg8[%c2_102, %c0_103, %c0_104] : memref<5x2x7xbf16, #tpu.memory_space<vmem>>, vector<1x2x7xbf16>
    %114 = vector.shape_cast %113 : vector<1x2x7xbf16> to vector<2x7xbf16>
    %cst_105 = arith.constant dense<0.000000e+00> : vector<2x224xf32>
    %115 = tpu.matmul %114, %95, %cst_105 {dimension_numbers = #tpu.dot_dimension_numbers<[1], [0], [0], [1], [0, 0, 1, 1], [], []>} : vector<2x7xbf16>, vector<7x224xbf16>, vector<2x224xf32> -> vector<2x224xf32>
    %116 = arith.truncf %115 : vector<2x224xf32> to vector<2x224xbf16>
    %c2_106 = arith.constant 2 : index
    %c0_107 = arith.constant 0 : index
    %c0_108 = arith.constant 0 : index
    %117 = vector.load %arg9[%c2_106, %c0_107, %c0_108] : memref<5x224x64xbf16, #tpu.memory_space<vmem>>, vector<1x224x64xbf16>
    %118 = vector.shape_cast %117 : vector<1x224x64xbf16> to vector<224x64xbf16>
    %cst_109 = arith.constant dense<0.000000e+00> : vector<2x64xf32>
    %119 = tpu.matmul %116, %118, %cst_109 {dimension_numbers = #tpu.dot_dimension_numbers<[1], [0], [0], [1], [0, 0, 1, 1], [], []>} : vector<2x224xbf16>, vector<224x64xbf16>, vector<2x64xf32> -> vector<2x64xf32>
    %120 = arith.addf %112, %119 : vector<2x64xf32>
    %c3_110 = arith.constant 3 : index
    %c0_111 = arith.constant 0 : index
    %c0_112 = arith.constant 0 : index
    %121 = vector.load %arg8[%c3_110, %c0_111, %c0_112] : memref<5x2x7xbf16, #tpu.memory_space<vmem>>, vector<1x2x7xbf16>
    %122 = vector.shape_cast %121 : vector<1x2x7xbf16> to vector<2x7xbf16>
    %cst_113 = arith.constant dense<0.000000e+00> : vector<2x224xf32>
    %123 = tpu.matmul %122, %95, %cst_113 {dimension_numbers = #tpu.dot_dimension_numbers<[1], [0], [0], [1], [0, 0, 1, 1], [], []>} : vector<2x7xbf16>, vector<7x224xbf16>, vector<2x224xf32> -> vector<2x224xf32>
    %124 = arith.truncf %123 : vector<2x224xf32> to vector<2x224xbf16>
    %c3_114 = arith.constant 3 : index
    %c0_115 = arith.constant 0 : index
    %c0_116 = arith.constant 0 : index
    %125 = vector.load %arg9[%c3_114, %c0_115, %c0_116] : memref<5x224x64xbf16, #tpu.memory_space<vmem>>, vector<1x224x64xbf16>
    %126 = vector.shape_cast %125 : vector<1x224x64xbf16> to vector<224x64xbf16>
    %cst_117 = arith.constant dense<0.000000e+00> : vector<2x64xf32>
    %127 = tpu.matmul %124, %126, %cst_117 {dimension_numbers = #tpu.dot_dimension_numbers<[1], [0], [0], [1], [0, 0, 1, 1], [], []>} : vector<2x224xbf16>, vector<224x64xbf16>, vector<2x64xf32> -> vector<2x64xf32>
    %128 = arith.addf %120, %127 : vector<2x64xf32>
    %c4_118 = arith.constant 4 : index
    %c0_119 = arith.constant 0 : index
    %c0_120 = arith.constant 0 : index
    %129 = vector.load %arg8[%c4_118, %c0_119, %c0_120] : memref<5x2x7xbf16, #tpu.memory_space<vmem>>, vector<1x2x7xbf16>
    %130 = vector.shape_cast %129 : vector<1x2x7xbf16> to vector<2x7xbf16>
    %cst_121 = arith.constant dense<0.000000e+00> : vector<2x224xf32>
    %131 = tpu.matmul %130, %95, %cst_121 {dimension_numbers = #tpu.dot_dimension_numbers<[1], [0], [0], [1], [0, 0, 1, 1], [], []>} : vector<2x7xbf16>, vector<7x224xbf16>, vector<2x224xf32> -> vector<2x224xf32>
    %132 = arith.truncf %131 : vector<2x224xf32> to vector<2x224xbf16>
    %c4_122 = arith.constant 4 : index
    %c0_123 = arith.constant 0 : index
    %c0_124 = arith.constant 0 : index
    %133 = vector.load %arg9[%c4_122, %c0_123, %c0_124] : memref<5x224x64xbf16, #tpu.memory_space<vmem>>, vector<1x224x64xbf16>
    %134 = vector.shape_cast %133 : vector<1x224x64xbf16> to vector<224x64xbf16>
    %cst_125 = arith.constant dense<0.000000e+00> : vector<2x64xf32>
    %135 = tpu.matmul %132, %134, %cst_125 {dimension_numbers = #tpu.dot_dimension_numbers<[1], [0], [0], [1], [0, 0, 1, 1], [], []>} : vector<2x224xbf16>, vector<224x64xbf16>, vector<2x64xf32> -> vector<2x64xf32>
    %136 = arith.addf %128, %135 : vector<2x64xf32>
    %c0_126 = arith.constant 0 : index
    %c0_127 = arith.constant 0 : index
    %137 = vector.load %arg10[%c0_126, %c0_127] : memref<1x64xf32, #tpu.memory_space<vmem>>, vector<1x64xf32>
    %138 = vector.broadcast %137 : vector<1x64xf32> to vector<2x64xf32>
    %139 = arith.addf %136, %138 : vector<2x64xf32>
    %cst_128 = arith.constant 0.000000e+00 : f32
    %140 = vector.broadcast %cst_128 : f32 to vector<2x64xf32>
    %141 = arith.maximumf %139, %140 : vector<2x64xf32>
    %142 = arith.truncf %141 : vector<2x64xf32> to vector<2x64xbf16>
    %cst_129 = arith.constant 0.000000e+00 : f32
    %143 = vector.broadcast %cst_129 : f32 to vector<1x128xf32>
    %144 = vector.extract_strided_slice %142 {offsets = [0, 0], sizes = [1, 64], strides = [1, 1]} : vector<2x64xbf16> to vector<1x64xbf16>
    %c0_130 = arith.constant 0 : index
    %c0_131 = arith.constant 0 : index
    %c0_132 = arith.constant 0 : index
    %145 = vector.load %arg11[%c0_130, %c0_131, %c0_132] : memref<2x64x128xbf16, #tpu.memory_space<vmem>>, vector<1x64x128xbf16>
    %146 = vector.shape_cast %145 : vector<1x64x128xbf16> to vector<64x128xbf16>
    %cst_133 = arith.constant dense<0.000000e+00> : vector<1x128xf32>
    %147 = tpu.matmul %144, %146, %cst_133 {dimension_numbers = #tpu.dot_dimension_numbers<[1], [0], [0], [1], [0, 0, 1, 1], [], []>} : vector<1x64xbf16>, vector<64x128xbf16>, vector<1x128xf32> -> vector<1x128xf32>
    %148 = arith.addf %143, %147 : vector<1x128xf32>
    %149 = vector.extract_strided_slice %142 {offsets = [1, 0], sizes = [1, 64], strides = [1, 1]} : vector<2x64xbf16> to vector<1x64xbf16>
    %c1_134 = arith.constant 1 : index
    %c0_135 = arith.constant 0 : index
    %c0_136 = arith.constant 0 : index
    %150 = vector.load %arg11[%c1_134, %c0_135, %c0_136] : memref<2x64x128xbf16, #tpu.memory_space<vmem>>, vector<1x64x128xbf16>
    %151 = vector.shape_cast %150 : vector<1x64x128xbf16> to vector<64x128xbf16>
    %cst_137 = arith.constant dense<0.000000e+00> : vector<1x128xf32>
    %152 = tpu.matmul %149, %151, %cst_137 {dimension_numbers = #tpu.dot_dimension_numbers<[1], [0], [0], [1], [0, 0, 1, 1], [], []>} : vector<1x64xbf16>, vector<64x128xbf16>, vector<1x128xf32> -> vector<1x128xf32>
    %153 = arith.addf %148, %152 : vector<1x128xf32>
    %c0_138 = arith.constant 0 : index
    %c0_139 = arith.constant 0 : index
    %154 = vector.load %arg12[%c0_138, %c0_139] : memref<1x128xf32, #tpu.memory_space<vmem>>, vector<1x128xf32>
    %155 = arith.addf %153, %154 : vector<1x128xf32>
    %cst_140 = arith.constant 0.000000e+00 : f32
    %156 = vector.broadcast %cst_140 : f32 to vector<1x128xf32>
    %157 = arith.subf %156, %155 : vector<1x128xf32>
    %158 = math.exp %157 : vector<1x128xf32>
    %cst_141 = arith.constant 1.000000e+00 : f32
    %159 = vector.broadcast %cst_141 : f32 to vector<1x128xf32>
    %160 = arith.addf %159, %158 : vector<1x128xf32>
    %161 = tpu.reciprocal %160 {approx = true} : vector<1x128xf32> -> vector<1x128xf32>
    %c0_142 = arith.constant 0 : index
    %c0_143 = arith.constant 0 : index
    %c0_144 = arith.constant 0 : index
    %162 = vector.load %arg13[%c0_142, %c0_143, %c0_144] : memref<1x1x128xf32, #tpu.memory_space<vmem>>, vector<1x1x128xf32>
    %163 = vector.shape_cast %162 : vector<1x1x128xf32> to vector<1x128xf32>
    %164 = vector.shape_cast %161 : vector<1x128xf32> to vector<1x1x128xf32>
    tpu.vector_store %arg13[%c0_142, %c0_143, %c0_144], %164 {strides = array<i32>} : memref<1x1x128xf32, #tpu.memory_space<vmem>>, vector<1x1x128xf32>,
    return
  }
  func.func @transform_0(%arg0: i32) -> (i32, i32, i32) {
    %c0_i32 = arith.constant 0 : i32
    %c0_i32_0 = arith.constant 0 : i32
    %c0_i32_1 = arith.constant 0 : i32
    return %arg0, %c0_i32, %c0_i32_0 : i32, i32, i32
  }
  func.func @transform_1(%arg0: i32) -> (i32, i32, i32) {
    %c0_i32 = arith.constant 0 : i32
    %c0_i32_0 = arith.constant 0 : i32
    %c0_i32_1 = arith.constant 0 : i32
    %c0_i32_2 = arith.constant 0 : i32
    return %c0_i32, %c0_i32_0, %c0_i32_1 : i32, i32, i32
  }
  func.func @transform_2(%arg0: i32) -> (i32, i32, i32) {
    %c0_i32 = arith.constant 0 : i32
    %c0_i32_0 = arith.constant 0 : i32
    %c0_i32_1 = arith.constant 0 : i32
    %c0_i32_2 = arith.constant 0 : i32
    return %c0_i32, %c0_i32_0, %c0_i32_1 : i32, i32, i32
  }
  func.func @transform_3(%arg0: i32) -> (i32, i32) {
    %c0_i32 = arith.constant 0 : i32
    %c0_i32_0 = arith.constant 0 : i32
    %c0_i32_1 = arith.constant 0 : i32
    return %c0_i32, %c0_i32_0 : i32, i32
  }
  func.func @transform_4(%arg0: i32) -> (i32, i32, i32) {
    %c0_i32 = arith.constant 0 : i32
    %c0_i32_0 = arith.constant 0 : i32
    %c0_i32_1 = arith.constant 0 : i32
    %c0_i32_2 = arith.constant 0 : i32
    return %c0_i32, %c0_i32_0, %c0_i32_1 : i32, i32, i32
  }
  func.func @transform_5(%arg0: i32) -> (i32, i32, i32) {
    %c0_i32 = arith.constant 0 : i32
    %c0_i32_0 = arith.constant 0 : i32
    %c0_i32_1 = arith.constant 0 : i32
    %c0_i32_2 = arith.constant 0 : i32
    return %c0_i32, %c0_i32_0, %c0_i32_1 : i32, i32, i32
  }
  func.func @transform_6(%arg0: i32) -> (i32, i32) {
    %c0_i32 = arith.constant 0 : i32
    %c0_i32_0 = arith.constant 0 : i32
    %c0_i32_1 = arith.constant 0 : i32
    return %c0_i32, %c0_i32_0 : i32, i32
  }
  func.func @transform_7(%arg0: i32) -> (i32, i32, i32) {
    %c0_i32 = arith.constant 0 : i32
    %c0_i32_0 = arith.constant 0 : i32
    %c0_i32_1 = arith.constant 0 : i32
    %c0_i32_2 = arith.constant 0 : i32
    return %c0_i32, %c0_i32_0, %c0_i32_1 : i32, i32, i32
  }
  func.func @transform_8(%arg0: i32) -> (i32, i32, i32) {
    %c0_i32 = arith.constant 0 : i32
    %c0_i32_0 = arith.constant 0 : i32
    %c0_i32_1 = arith.constant 0 : i32
    %c0_i32_2 = arith.constant 0 : i32
    return %c0_i32, %c0_i32_0, %c0_i32_1 : i32, i32, i32
  }
  func.func @transform_9(%arg0: i32) -> (i32, i32) {
    %c0_i32 = arith.constant 0 : i32
    %c0_i32_0 = arith.constant 0 : i32
    %c0_i32_1 = arith.constant 0 : i32
    return %c0_i32, %c0_i32_0 : i32, i32
  }
  func.func @transform_10(%arg0: i32) -> (i32, i32, i32) {
    %c0_i32 = arith.constant 0 : i32
    %c0_i32_0 = arith.constant 0 : i32
    %c0_i32_1 = arith.constant 0 : i32
    %c0_i32_2 = arith.constant 0 : i32
    return %c0_i32, %c0_i32_0, %c0_i32_1 : i32, i32, i32
  }
  func.func @transform_11(%arg0: i32) -> (i32, i32) {
    %c0_i32 = arith.constant 0 : i32
    %c0_i32_0 = arith.constant 0 : i32
    %c0_i32_1 = arith.constant 0 : i32
    return %c0_i32, %c0_i32_0 : i32, i32
  }
  func.func @transform_12(%arg0: i32) -> (i32, i32, i32) {
    %c0_i32 = arith.constant 0 : i32
    %c0_i32_0 = arith.constant 0 : i32
    %c0_i32_1 = arith.constant 0 : i32
    return %arg0, %c0_i32, %c0_i32_0 : i32, i32, i32
  }
}

</mosaic_0001>

<bundles_post_ra>
// kernel: tile.18
= control target key start
LH: loop header
LB: loop body
LE: loop exit
PB: predicated region body
PF: predicated region fallthrough
CT: control target
= control target key end

     0   :  { %s34_s0 = inlined_call_operand.vmem [shape: f32[16], index: 0, kind: input, shape index: {}]   ;;  %s35_s1 = inlined_call_operand.vmem [shape: f32[18,16], index: 1, kind: output, shape index: {}]  }
   0x1   :  { %v4_v0 = vld [vmem:[%s34_s0] ss:$0 sm:$0xff] }
   0x2   :  { %5 = vst [vmem:[%s35_s1] sm:$0xff] %v4_v0  ;;  %10 = vst [vmem:[%s35_s1 + $0x8] sm:$0xff] %v4_v0 }
   0x3   :  { %11 = vst [vmem:[%s35_s1 + $0x10] sm:$0xff] %v4_v0 }

// kernel: tile.19
= control target key start
LH: loop header
LB: loop body
LE: loop exit
PB: predicated region body
PF: predicated region fallthrough
CT: control target
= control target key end

     0   :  { %s6_s6 = smov 3  ;;  %s20_s9 = smov 3  ;;  %vm3_vm0 = vcmask 130048   ;;  %vm10_vm1 = vcmask 1048448   ;;  %vm17_vm2 = vcmask 917248   ;;  %vm24_vm3 = vcmask 786048   ;;  %s137_s0 = inlined_call_operand.vmem [shape: f32[18,16], index: 0, kind: input, shape index: {}]   ;;  %s138_s1 = inlined_call_operand.vmem [shape: f32[1,288], index: 1, kind: output, shape index: {}]  }
   0x1   :  { %v71_v0 = vld [vmem:[%s137_s0 + $0x7] ss:$8 sm:%s6_s6]   ;;  %s87_s10 = smov 112   ;;  %v73_v1 = vld [vmem:[%s137_s0 + $0x5] ss:$8 sm:%s20_s9]   ;;  %s13_s13 = smov 3 }
   0x2   :  { %8 = vrot.lane.b32.xlu0 %v71_v0, %s87_s10  ;;  %s88_s14 = smov 80   ;;  %v72_v2 = vld [vmem:[%s137_s0 + $0x6] ss:$8 sm:%s13_s13]   ;;  %s27_s17 = smov 3  ;;  %vm31_vm4 = vcmask 654848   ;;  %vm38_vm5 = vcmask 523648  }
   0x3   :  { %22 = vrot.lane.b32.xlu1 %v73_v1, %s88_s14  ;;  %v74_v3 = vld [vmem:[%s137_s0 + $0x4] ss:$8 sm:%s27_s17]   ;;  %s34_s20 = smov 3  ;;  %s41_s21 = smov 3  ;;  %vm45_vm6 = vcmask 392448   ;;  %vm51_vm7 = vcmask 261248  }
   0x4   :  { %s89_s22 = smov 96   ;;  %v2_v4 = vld [vmem:[%s137_s0] ss:$8 sm:$0x7]   ;;  %s90_s25 = smov 64  }
   0x5   :  { %v75_v5 = vld [vmem:[%s137_s0 + $0x3] ss:$8 sm:%s34_s20]   ;;  %4 = vst.msk [vmem:[#allocation0] ss:$8 sm:$0x7] %vm3_vm0, %v2_v4   ;;  %s91_s30 = smov 48  }
   0x6   :  { %15 = vrot.lane.b32.xlu0 %v72_v2, %s89_s22  ;;  %v76_v6 = vld [vmem:[%s137_s0 + $0x2] ss:$8 sm:%s41_s21]   ;;  %s92_s2 = smov 32   ;;  %v77_v7 = vld [vmem:[%s137_s0 + $0x1] ss:$8 sm:$0x7]  }
   0x7   :  { %29 = vrot.lane.b32.xlu1 %v74_v3, %s90_s25  ;;  %s93_s0 = smov 16  }
   0xa   :  { %36 = vrot.lane.b32.xlu0 %v75_v5, %s91_s30 }
   0xb   :  { %43 = vrot.lane.b32.xlu1 %v76_v6, %s92_s2 }
   0xe   :  { %49 = vrot.lane.b32.xlu0 %v77_v7, %s93_s0 }
  0x74   :  { %v9_v8 = vpop.permute.xlu0 %8  }
  0x75   :  { %11 = vst.msk [vmem:[#allocation0] ss:$8 sm:$0x3] %vm10_vm1, %v9_v8   ;;  %v23_v9 = vpop.permute.xlu1 %22  }
  0x78   :  { %v16_v10 = vpop.permute.xlu0 %15  }
  0x79   :  { %18 = vst.msk [vmem:[#allocation0] ss:$8 sm:$0x3] %vm17_vm2, %v16_v10   ;;  %v30_v11 = vpop.permute.xlu1 %29  }
  0x7a   :  { %25 = vst.msk [vmem:[#allocation0] ss:$8 sm:$0x3] %vm24_vm3, %v23_v9  }
  0x7b   :  { %32 = vst.msk [vmem:[#allocation0] ss:$8 sm:$0x3] %vm31_vm4, %v30_v11  }
  0x7c   :  { %v37_v12 = vpop.permute.xlu0 %36  }
  0x7d   :  { %39 = vst.msk [vmem:[#allocation0] ss:$8 sm:$0x3] %vm38_vm5, %v37_v12   ;;  %v44_v13 = vpop.permute.xlu1 %43  }
  0x7e   :  { %46 = vst.msk [vmem:[#allocation0] ss:$8 sm:$0x3] %vm45_vm6, %v44_v13  }
  0x80   :  { %v50_v14 = vpop.permute.xlu0 %49  }
  0x81   :  { %52 = vst.msk [vmem:[#allocation0] ss:$8 sm:$0x7] %vm51_vm7, %v50_v14  }
  0x88   :  { %v56_v15 = vld [vmem:[#allocation0] sm:$0x1]  ;;  %v60_v16 = vld [vmem:[#allocation0 + $0x8] sm:$0x1]  ;;  %v65_v17 = vld [vmem:[#allocation0 + $0x10] sm:$0x1] }
  0x89   :  { %58 = vst [vmem:[%s138_s1] sm:$0x1] %v56_v15  ;;  %78 = vst [vmem:[%s138_s1 + $0x1] sm:$0x1] %v60_v16 }
  0x8a   :  { %79 = vst [vmem:[%s138_s1 + $0x2] sm:$0x1] %v65_v17 }

// kernel: tile.23
= control target key start
LH: loop header
LB: loop body
LE: loop exit
PB: predicated region body
PF: predicated region fallthrough
CT: control target
= control target key end

     0   :  { %s22_s0 = inlined_call_operand.vmem [shape: f32[32], index: 0, kind: input, shape index: {}]   ;;  %s23_s1 = inlined_call_operand.vmem [shape: f32[7,32], index: 1, kind: output, shape index: {}]  }
   0x1   :  { %v4_v0 = vld [vmem:[%s22_s0] ss:$0 sm:$0xff] }
   0x2   :  { %5 = vst [vmem:[%s23_s1] sm:$0xff] %v4_v0 }

// kernel: tile.24
= control target key start
LH: loop header
LB: loop body
LE: loop exit
PB: predicated region body
PF: predicated region fallthrough
CT: control target
= control target key end

     0   :  { %s13_s8 = smov 3  ;;  %s44_s9 = smov 96   ;;  %vm4_vm0 = vcmask 261120   ;;  %vm10_vm1 = vcmask 1048320   ;;  %vm17_vm2 = vcmask 785920   ;;  %vm24_vm3 = vcmask 523520   ;;  %s75_s0 = inlined_call_operand.vmem [shape: f32[7,32], index: 0, kind: input, shape index: {}]   ;;  %s76_s1 = inlined_call_operand.vmem [shape: f32[1,224], index: 1, kind: output, shape index: {}]  }
   0x1   :  { %v37_v0 = vld [vmem:[%s75_s0 + $0x3] sm:$0x1]   ;;  %s20_s10 = smov 3  ;;  %v38_v1 = vld [vmem:[%s75_s0 + $0x2] ss:$4 sm:%s13_s8]   ;;  %s2_s15 = smov 3 }
   0x2   :  { %8 = vrot.lane.b32.xlu0 %v37_v0, %s44_s9  ;;  %v39_v2 = vld [vmem:[%s75_s0 + $0x1] ss:$4 sm:%s20_s10]   ;;  %s45_s16 = smov 32  }
   0x3   :  { %22 = vrot.lane.b32.xlu1 %v39_v2, %s45_s16  ;;  %v3_v3 = vld [vmem:[%s75_s0] ss:$4 sm:%s2_s15]   ;;  %s46_s0 = smov 64  }
   0x4   :  { %5 = vst.msk [vmem:[#allocation0] ss:$8 sm:$0x3] %vm4_vm0, %v3_v3  }
   0x6   :  { %15 = vrot.lane.b32.xlu0 %v38_v1, %s46_s0 }
  0x74   :  { %v9_v4 = vpop.permute.xlu0 %8  }
  0x75   :  { %11 = vst.msk [vmem:[#allocation0] sm:$0x1] %vm10_vm1, %v9_v4   ;;  %v23_v5 = vpop.permute.xlu1 %22  }
  0x78   :  { %v16_v6 = vpop.permute.xlu0 %15  }
  0x79   :  { %18 = vst.msk [vmem:[#allocation0] ss:$8 sm:$0x3] %vm17_vm2, %v16_v6  }
  0x7a   :  { %25 = vst.msk [vmem:[#allocation0] ss:$8 sm:$0x3] %vm24_vm3, %v23_v5  }
  0x81   :  { %v29_v7 = vld [vmem:[#allocation0] sm:$0x1]  ;;  %v33_v8 = vld [vmem:[#allocation0 + $0x8] sm:$0x1] }
  0x82   :  { %31 = vst [vmem:[%s76_s1] sm:$0x1] %v29_v7  ;;  %40 = vst [vmem:[%s76_s1 + $0x1] sm:$0x1] %v33_v8 }

// kernel: tile.28
= control target key start
LH: loop header
LB: loop body
LE: loop exit
PB: predicated region body
PF: predicated region fallthrough
CT: control target
= control target key end

     0   :  { %s22_s0 = inlined_call_operand.vmem [shape: f32[32], index: 0, kind: input, shape index: {}]   ;;  %s23_s1 = inlined_call_operand.vmem [shape: f32[2,32], index: 1, kind: output, shape index: {}]  }
   0x1   :  { %v4_v0 = vld [vmem:[%s22_s0] ss:$0 sm:$0xff] }
   0x2   :  { %5 = vst [vmem:[%s23_s1] sm:$0x3] %v4_v0 }

// kernel: tile.29
= control target key start
LH: loop header
LB: loop body
LE: loop exit
PB: predicated region body
PF: predicated region fallthrough
CT: control target
= control target key end

     0   :  { %vm7_vm0 = vcmask 261120   ;;  %vm13_vm1 = vcmask 523520   ;;  %s39_s0 = inlined_call_operand.vmem [shape: f32[2,32], index: 0, kind: input, shape index: {}]   ;;  %s40_s1 = inlined_call_operand.vmem [shape: f32[1,64], index: 1, kind: output, shape index: {}]  }
   0x1   :  { %v4_v0 = vld [vmem:[%s39_s0] sm:$0x3]  ;;  %s22_s0 = smov 32  }
   0x2   :  { %5 = vst [vmem:[#allocation1] sm:$0x3] %v4_v0 }
   0x9   :  { %v10_v1 = vld [vmem:[#allocation1 + $0x1] sm:$0x1]   ;;  %v6_v2 = vld [vmem:[#allocation1] sm:$0x1]  }
   0xa   :  { %11 = vrot.lane.b32.xlu0 %v10_v1, %s22_s0  ;;  %8 = vst.msk [vmem:[#allocation0] sm:$0x1] %vm7_vm0, %v6_v2  }
  0x7c   :  { %v12_v3 = vpop.permute.xlu0 %11  }
  0x7d   :  { %14 = vst.msk [vmem:[#allocation0] sm:$0x1] %vm13_vm1, %v12_v3  }
  0x84   :  { %v18_v4 = vld [vmem:[#allocation0] sm:$0x1] }
  0x85   :  { %20 = vst [vmem:[%s40_s1] sm:$0x1] %v18_v4 }

// kernel: dqn_forward.1
= control target key start
LH: loop header
LB: loop body
LE: loop exit
PB: predicated region body
PF: predicated region fallthrough
CT: control target
= control target key end

     0   :  { %s9021_s0 = inlined_call_operand.vmem [shape: bf16[2,40,120], index: 0, kind: input, shape index: {}]   ;;  %s9022_s1 = inlined_call_operand.vmem [shape: bf16[5,18,40], index: 1, kind: input, shape index: {}]   ;;  %s9023_s2 = inlined_call_operand.vmem [shape: bf16[5,120,288], index: 2, kind: input, shape index: {}]   ;;  %s9024_s3 = inlined_call_operand.vmem [shape: f32[1,288], index: 3, kind: input, shape index: {}]   ;;  %s9025_s4 = inlined_call_operand.vmem [shape: bf16[5,7,18], index: 4, kind: input, shape index: {}]   ;;  %s9026_s5 = inlined_call_operand.vmem [shape: bf16[5,288,224], index: 5, kind: input, shape index: {}]   ;;  %s9027_s6 = inlined_call_operand.vmem [shape: f32[1,224], index: 6, kind: input, shape index: {}]   ;;  %s9028_s7 = inlined_call_operand.vmem [shape: bf16[5,2,7], index: 7, kind: input, shape index: {}]   ;;  %s9029_s8 = inlined_call_operand.vmem [shape: bf16[5,224,64], index: 8, kind: input, shape index: {}]   ;;  %s9030_s9 = inlined_call_operand.vmem [shape: f32[1,64], index: 9, kind: input, shape index: {}]   ;;  %s9031_s10 = inlined_call_operand.vmem [shape: bf16[2,64,128], index: 10, kind: input, shape index: {}]   ;;  %s9032_s11 = inlined_call_operand.vmem [shape: f32[1,128], index: 11, kind: input, shape index: {}]   ;;  %s9033_s12 = inlined_call_operand.hbm [shape: f32[2,1,128], index: 12, kind: output, shape index: {}]  }
   0x1   :  { %9034 = sst [smem:[#allocation6_spill]] %s9021_s0 }
   0x2   :  { %17 = vsyncpa [#allocation3], 0 }
   0x3   :  { %19 = vsyncpa [#allocation3 + $0x1], 0  ;;  %s7342_s21 = smov 0   ;;  %s7344_s22 = smov 0  }
   0x4   :  { %s7346_s23 = smov 0   ;;  %s7348_s24 = smov 0  }
   0x5 LB: > { %s7363_s25 = sadd.s32 4294967295, %s7270_s24   ;;  %s5430_s26 = sadd.s32 4294967294, %s7270_s24   ;;  %s7270_s24 = sphi %s7348_s24, %s9043_s24   ;;  %s7266_s23 = sphi %s7346_s23, %s9042_s23   ;;  %s7262_s22 = sphi %s7344_s22, %s9041_s22   ;;  %s7258_s21 = sphi %s7342_s21, %s9040_s21  }
   0x6   : > { %s7367_s27 = sadd.s32 1, %s7270_s24   ;;  %s289_s28 = sadd.s32 1, %s7266_s23 }
   0x7   : > { %s286_s29 = ssub.s32 %s7270_s24, %s7367_s27  ;;  %p299_p0 = scmp.ne.s32.totalorder %s7266_s23, %s7262_s22 }
   0x8   : > { %p287_p1 = scmp.eq.s32.totalorder %s286_s29, 0  ;;  %p300_p2 = scmp.eq.s32.totalorder %s7363_s25, 1 }
   0x9   : > { %p305_p3 = scmp.ne.s32.totalorder %s7262_s22, %s7258_s21  ;;  %p306_p4 = scmp.eq.s32.totalorder %s5430_s26, 1 }
   0xa   : > { %s7378_s30 = scalar_select %p287_p1, %s7266_s23, %s289_s28  }
   0xb   : > { %p7380_p5 = por %p300_p2, %p299_p0  ;;  %p7384_p6 = por %p306_p4, %p305_p3 }
   0xc   : > { %9035 = sst [smem:[#allocation5_spill]] %s7378_s30  ;;  %p5433_p7 = scmp.ge.s32.totalorder %s7270_s24, 1 }
   0xd   : > { %p365_p8 = scmp.lt.s32.totalorder %s7270_s24, 3 }
   0xf   : > { %p366_p9 = pnand %p5433_p7, %p365_p8 }
  0x10   : > { %p406_p10 = scmp.lt.s32.totalorder (!%p366_p9), %s7363_s25, 1  ;;  %vm443_vm0 = vcmask (!%p366_p9), 326656   ;;  %v6688_v0 = vld [vmem:[%s9022_s1 + $0xc] sm:$0xff] (!%p366_p9)   ;;  %v6690_v1 = vld [vmem:[%s9022_s1] sm:$0xff] (!%p366_p9)   ;;  %s9038_s0 = sld [smem:[#allocation6_spill]] (!%p366_p9)  ;;  %vm450_vm1 = vcmask (!%p366_p9), 1043456  }
  0x11   : > { %369 = sbr.rel (%p366_p9) target bundleno = 3580 (0xdfc), region = 68  ;;  %6417 = vmatprep.mubr.msk.bf16.mxu1 (!%p366_p9), %vm443_vm0, %v6688_v0  ;;  %6407 = vmatprep.mubr.msk.bf16.mxu0 (!%p366_p9), %vm443_vm0, %v6690_v1  ;;  %v6694_v5 = vld [vmem:[%s9023_s2 + $0xb8] ss:$12 sps:$4 sm:$0xff] (!%p366_p9)   ;;  %v6695_v6 = vld [vmem:[%s9023_s2 + $0xbc] ss:$12 sps:$4 sm:$0xff] (!%p366_p9)   ;;  %v7272_v36 = vmov (!%p366_p9), 0  }
  0x12   : > { %v6689_v8 = vld [vmem:[%s9022_s1 + $0x14] ss:$0 sps:$4 sm:$0x11] (!%p366_p9)   ;;  %v6691_v9 = vld [vmem:[%s9022_s1 + $0x8] ss:$0 sps:$4 sm:$0x11] (!%p366_p9)  }
  0x13   : > { %v6692_v10 = vld [vmem:[%s9023_s2 + $0xb4] ss:$12 sps:$4 sm:$0xff] (!%p366_p9)   ;;  %v6698_v11 = vld [vmem:[%s9023_s2 + $0xd0] ss:$12 sps:$4 sm:$0xff] (!%p366_p9)   ;;  %v6696_v13 = vld [vmem:[%s9023_s2 + $0xcc] ss:$12 sps:$4 sm:$0xff] (!%p366_p9)  }
  0x14   : > { %v6699_v12 = vld [vmem:[%s9023_s2 + $0xd4] ss:$12 sps:$4 sm:$0xff] (!%p366_p9)   ;;  %v6703_v15 = vld [vmem:[%s9023_s2 + $0xec] ss:$12 sps:$4 sm:$0xff] (!%p366_p9)   ;;  %v6700_v16 = vld [vmem:[%s9023_s2 + $0xe4] ss:$12 sps:$4 sm:$0xff] (!%p366_p9)  }
  0x15   : > { %v6702_v14 = vld [vmem:[%s9023_s2 + $0xe8] ss:$12 sps:$4 sm:$0xff] (!%p366_p9)   ;;  %v6706_v17 = vld [vmem:[%s9023_s2 + $0x100] ss:$12 sps:$4 sm:$0xff] (!%p366_p9)   ;;  %v6707_v18 = vld [vmem:[%s9023_s2 + $0x104] ss:$12 sps:$4 sm:$0xff] (!%p366_p9)  }
  0x16   : > { %v6704_v19 = vld [vmem:[%s9023_s2 + $0xfc] ss:$12 sps:$4 sm:$0xff] (!%p366_p9)   ;;  %v6710_v20 = vld [vmem:[%s9023_s2 + $0x118] ss:$12 sps:$4 sm:$0xff] (!%p366_p9)   ;;  %v6708_v22 = vld [vmem:[%s9023_s2 + $0x114] ss:$12 sps:$4 sm:$0xff] (!%p366_p9)  }
  0x17   : > { %v6711_v21 = vld [vmem:[%s9023_s2 + $0x11c] ss:$12 sps:$4 sm:$0xff] (!%p366_p9)   ;;  %v6715_v24 = vld [vmem:[%s9023_s2 + $0x134] ss:$12 sps:$4 sm:$0xff] (!%p366_p9)   ;;  %v6712_v25 = vld [vmem:[%s9023_s2 + $0x12c] ss:$12 sps:$4 sm:$0xff] (!%p366_p9)  }
  0x18   : > { %s407_s17 = scalar_select %p406_p10, %s7363_s25, 1  ;;  %v6714_v23 = vld [vmem:[%s9023_s2 + $0x130] ss:$12 sps:$4 sm:$0xff]   ;;  %v6718_v26 = vld [vmem:[%s9023_s2 + $0x148] ss:$12 sps:$4 sm:$0xff]   ;;  %vm753_vm2 = vcmask 982016  }
  0x19   : > { %v6719_v27 = vld [vmem:[%s9023_s2 + $0x14c] ss:$12 sps:$4 sm:$0xff]   ;;  %v6716_v28 = vld [vmem:[%s9023_s2 + $0x144] ss:$12 sps:$4 sm:$0xff]   ;;  %v5477_v29 = vld [vmem:[%s9023_s2 + $0x15c] sm:$0xff]  ;;  %vm7274_vm3 = vmmov 0  }
  0x1a   : > { %s6641_s20 = smul.u32 20, %s407_s17  ;;  %v5501_v30 = vcombine.high %v5477_v29, %v5477_v29  ;;  %v5500_v31 = vcombine.low %v5477_v29, %v5477_v29  ;;  %v6722_v32 = vld [vmem:[%s9023_s2 + $0x164] ss:$0 sps:$4 sm:$0xff]   ;;  %v6726_v37 = vld [vmem:[%s9023_s2 + $0x8] ss:$12 sps:$4 sm:$0xff]   ;;  %vm2174_vm4 = vcmask 1040384  }
  0x1b   : > { %v767_v34 = vsel %vm450_vm1, %v6722_v32, 0  ;;  %v6725_v35 = vld [vmem:[%s9023_s2 + $0x4] ss:$12 sps:$4 sm:$0xff]   ;;  %v6723_v45 = vld [vmem:[%s9023_s2] ss:$12 sps:$4 sm:$0xff]   ;;  %vm2170_vm5 = vcmask 146432  }
  0x1c   : > { %s7403_s29 = scalar_lea.vmem %s9038_s0, %s6641_s20  ;;  %v761_v33 = vsel %vm450_vm1, %v5500_v31, 0  ;;  %v6729_v48 = vld [vmem:[%s9023_s2 + $0x1c] ss:$12 sps:$4 sm:$0xff]   ;;  %v6730_v51 = vld [vmem:[%s9023_s2 + $0x20] ss:$12 sps:$4 sm:$0xff]   ;;  %vm2610_vm6 = vcmask 261120  }
  0x1d   : > { %v6685_v2 = vld [vmem:[%s7403_s29] sm:$0xff]   ;;  %v6686_v3 = vld [vmem:[%s7403_s29 + $0x8] sm:$0xff]   ;;  %v6687_v4 = vld [vmem:[%s7403_s29 + $0x10] ss:$0 sps:$4 sm:$0xff]   ;;  %vm4163_vm7 = vcmask 1042432   ;;  %vm4159_vm8 = vcmask 56320  }
  0x1e   : > { %6411 = vmatprep.subr.bf16.mxu1 %v6685_v2  ;;  %6401 = vmatprep.subr.bf16.mxu0 %v6685_v2  ;;  %v7416_v7 = vsel %vm450_vm1, %v6687_v4, 0  ;;  %v6727_v52 = vld [vmem:[%s9023_s2 + $0x18] ss:$12 sps:$4 sm:$0xff]   ;;  %v6733_v53 = vld [vmem:[%s9023_s2 + $0x34] ss:$12 sps:$4 sm:$0xff]   ;;  %vm4404_vm9 = vcmask 785408  }
  0x1f   : > { %6412 = vmatpush3.bf16.msra.mxu1 %v6685_v2  ;;  %6402 = vmatpush3.bf16.msra.mxu0 %v6685_v2  ;;  %v6734_v54 = vld [vmem:[%s9023_s2 + $0x38] ss:$12 sps:$4 sm:$0xff]   ;;  %v6731_v55 = vld [vmem:[%s9023_s2 + $0x30] ss:$12 sps:$4 sm:$0xff]   ;;  %v6735_v58 = vld [vmem:[%s9023_s2 + $0x48] ss:$12 sps:$4 sm:$0xff]  }
  0x20   : > { %6413 = vmatprep.subr.bf16.mxu1 %v6686_v3  ;;  %6403 = vmatprep.subr.bf16.mxu0 %v6686_v3  ;;  %v6737_v56 = vld [vmem:[%s9023_s2 + $0x4c] ss:$12 sps:$4 sm:$0xff]   ;;  %v6738_v57 = vld [vmem:[%s9023_s2 + $0x50] ss:$12 sps:$4 sm:$0xff]   ;;  %v6742_v60 = vld [vmem:[%s9023_s2 + $0x68] ss:$12 sps:$4 sm:$0xff]  }
  0x21   : > { %v6741_v59 = vld [vmem:[%s9023_s2 + $0x64] ss:$12 sps:$4 sm:$0xff]   ;;  %v6739_v61 = vld [vmem:[%s9023_s2 + $0x60] ss:$12 sps:$4 sm:$0xff]   ;;  %v6745_v62 = vld [vmem:[%s9023_s2 + $0x7c] ss:$12 sps:$4 sm:$0xff]  }
  0x22   : > { %v6746_v63 = vld [vmem:[%s9023_s2 + $0x80] ss:$12 sps:$4 sm:$0xff]   ;;  %v6743_v0 = vld [vmem:[%s9023_s2 + $0x78] ss:$12 sps:$4 sm:$0xff]   ;;  %v6775_v31 = vld [vmem:[%s9023_s2 + $0x1d0] ss:$12 sps:$4 sm:$0xff]  }
  0x23   : > { %6414 = vmatpush3.bf16.msra.mxu1 %v6686_v3  ;;  %6404 = vmatpush3.bf16.msra.mxu0 %v6686_v3  ;;  %v6749_v1 = vld [vmem:[%s9023_s2 + $0x94] ss:$12 sps:$4 sm:$0xff]   ;;  %v6750_v2 = vld [vmem:[%s9023_s2 + $0x98] ss:$12 sps:$4 sm:$0xff]   ;;  %v532_v3 = vld [vmem:[%s9023_s2 + $0xa8] sm:$0xff]  ;;  %vm5244_vm10 = vcmask 523264  }
  0x24   : > { %6632 = vmatprep.subr.msk.bf16.mxu1 %vm450_vm1, %v6687_v4  ;;  %6631 = vmatprep.subr.msk.bf16.mxu0 %vm450_vm1, %v6687_v4  ;;  %v6747_v4 = vld [vmem:[%s9023_s2 + $0x90] ss:$12 sps:$4 sm:$0xff]   ;;  %v6774_v29 = vld [vmem:[%s9023_s2 + $0x1cc] ss:$12 sps:$4 sm:$0xff]   ;;  %s404_s16 = sand.u32 1, %s7262_s22   ;;  %s6298_s17 = sshll.u32 %s7363_s25, 4 }
  0x25   : > { %s405_s18 = scalar_lea.vmem [#allocation2], %s404_s16  ;;  %s8979_s0 = scalar_lea.hbm %s9033_s12, %s6298_s17 }
  0x26   : > { %s5375_s19 = sshll.u32 %s405_s18, 4  ;;  %s5363_s30 = scalar_lea.sflag [#allocation3], %s404_s16  ;;  %s8981_s19 = int_to_ptr.vmem [resolvable:$true] %s5375_s19 }
  0x27   : > { %6416 = vmatpush3.bf16.msra.mxu1 %v7416_v7  ;;  %6406 = vmatpush3.bf16.msra.mxu0 %v7416_v7  ;;  %s7208_s26 = scalar_lea.vmem %s8981_s19, 16  ;;  %s7276_s25 = smov [#allocation2]  }
  0x28   : > { %769 = vmatprep.subr.bf16.mxu0 %v6694_v5  ;;  %6421 = vmatprep.subr.bf16.mxu1 %v6695_v6  ;;  %v5530_v5 = vcombine.high %v532_v3, %v532_v3  ;;  %p7209_p11 = scmp.ne.s32.totalorder %s8981_s19, %s7208_s26  ;;  %s7212_s28 = sshll.u32 %s7276_s25, 4  ;;  %s7213_s28 = int_to_ptr.vmem [resolvable:$false] %s7212_s28 }
  0x29   : > { %s7214_s15 = scalar_lea.vmem %s7213_s28, 32  ;;  %p7215_p0 = scmp.lt.s32.totalorder %s8981_s19, %s7213_s28 }
  0x2a   : > { %6418 = vmatmul.mubr.msk.bf16.vlgmr.msra.gmra.mrb[0].mxu1 %vm443_vm0, %v6689_v8  ;;  %6408 = vmatmul.mubr.msk.bf16.vlgmr.msra.gmra.mrb[0].mxu0 %vm443_vm0, %v6691_v9  ;;  %v6753_v8 = vld [vmem:[%s9023_s2 + $0xb0] ss:$0 sps:$4 sm:$0xff]   ;;  %p7210_p12 = pnand %p7209_p11, %p7380_p5  ;;  %p7216_p1 = scmp.lt.s32.totalorder %s7214_s15, %s7208_s26 }
  0x2b   : > { %770 = vmatpush1.bf16.msra.mxu0 %v6692_v10  ;;  %6422 = vmatpush3.bf16.msra.mxu1 %v6695_v6  ;;  %v5529_v6 = vcombine.low %v532_v3, %v532_v3  ;;  %v1001_v10 = vsel %vm450_vm1, %v6753_v8, 0 }
  0x2c   : > { %771 = vmatprep.subr.bf16.mxu0 %v6698_v11  ;;  %6423 = vmatprep.subr.bf16.mxu1 %v6699_v12  ;;  %v6754_v11 = vld [vmem:[%s9022_s1 + $0x18] sm:$0xff]   ;;  %p7211_p13 = pneg %p7210_p12  ;;  %p7217_p2 = por %p7216_p1, %p7215_p0 }
  0x2d   : > { %801 = vmatprep.mubr.bf16.mxu0 %v7272_v36  ;;  %v995_v9 = vsel %vm450_vm1, %v5529_v6, 0 }
  0x2e   : > { %p7218_p3 = pnand %p7217_p2, %p7211_p13 }
  0x2f   : > { %772 = vmatpush1.bf16.msra.mxu0 %v6696_v13  ;;  %6424 = vmatpush3.bf16.msra.mxu1 %v6699_v12  ;;  %v7588_v13 = vld [vmem:[%s7403_s29] sm:$0xff]  }
  0x30   : > { %773 = vmatprep.subr.bf16.mxu0 %v6702_v14  ;;  %6425 = vmatprep.subr.bf16.mxu1 %v6703_v15  ;;  %v7598_v14 = vld [vmem:[%s7403_s29 + $0x8] sm:$0xff]  }
  0x33   : > { %774 = vmatpush1.bf16.msra.mxu0 %v6700_v16  ;;  %6426 = vmatpush3.bf16.msra.mxu1 %v6703_v15  ;;  %v7603_v15 = vld [vmem:[%s7403_s29 + $0x10] ss:$0 sps:$4 sm:$0xff]   ;;  %v6755_v16 = vld [vmem:[%s9022_s1 + $0x20] ss:$0 sps:$4 sm:$0x11]  }
  0x34   : > { %775 = vmatprep.subr.bf16.mxu0 %v6706_v17  ;;  %6427 = vmatprep.subr.bf16.mxu1 %v6707_v18  ;;  %v6756_v17 = vld [vmem:[%s9023_s2 + $0x168] ss:$12 sps:$4 sm:$0xff]  }
  0x37   : > { %776 = vmatpush1.bf16.msra.mxu0 %v6704_v19  ;;  %6428 = vmatpush3.bf16.msra.mxu1 %v6707_v18  ;;  %v6758_v18 = vld [vmem:[%s9023_s2 + $0x16c] ss:$12 sps:$4 sm:$0xff]   ;;  %v6759_v19 = vld [vmem:[%s9023_s2 + $0x170] ss:$12 sps:$4 sm:$0xff]  }
  0x38   : > { %777 = vmatprep.subr.bf16.mxu0 %v6710_v20  ;;  %6429 = vmatprep.subr.bf16.mxu1 %v6711_v21  ;;  %v6762_v20 = vld [vmem:[%s9023_s2 + $0x184] ss:$12 sps:$4 sm:$0xff]  }
  0x3b   : > { %778 = vmatpush1.bf16.msra.mxu0 %v6708_v22  ;;  %6430 = vmatpush3.bf16.msra.mxu1 %v6711_v21  ;;  %v6763_v21 = vld [vmem:[%s9023_s2 + $0x188] ss:$12 sps:$4 sm:$0xff]   ;;  %v6760_v22 = vld [vmem:[%s9023_s2 + $0x180] ss:$12 sps:$4 sm:$0xff]  }
  0x3c   : > { %779 = vmatprep.subr.bf16.mxu0 %v6714_v23  ;;  %6431 = vmatprep.subr.bf16.mxu1 %v6715_v24  ;;  %v6766_v23 = vld [vmem:[%s9023_s2 + $0x19c] ss:$12 sps:$4 sm:$0xff]  }
  0x3f   : > { %780 = vmatpush1.bf16.msra.mxu0 %v6712_v25  ;;  %6432 = vmatpush3.bf16.msra.mxu1 %v6715_v24  ;;  %v6767_v24 = vld [vmem:[%s9023_s2 + $0x1a0] ss:$12 sps:$4 sm:$0xff]   ;;  %v6764_v25 = vld [vmem:[%s9023_s2 + $0x198] ss:$12 sps:$4 sm:$0xff]  }
  0x40   : > { %781 = vmatprep.subr.bf16.mxu0 %v6718_v26  ;;  %6433 = vmatprep.subr.bf16.mxu1 %v6719_v27  ;;  %v6770_v26 = vld [vmem:[%s9023_s2 + $0x1b4] ss:$12 sps:$4 sm:$0xff]  }
  0x43   : > { %782 = vmatpush1.bf16.msra.mxu0 %v6716_v28  ;;  %6434 = vmatpush3.bf16.msra.mxu1 %v6719_v27  ;;  %v6771_v27 = vld [vmem:[%s9023_s2 + $0x1b8] ss:$12 sps:$4 sm:$0xff]   ;;  %v6768_v28 = vld [vmem:[%s9023_s2 + $0x1b0] ss:$12 sps:$4 sm:$0xff]  }
  0x44   : > { %5503 = vmatprep.subr.msk.bf16.mxu0 %vm450_vm1, %v5501_v30  ;;  %6633 = vmatprep.subr.msk.bf16.mxu1 %vm450_vm1, %v6722_v32  ;;  %v6772_v30 = vld [vmem:[%s9023_s2 + $0x1c8] ss:$12 sps:$4 sm:$0xff]   ;;  %v6776_v32 = vld [vmem:[%s9023_s2 + $0x1e0] ss:$12 sps:$4 sm:$0xff]  }
  0x47   : > { %784 = vmatpush1.bf16.msra.mxu0 %v761_v33  ;;  %6436 = vmatpush3.bf16.msra.mxu1 %v767_v34  ;;  %v6778_v33 = vld [vmem:[%s9023_s2 + $0x1e4] ss:$12 sps:$4 sm:$0xff]   ;;  %v6779_v34 = vld [vmem:[%s9023_s2 + $0x1e8] ss:$12 sps:$4 sm:$0xff]  }
  0x48   : > { %1003 = vmatprep.subr.bf16.mxu0 %v6725_v35  ;;  %6441 = vmatprep.subr.bf16.mxu1 %v6726_v37  ;;  %v6782_v35 = vld [vmem:[%s9023_s2 + $0x1fc] ss:$12 sps:$4 sm:$0xff]  }
  0xfd   : > { %v6419_v38 = vpop.f32.mrb[0].mxu1  ;;  %v7503_v39 = vpop.f32.mrb[0].mxu0 }
  0xfe   : > { %v586_v40 = vpop.f32.mrb[1].mxu1  ;;  %v488_v41 = vpop.f32.mrb[1].mxu0  ;;  %v601_v50 = vpack.c.bf16 %v6419_v38, %v6419_v38  ;;  %v503_v12 = vpack.c.bf16 %v7503_v39, %v7503_v39  ;;  %v6783_v38 = vld [vmem:[%s9023_s2 + $0x200] ss:$12 sps:$4 sm:$0xff]   ;;  %v5572_v39 = vld [vmem:[%s9023_s2 + $0x210] sm:$0xff] }
  0xff   : > { %v6420_v42 = vpop.f32.mrb[2].mxu1  ;;  %v6410_v43 = vpop.f32.mrb[2].mxu0 }
 0x100   : > { %v589_v44 = vpop.f32.mrb[3].mxu1  ;;  %v491_v46 = vpop.f32.mrb[3].mxu0  ;;  %v6786_v42 = vld [vmem:[%s9023_s2 + $0x218] ss:$0 sps:$4 sm:$0xff]  }
 0x101   : > { %v600_v47 = vpack.c.bf16 %v589_v44, %v586_v40  ;;  %v7511_v49 = vpack.c.bf16 %v491_v46, %v488_v41  ;;  %v5596_v40 = vcombine.high %v5572_v39, %v5572_v39  ;;  %v5595_v41 = vcombine.low %v5572_v39, %v5572_v39 }
 0x102   : > { %v1334_v44 = vsel %vm450_vm1, %v6786_v42, 0 }
 0x103   : > { %5504 = vmatmul.mubr.msk.bf16.vlgmr.msra.gmra.mrb[4].mxu0 %vm753_vm2, %v600_v47  ;;  %6437 = vmatprep.mubr.msk.bf16.mxu1 %vm753_vm2, %v600_v47  ;;  %v1328_v43 = vsel %vm450_vm1, %v5595_v41, 0 }
 0x104   : > { %1004 = vmatpush1.bf16.msra.mxu0 %v6723_v45  ;;  %6438 = vmatmul.mubr.msk.bf16.vlgmr.msra.gmra.mrb[4].mxu1 %vm753_vm2, %v601_v50  ;;  %v6792_v45 = vld [vmem:[%s9023_s2 + $0x224] ss:$12 sps:$4 sm:$0xff]  }
 0x105   : > { %6442 = vmatpush3.bf16.msra.mxu1 %v6726_v37  ;;  %1005 = vmatprep.subr.bf16.mxu0 %v6729_v48  ;;  %v6780_v37 = vld [vmem:[%s9023_s2 + $0x1f8] ss:$12 sps:$4 sm:$0xff]  }
 0x106   : > { %6443 = vmatprep.subr.bf16.mxu1 %v6730_v51  ;;  %811 = vmatprep.mubr.bf16.mxu0 %v7272_v36 }
 0x107   : > { %6457 = vmatprep.mubr.msk.bf16.mxu1 %vm753_vm2, %v7511_v49 }
 0x108   : > { %1006 = vmatpush1.bf16.msra.mxu0 %v6727_v52 }
 0x109   : > { %6444 = vmatpush3.bf16.msra.mxu1 %v6730_v51  ;;  %1007 = vmatprep.subr.bf16.mxu0 %v6733_v53 }
 0x10a   : > { %6445 = vmatprep.subr.bf16.mxu1 %v6734_v54 }
 0x10b   : > { %5505 = vmatmul.mubr.msk.bf16.gmra.mrb[8].mxu0 %vm753_vm2, %v601_v50 }
 0x10c   : > { %1008 = vmatpush1.bf16.msra.mxu0 %v6731_v55  ;;  %1035 = vmatprep.mubr.bf16.mxu0 %v7272_v36 }
 0x10d   : > { %6446 = vmatpush3.bf16.msra.mxu1 %v6734_v54  ;;  %1009 = vmatprep.subr.bf16.mxu0 %v6737_v56 }
 0x10e   : > { %6447 = vmatprep.subr.bf16.mxu1 %v6738_v57 }
 0x110   : > { %1010 = vmatpush1.bf16.msra.mxu0 %v6735_v58 }
 0x111   : > { %6448 = vmatpush3.bf16.msra.mxu1 %v6738_v57  ;;  %1011 = vmatprep.subr.bf16.mxu0 %v6741_v59 }
 0x112   : > { %6449 = vmatprep.subr.bf16.mxu1 %v6742_v60 }
 0x114   : > { %1012 = vmatpush1.bf16.msra.mxu0 %v6739_v61 }
 0x115   : > { %6450 = vmatpush3.bf16.msra.mxu1 %v6742_v60  ;;  %1013 = vmatprep.subr.bf16.mxu0 %v6745_v62 }
 0x116   : > { %6451 = vmatprep.subr.bf16.mxu1 %v6746_v63 }
 0x118   : > { %1014 = vmatpush1.bf16.msra.mxu0 %v6743_v0 }
 0x119   : > { %6452 = vmatpush3.bf16.msra.mxu1 %v6746_v63  ;;  %1015 = vmatprep.subr.bf16.mxu0 %v6749_v1 }
 0x11a   : > { %6453 = vmatprep.subr.bf16.mxu1 %v6750_v2 }
 0x11c   : > { %1016 = vmatpush1.bf16.msra.mxu0 %v6747_v4 }
 0x11d   : > { %6454 = vmatpush3.bf16.msra.mxu1 %v6750_v2  ;;  %5532 = vmatprep.subr.msk.bf16.mxu0 %vm450_vm1, %v5530_v5 }
 0x11e   : > { %6634 = vmatprep.subr.msk.bf16.mxu1 %vm450_vm1, %v6753_v8 }
 0x120   : > { %1018 = vmatpush1.bf16.msra.mxu0 %v995_v9 }
 0x121   : > { %6456 = vmatpush3.bf16.msra.mxu1 %v1001_v10  ;;  %1336 = vmatprep.subr.bf16.mxu0 %v6758_v18  ;;  %v6796_v10 = vld [vmem:[%s9023_s2 + $0x23c] ss:$12 sps:$4 sm:$0xff]  }
 0x122   : > { %6461 = vmatprep.subr.bf16.mxu1 %v7588_v13  ;;  %v6789_v18 = vld [vmem:[%s9023_s2 + $0x21c] ss:$12 sps:$4 sm:$0xff]  }
 0x123   : > { %5533 = vmatmul.mubr.msk.bf16.vlgmr.msra.gmra.mrb[4].mxu0 %vm753_vm2, %v7511_v49 }
 0x124   : > { %6458 = vmatmul.mubr.msk.bf16.vlgmr.msra.gmra.mrb[8].mxu1 %vm753_vm2, %v503_v12  ;;  %1045 = vmatprep.mubr.bf16.mxu0 %v7272_v36 }
 0x125   : > { %6462 = vmatpush3.bf16.msra.mxu1 %v7588_v13  ;;  %6467 = vmatprep.mubr.msk.bf16.mxu1 %vm443_vm0, %v6754_v11  ;;  %v6800_v11 = vld [vmem:[%s9023_s2 + $0x254] ss:$12 sps:$4 sm:$0xff]  }
 0x126   : > { %6463 = vmatprep.subr.bf16.mxu1 %v7598_v14  ;;  %1337 = vmatpush1.bf16.msra.mxu0 %v6756_v17  ;;  %v6788_v17 = vld [vmem:[%s9022_s1 + $0x2c] ss:$0 sps:$4 sm:$0x11]  }
 0x127   : > { %1338 = vmatprep.subr.bf16.mxu0 %v6762_v20  ;;  %v6793_v20 = vld [vmem:[%s9023_s2 + $0x234] ss:$12 sps:$4 sm:$0xff]  }
 0x129   : > { %6464 = vmatpush3.bf16.msra.mxu1 %v7598_v14 }
 0x12a   : > { %6635 = vmatprep.subr.msk.bf16.mxu1 %vm450_vm1, %v7603_v15  ;;  %1339 = vmatpush1.bf16.msra.mxu0 %v6760_v22  ;;  %v6797_v22 = vld [vmem:[%s9023_s2 + $0x24c] ss:$12 sps:$4 sm:$0xff]  }
 0x12b   : > { %5534 = vmatmul.mubr.msk.bf16.gmra.mrb[12].mxu0 %vm753_vm2, %v503_v12  ;;  %1340 = vmatprep.subr.bf16.mxu0 %v6766_v23  ;;  %v6787_v12 = vld [vmem:[%s9022_s1 + $0x24] sm:$0xff]  }
 0x12c   : > { %1368 = vmatprep.mubr.bf16.mxu0 %v7272_v36  ;;  %v6803_v23 = vld [vmem:[%s9023_s2 + $0x268] ss:$12 sps:$4 sm:$0xff]  }
 0x12d   : > { %6466 = vmatpush3.bf16.msra.mxu1 %v7416_v7 }
 0x12e   : > { %6471 = vmatprep.subr.bf16.mxu1 %v6759_v19  ;;  %1341 = vmatpush1.bf16.msra.mxu0 %v6764_v25  ;;  %v6801_v25 = vld [vmem:[%s9023_s2 + $0x264] ss:$12 sps:$4 sm:$0xff]  }
 0x12f   : > { %1342 = vmatprep.subr.bf16.mxu0 %v6770_v26  ;;  %v6807_v26 = vld [vmem:[%s9023_s2 + $0x280] ss:$12 sps:$4 sm:$0xff]  }
 0x130   : > { %6468 = vmatmul.mubr.msk.bf16.vlgmr.msra.gmra.mrb[12].mxu1 %vm443_vm0, %v6755_v16  ;;  %v6791_v16 = vld [vmem:[%s9023_s2 + $0x220] ss:$12 sps:$4 sm:$0xff]  }
 0x131   : > { %6472 = vmatpush3.bf16.msra.mxu1 %v6759_v19  ;;  %v6795_v19 = vld [vmem:[%s9023_s2 + $0x238] ss:$12 sps:$4 sm:$0xff]  }
 0x132   : > { %6473 = vmatprep.subr.bf16.mxu1 %v6763_v21  ;;  %1343 = vmatpush1.bf16.msra.mxu0 %v6768_v28  ;;  %v6805_v28 = vld [vmem:[%s9023_s2 + $0x27c] ss:$12 sps:$4 sm:$0xff]  }
 0x133   : > { %1344 = vmatprep.subr.bf16.mxu0 %v6774_v29  ;;  %v6811_v29 = vld [vmem:[%s9023_s2 + $0x298] ss:$12 sps:$4 sm:$0xff]  }
 0x135   : > { %6474 = vmatpush3.bf16.msra.mxu1 %v6763_v21  ;;  %v6799_v21 = vld [vmem:[%s9023_s2 + $0x250] ss:$12 sps:$4 sm:$0xff]  }
 0x136   : > { %6475 = vmatprep.subr.bf16.mxu1 %v6767_v24  ;;  %1345 = vmatpush1.bf16.msra.mxu0 %v6772_v30  ;;  %v6812_v30 = vld [vmem:[%s9023_s2 + $0x29c] ss:$12 sps:$4 sm:$0xff]  }
 0x137   : > { %1346 = vmatprep.subr.bf16.mxu0 %v6778_v33  ;;  %v6815_v33 = vld [vmem:[%s9023_s2 + $0x2b0] ss:$12 sps:$4 sm:$0xff]  }
 0x139   : > { %6476 = vmatpush3.bf16.msra.mxu1 %v6767_v24  ;;  %v6804_v24 = vld [vmem:[%s9023_s2 + $0x26c] ss:$12 sps:$4 sm:$0xff]  }
 0x13a   : > { %6477 = vmatprep.subr.bf16.mxu1 %v6771_v27  ;;  %1347 = vmatpush1.bf16.msra.mxu0 %v6776_v32  ;;  %v6813_v32 = vld [vmem:[%s9023_s2 + $0x2ac] ss:$12 sps:$4 sm:$0xff]  }
 0x13b   : > { %1348 = vmatprep.subr.bf16.mxu0 %v6782_v35  ;;  %v5638_v35 = vld [vmem:[%s9023_s2 + $0x2c4] sm:$0xff] }
 0x13c   : > { %v5661_v39 = vcombine.low %v5638_v35, %v5638_v35 }
 0x13d   : > { %6478 = vmatpush3.bf16.msra.mxu1 %v6771_v27  ;;  %v6808_v27 = vld [vmem:[%s9023_s2 + $0x284] ss:$12 sps:$4 sm:$0xff]  }
 0x13e   : > { %6479 = vmatprep.subr.bf16.mxu1 %v6775_v31  ;;  %1349 = vmatpush1.bf16.msra.mxu0 %v6780_v37  ;;  %v5662_v37 = vcombine.high %v5638_v35, %v5638_v35 }
 0x13f   : > { %5598 = vmatprep.subr.msk.bf16.mxu0 %vm450_vm1, %v5596_v40  ;;  %v1670_v40 = vsel %vm450_vm1, %v5661_v39, 0 }
 0x141   : > { %6480 = vmatpush3.bf16.msra.mxu1 %v6775_v31  ;;  %v6809_v31 = vld [vmem:[%s9023_s2 + $0x294] ss:$12 sps:$4 sm:$0xff]  }
 0x142   : > { %6481 = vmatprep.subr.bf16.mxu1 %v6779_v34  ;;  %1351 = vmatpush1.bf16.msra.mxu0 %v1328_v43 }
 0x143   : > { %6491 = vmatprep.subr.bf16.mxu0 %v7588_v13 }
 0x145   : > { %6482 = vmatpush3.bf16.msra.mxu1 %v6779_v34  ;;  %v6816_v34 = vld [vmem:[%s9023_s2 + $0x2b4] ss:$12 sps:$4 sm:$0xff]  }
 0x146   : > { %6483 = vmatprep.subr.bf16.mxu1 %v6783_v38 }
 0x149   : > { %6484 = vmatpush3.bf16.msra.mxu1 %v6783_v38  ;;  %v6818_v38 = vld [vmem:[%s9023_s2 + $0x2cc] ss:$0 sps:$4 sm:$0xff]  }
 0x14a   : > { %6636 = vmatprep.subr.msk.bf16.mxu1 %vm450_vm1, %v6786_v42  ;;  %v1676_v41 = vsel %vm450_vm1, %v6818_v38, 0  ;;  %v6824_v42 = vld [vmem:[%s9023_s2 + $0x2d4] ss:$12 sps:$4 sm:$0xff]  }
 0x14d   : > { %6486 = vmatpush3.bf16.msra.mxu1 %v1334_v44 }
 0x14e   : > { %6501 = vmatprep.subr.bf16.mxu1 %v6792_v45 }
 0x1d7   : > { %v6439_v46 = vpop.f32.mrb[4].mxu1 }
 0x1d8   : > { %v854_v47 = vpop.f32.mrb[5].mxu1 }
 0x1d9   : > { %v6440_v48 = vpop.f32.mrb[6].mxu1 }
 0x1da   : > { %v857_v49 = vpop.f32.mrb[7].mxu1 }
 0x1de   : > { %v813_v50 = vpop.f32.mrb[8].mxu0 }
 0x1df   : > { %v815_v51 = vpop.f32.mrb[9].mxu0 }
 0x1e0   : > { %v817_v52 = vpop.f32.mrb[10].mxu0 }
 0x1e1   : > { %v818_v53 = vpop.f32.mrb[11].mxu0 }
 0x1f7   : > { %v6459_v54 = vpop.f32.mrb[8].mxu1 }
 0x1f8   : > { %v7691_v55 = vadd.f32 %v6459_v54, %v6439_v46  ;;  %v1088_v56 = vpop.f32.mrb[9].mxu1 }
 0x1f9   : > { %v7693_v57 = vadd.f32 %v1088_v56, %v854_v47  ;;  %v6460_v58 = vpop.f32.mrb[10].mxu1 }
 0x1fa   : > { %v1091_v59 = vpop.f32.mrb[11].mxu1 }
 0x1fb   : > { %v7695_v60 = vadd.f32 %v1091_v59, %v857_v49 }
 0x1fe   : > { %v1047_v61 = vpop.f32.mrb[12].mxu0 }
 0x1ff   : > { %v7697_v62 = vadd.f32 %v1047_v61, %v813_v50  ;;  %v1049_v63 = vpop.f32.mrb[13].mxu0 }
 0x200   : > { %v7699_v0 = vadd.f32 %v1049_v63, %v815_v51  ;;  %v1051_v1 = vpop.f32.mrb[14].mxu0 }
 0x201   : > { %v1052_v2 = vpop.f32.mrb[15].mxu0  ;;  %v6826_v1 = vld [vmem:[%s9023_s2 + $0x2e8] ss:$12 sps:$4 sm:$0xff]  }
 0x202   : > { %v6832_v2 = vld [vmem:[%s9023_s2 + $0x304] ss:$12 sps:$4 sm:$0xff]  }
 0x203   : > { %v6469_v3 = vpop.f32.mrb[12].mxu1 }
 0x204   : > { %v1154_v4 = vpop.f32.mrb[13].mxu1  ;;  %v1169_v9 = vpack.c.bf16 %v6469_v3, %v6469_v3  ;;  %v6830_v3 = vld [vmem:[%s9023_s2 + $0x300] ss:$12 sps:$4 sm:$0xff]  }
 0x205   : > { %v6470_v5 = vpop.f32.mrb[14].mxu1 }
 0x206   : > { %v1157_v6 = vpop.f32.mrb[15].mxu1  ;;  %v6834_v5 = vld [vmem:[%s9023_s2 + $0x318] ss:$12 sps:$4 sm:$0xff]  }
 0x207   : > { %v1168_v8 = vpack.c.bf16 %v1157_v6, %v1154_v4  ;;  %v6836_v4 = vld [vmem:[%s9023_s2 + $0x31c] ss:$12 sps:$4 sm:$0xff]  }
 0x208   : > { %v6833_v6 = vld [vmem:[%s9023_s2 + $0x308] ss:$12 sps:$4 sm:$0xff]  }
 0x209   : > { %5599 = vmatmul.mubr.msk.bf16.vlgmr.msra.gmra.mrb[4].mxu0 %vm753_vm2, %v1168_v8  ;;  %6487 = vmatprep.mubr.msk.bf16.mxu1 %vm753_vm2, %v1168_v8  ;;  %v6840_v8 = vld [vmem:[%s9023_s2 + $0x334] ss:$12 sps:$4 sm:$0xff]  }
 0x20a   : > { %6488 = vmatmul.mubr.msk.bf16.vlgmr.msra.gmra.mrb[16].mxu1 %vm753_vm2, %v1169_v9  ;;  %6492 = vmatpush3.bf16.msra.mxu0 %v7588_v13 }
 0x20b   : > { %1378 = vmatprep.mubr.bf16.mxu0 %v7272_v36  ;;  %6493 = vmatprep.subr.bf16.mxu0 %v7598_v14 }
 0x20c   : > { %6502 = vmatpush3.bf16.msra.mxu1 %v6792_v45 }
 0x20d   : > { %6503 = vmatprep.subr.bf16.mxu1 %v6796_v10 }
 0x20e   : > { %6494 = vmatpush3.bf16.msra.mxu0 %v7598_v14 }
 0x20f   : > { %6637 = vmatprep.subr.msk.bf16.mxu0 %vm450_vm1, %v7603_v15 }
 0x210   : > { %6504 = vmatpush3.bf16.msra.mxu1 %v6796_v10  ;;  %v6841_v10 = vld [vmem:[%s9023_s2 + $0x338] ss:$12 sps:$4 sm:$0xff]  }
 0x211   : > { %5600 = vmatmul.mubr.msk.bf16.gmra.mrb[16].mxu0 %vm753_vm2, %v1169_v9  ;;  %6505 = vmatprep.subr.bf16.mxu1 %v6800_v11  ;;  %v6838_v9 = vld [vmem:[%s9023_s2 + $0x330] ss:$12 sps:$4 sm:$0xff]  }
 0x212   : > { %6496 = vmatpush3.bf16.msra.mxu0 %v7416_v7  ;;  %6497 = vmatprep.mubr.msk.bf16.mxu0 %vm443_vm0, %v6787_v12  ;;  %v6844_v12 = vld [vmem:[%s9023_s2 + $0x34c] ss:$12 sps:$4 sm:$0xff]  }
 0x213   : > { %1678 = vmatprep.subr.bf16.mxu0 %v6791_v16  ;;  %v6845_v16 = vld [vmem:[%s9023_s2 + $0x350] ss:$12 sps:$4 sm:$0xff]  }
 0x214   : > { %6506 = vmatpush3.bf16.msra.mxu1 %v6800_v11  ;;  %v6842_v11 = vld [vmem:[%s9023_s2 + $0x348] ss:$12 sps:$4 sm:$0xff]  }
 0x215   : > { %6507 = vmatprep.subr.bf16.mxu1 %v6804_v24 }
 0x218   : > { %6508 = vmatpush3.bf16.msra.mxu1 %v6804_v24 }
 0x219   : > { %6498 = vmatmul.mubr.msk.bf16.vlgmr.msra.gmra.mrb[20].mxu0 %vm443_vm0, %v6788_v17  ;;  %6509 = vmatprep.subr.bf16.mxu1 %v6808_v27  ;;  %v6848_v17 = vld [vmem:[%s9023_s2 + $0x364] ss:$12 sps:$4 sm:$0xff]  }
 0x21a   : > { %1679 = vmatpush1.bf16.msra.mxu0 %v6789_v18  ;;  %1710 = vmatprep.mubr.bf16.mxu0 %v7272_v36  ;;  %v6846_v18 = vld [vmem:[%s9023_s2 + $0x360] ss:$12 sps:$4 sm:$0xff]  }
 0x21b   : > { %1680 = vmatprep.subr.bf16.mxu0 %v6795_v19  ;;  %v6849_v19 = vld [vmem:[%s9023_s2 + $0x368] ss:$12 sps:$4 sm:$0xff]  }
 0x21c   : > { %6510 = vmatpush3.bf16.msra.mxu1 %v6808_v27 }
 0x21d   : > { %6511 = vmatprep.subr.bf16.mxu1 %v6812_v30 }
 0x21e   : > { %1681 = vmatpush1.bf16.msra.mxu0 %v6793_v20  ;;  %v5704_v20 = vld [vmem:[%s9023_s2 + $0x378] sm:$0xff] }
 0x21f   : > { %1682 = vmatprep.subr.bf16.mxu0 %v6799_v21  ;;  %v5728_v21 = vcombine.high %v5704_v20, %v5704_v20 }
 0x220   : > { %6512 = vmatpush3.bf16.msra.mxu1 %v6812_v30 }
 0x221   : > { %6513 = vmatprep.subr.bf16.mxu1 %v6816_v34 }
 0x222   : > { %1683 = vmatpush1.bf16.msra.mxu0 %v6797_v22  ;;  %v5727_v22 = vcombine.low %v5704_v20, %v5704_v20 }
 0x223   : > { %1684 = vmatprep.subr.bf16.mxu0 %v6803_v23  ;;  %v6852_v23 = vld [vmem:[%s9023_s2 + $0x380] ss:$0 sps:$4 sm:$0xff]  }
 0x224   : > { %6514 = vmatpush3.bf16.msra.mxu1 %v6816_v34  ;;  %v2012_v24 = vsel %vm450_vm1, %v5727_v22, 0 }
 0x225   : > { %6638 = vmatprep.subr.msk.bf16.mxu1 %vm450_vm1, %v6818_v38 }
 0x226   : > { %1685 = vmatpush1.bf16.msra.mxu0 %v6801_v25  ;;  %v2018_v25 = vsel %vm450_vm1, %v6852_v23, 0 }
 0x227   : > { %1686 = vmatprep.subr.bf16.mxu0 %v6807_v26 }
 0x228   : > { %6516 = vmatpush3.bf16.msra.mxu1 %v1676_v41 }
 0x229   : > { %6521 = vmatprep.subr.bf16.mxu1 %v7588_v13 }
 0x22a   : > { %1687 = vmatpush1.bf16.msra.mxu0 %v6805_v28 }
 0x22b   : > { %1688 = vmatprep.subr.bf16.mxu0 %v6811_v29 }
 0x22e   : > { %1689 = vmatpush1.bf16.msra.mxu0 %v6809_v31 }
 0x22f   : > { %1690 = vmatprep.subr.bf16.mxu0 %v6815_v33 }
 0x232   : > { %1691 = vmatpush1.bf16.msra.mxu0 %v6813_v32 }
 0x233   : > { %5664 = vmatprep.subr.msk.bf16.mxu0 %vm450_vm1, %v5662_v37 }
 0x236   : > { %1693 = vmatpush1.bf16.msra.mxu0 %v1670_v40 }
 0x237   : > { %2020 = vmatprep.subr.bf16.mxu0 %v6824_v42 }
 0x2dd   : > { %v6489_v43 = vpop.f32.mrb[16].mxu1 }
 0x2de   : > { %v7796_v44 = vadd.f32 %v6489_v43, %v7691_v55  ;;  %v1421_v45 = vpop.f32.mrb[17].mxu1 }
 0x2df   : > { %v7799_v46 = vadd.f32 %v1421_v45, %v7693_v57  ;;  %v6490_v47 = vpop.f32.mrb[18].mxu1 }
 0x2e0   : > { %v1424_v48 = vpop.f32.mrb[19].mxu1  ;;  %v2130_v47 = vlaneseq }
 0x2e1   : > { %v7802_v49 = vadd.f32 %v1424_v48, %v7695_v60  ;;  %v6820_v60 = vld [vmem:[%s9022_s1 + $0x30] sm:$0xff]  }
 0x2e2   : > { %v7914_v48 = vshrl.u32 %v2130_v47, 7  ;;  %v6867_v47 = vld [vmem:[%s9026_s5 + $0x164] ss:$8 sps:$4 sm:$0xff]  }
 0x2e4   : > { %v1380_v50 = vpop.f32.mrb[16].mxu0 }
 0x2e5   : > { %v7805_v51 = vadd.f32 %v1380_v50, %v7697_v62  ;;  %v1382_v52 = vpop.f32.mrb[17].mxu0  ;;  %v6822_v62 = vld [vmem:[%s9023_s2 + $0x2d0] ss:$12 sps:$4 sm:$0xff]   ;;  %v2128_v50 = vld [vmem:[%s9024_s3] sm:$0x7] }
 0x2e6   : > { %v7808_v53 = vadd.f32 %v1382_v52, %v7699_v0  ;;  %v1384_v54 = vpop.f32.mrb[18].mxu0  ;;  %v6828_v0 = vld [vmem:[%s9023_s2 + $0x2ec] ss:$12 sps:$4 sm:$0xff]   ;;  %v2140_v52 = vsub.s32 2, %v7914_v48 }
 0x2e7   : > { %v1385_v55 = vpop.f32.mrb[19].mxu0 }
 0x2ec   : > { %v6499_v56 = vpop.f32.mrb[20].mxu0 }
 0x2ed   : > { %v1496_v58 = vpop.f32.mrb[21].mxu0  ;;  %v1511_v63 = vpack.c.bf16 %v6499_v56, %v6499_v56  ;;  %v2141_v56 = vrot.slane %v2128_v50, %v2140_v52  ;;  %v6870_v52 = vld [vmem:[%s9026_s5 + $0x174] ss:$8 sps:$4 sm:$0xff]  }
 0x2ee   : > { %v6500_v59 = vpop.f32.mrb[22].mxu0 }
 0x2ef   : > { %v1499_v57 = vpop.f32.mrb[23].mxu0 }
 0x2f0   : > { %v1510_v61 = vpack.c.bf16 %v1499_v57, %v1496_v58 }
 0x2f2   : > { %5665 = vmatmul.mubr.msk.bf16.vlgmr.msra.gmra.mrb[4].mxu0 %vm753_vm2, %v1510_v61  ;;  %6517 = vmatprep.mubr.msk.bf16.mxu1 %vm753_vm2, %v1510_v61 }
 0x2f3   : > { %6518 = vmatmul.mubr.msk.bf16.vlgmr.msra.gmra.mrb[20].mxu1 %vm753_vm2, %v1511_v63  ;;  %1720 = vmatprep.mubr.bf16.mxu0 %v7272_v36 }
 0x2f4   : > { %6522 = vmatpush3.bf16.msra.mxu1 %v7588_v13  ;;  %6527 = vmatprep.mubr.msk.bf16.mxu1 %vm443_vm0, %v6820_v60  ;;  %v6825_v13 = vld [vmem:[%s9023_s2 + $0x2d8] ss:$12 sps:$4 sm:$0xff]  }
 0x2f5   : > { %6523 = vmatprep.subr.bf16.mxu1 %v7598_v14  ;;  %2021 = vmatpush1.bf16.msra.mxu0 %v6822_v62 }
 0x2f6   : > { %2022 = vmatprep.subr.bf16.mxu0 %v6828_v0 }
 0x2f8   : > { %6524 = vmatpush3.bf16.msra.mxu1 %v7598_v14  ;;  %v6821_v14 = vld [vmem:[%s9022_s1 + $0x38] ss:$0 sps:$4 sm:$0x11]  }
 0x2f9   : > { %6639 = vmatprep.subr.msk.bf16.mxu1 %vm450_vm1, %v7603_v15  ;;  %2023 = vmatpush1.bf16.msra.mxu0 %v6826_v1  ;;  %v6829_v15 = vld [vmem:[%s9023_s2 + $0x2f0] ss:$12 sps:$4 sm:$0xff]  }
 0x2fa   : > { %5666 = vmatmul.mubr.msk.bf16.gmra.mrb[24].mxu0 %vm753_vm2, %v1511_v63  ;;  %2024 = vmatprep.subr.bf16.mxu0 %v6832_v2 }
 0x2fb   : > { %2052 = vmatprep.mubr.bf16.mxu0 %v7272_v36 }
 0x2fc   : > { %6526 = vmatpush3.bf16.msra.mxu1 %v7416_v7  ;;  %v6837_v7 = vld [vmem:[%s9023_s2 + $0x320] ss:$12 sps:$4 sm:$0xff]  }
 0x2fd   : > { %6531 = vmatprep.subr.bf16.mxu1 %v6825_v13  ;;  %2025 = vmatpush1.bf16.msra.mxu0 %v6830_v3 }
 0x2fe   : > { %2026 = vmatprep.subr.bf16.mxu0 %v6836_v4 }
 0x2ff   : > { %6528 = vmatmul.mubr.msk.bf16.vlgmr.msra.gmra.mrb[24].mxu1 %vm443_vm0, %v6821_v14 }
 0x300   : > { %6532 = vmatpush3.bf16.msra.mxu1 %v6825_v13 }
 0x301   : > { %6533 = vmatprep.subr.bf16.mxu1 %v6829_v15  ;;  %2027 = vmatpush1.bf16.msra.mxu0 %v6834_v5 }
 0x302   : > { %2028 = vmatprep.subr.bf16.mxu0 %v6840_v8 }
 0x304   : > { %6534 = vmatpush3.bf16.msra.mxu1 %v6829_v15 }
 0x305   : > { %6535 = vmatprep.subr.bf16.mxu1 %v6833_v6  ;;  %2029 = vmatpush1.bf16.msra.mxu0 %v6838_v9 }
 0x306   : > { %2030 = vmatprep.subr.bf16.mxu0 %v6844_v12 }
 0x308   : > { %6536 = vmatpush3.bf16.msra.mxu1 %v6833_v6 }
 0x309   : > { %6537 = vmatprep.subr.bf16.mxu1 %v6837_v7  ;;  %2031 = vmatpush1.bf16.msra.mxu0 %v6842_v11 }
 0x30a   : > { %2032 = vmatprep.subr.bf16.mxu0 %v6848_v17 }
 0x30c   : > { %6538 = vmatpush3.bf16.msra.mxu1 %v6837_v7 }
 0x30d   : > { %6539 = vmatprep.subr.bf16.mxu1 %v6841_v10  ;;  %2033 = vmatpush1.bf16.msra.mxu0 %v6846_v18 }
 0x30e   : > { %5730 = vmatprep.subr.msk.bf16.mxu0 %vm450_vm1, %v5728_v21 }
 0x310   : > { %6540 = vmatpush3.bf16.msra.mxu1 %v6841_v10 }
 0x311   : > { %6541 = vmatprep.subr.bf16.mxu1 %v6845_v16  ;;  %2035 = vmatpush1.bf16.msra.mxu0 %v2012_v24 }
 0x314   : > { %6542 = vmatpush3.bf16.msra.mxu1 %v6845_v16 }
 0x315   : > { %6543 = vmatprep.subr.bf16.mxu1 %v6849_v19 }
 0x318   : > { %6544 = vmatpush3.bf16.msra.mxu1 %v6849_v19 }
 0x319   : > { %6640 = vmatprep.subr.msk.bf16.mxu1 %vm450_vm1, %v6852_v23 }
 0x31c   : > { %6546 = vmatpush3.bf16.msra.mxu1 %v2018_v25 }
 0x3c6   : > { %v6519_v26 = vpop.f32.mrb[20].mxu1 }
 0x3c7   : > { %v1785_v27 = vadd.f32 %v6519_v26, %v7796_v44  ;;  %v1763_v28 = vpop.f32.mrb[21].mxu1 }
 0x3c8   : > { %v1779_v29 = vadd.f32 %v1763_v28, %v7799_v46  ;;  %v6520_v30 = vpop.f32.mrb[22].mxu1  ;;  %v7273_v46 = vmov 0.0  }
 0x3c9   : > { %v1766_v31 = vpop.f32.mrb[23].mxu1  ;;  %6551 = vmatprep.subr.bf16.mxu1 %v7273_v46 }
 0x3ca   : > { %v1782_v32 = vadd.f32 %v1766_v31, %v7802_v49  ;;  %v2132_v49 = vsub.s32 0, %v7914_v48 }
 0x3cd   : > { %v1722_v33 = vpop.f32.mrb[24].mxu0 }
 0x3ce   : > { %v1783_v34 = vadd.f32 %v1722_v33, %v7805_v51  ;;  %v1724_v35 = vpop.f32.mrb[25].mxu0  ;;  %v2136_v51 = vsub.s32 1, %v7914_v48 }
 0x3cf   : > { %v1784_v37 = vadd.f32 %v1724_v35, %v7808_v53  ;;  %v1726_v38 = vpop.f32.mrb[26].mxu0  ;;  %v2133_v53 = vrot.slane %v2128_v50, %v2132_v49  ;;  %v2169_v35 = vld [vmem:[%s9025_s4] sm:$0xf] }
 0x3d0   : > { %v1727_v39 = vpop.f32.mrb[27].mxu0  ;;  %v2137_v54 = vrot.slane %v2128_v50, %v2136_v51  ;;  %v5738_v38 = vld [vmem:[%s9025_s4 + $0x4] sm:$0xf]  ;;  %v6865_v50 = vld [vmem:[%s9026_s5 + $0x160] ss:$8 sps:$4 sm:$0xff]  }
 0x3d1   : > { %v6853_v39 = vld [vmem:[%s9026_s5 + $0x120] ss:$8 sps:$4 sm:$0xff]  }
 0x3d2   : > { %v6529_v40 = vpop.f32.mrb[24].mxu1 }
 0x3d3   : > { %v1838_v41 = vpop.f32.mrb[25].mxu1  ;;  %v1853_v45 = vpack.c.bf16 %v6529_v40, %v6529_v40  ;;  %v6858_v40 = vld [vmem:[%s9026_s5 + $0x134] ss:$8 sps:$4 sm:$0xff]  }
 0x3d4   : > { %v6530_v42 = vpop.f32.mrb[26].mxu1 }
 0x3d5   : > { %v1841_v43 = vpop.f32.mrb[27].mxu1  ;;  %v6861_v42 = vld [vmem:[%s9026_s5 + $0x144] ss:$8 sps:$4 sm:$0xff]  }
 0x3d6   : > { %v1852_v44 = vpack.c.bf16 %v1841_v43, %v1838_v41  ;;  %v6856_v41 = vld [vmem:[%s9026_s5 + $0x130] ss:$8 sps:$4 sm:$0xff]   ;;  %v6859_v43 = vld [vmem:[%s9026_s5 + $0x140] ss:$8 sps:$4 sm:$0xff]  }
 0x3d8   : > { %5731 = vmatmul.mubr.msk.bf16.vlgmr.msra.gmra.mrb[4].mxu0 %vm753_vm2, %v1852_v44  ;;  %6547 = vmatprep.mubr.msk.bf16.mxu1 %vm753_vm2, %v1852_v44  ;;  %v6864_v44 = vld [vmem:[%s9026_s5 + $0x154] ss:$8 sps:$4 sm:$0xff]  }
 0x3d9   : > { %6548 = vmatmul.mubr.msk.bf16.vlgmr.msra.gmra.mrb[28].mxu1 %vm753_vm2, %v1853_v45  ;;  %2062 = vmatprep.mubr.bf16.mxu0 %v7272_v36 }
 0x3da   : > { %6555 = vmatprep.mubr.msk.bf16.mxu1 %vm7274_vm3, %v7273_v46 }
 0x3e0   : > { %5732 = vmatmul.mubr.msk.bf16.gmra.mrb[28].mxu0 %vm753_vm2, %v1853_v45  ;;  %v6862_v45 = vld [vmem:[%s9026_s5 + $0x150] ss:$8 sps:$4 sm:$0xff]  }
 0x3e1   : > { %2216 = vmatprep.mubr.bf16.mxu0 %v7272_v36 }
 0x4ab   : > { %v2054_v55 = vpop.f32.mrb[4].mxu0 }
 0x4ac   : > { %v2145_v58 = vadd.f32 %v2133_v53, %v2054_v55  ;;  %v2056_v59 = vpop.f32.mrb[5].mxu0  ;;  %v6549_v57 = vpop.f32.mrb[28].mxu1  ;;  %v6871_v55 = vld [vmem:[%s9026_s5 + $0x180] ss:$8 sps:$4 sm:$0xff]  }
 0x4ad   : > { %v2146_v61 = vadd.f32 %v2137_v54, %v2056_v59  ;;  %v2127_v60 = vadd.f32 %v6549_v57, %v1785_v27  ;;  %v2058_v63 = vpop.f32.mrb[6].mxu0  ;;  %v2105_v62 = vpop.f32.mrb[29].mxu1  ;;  %v6879_v59 = vld [vmem:[%s9026_s5 + $0x1a4] ss:$8 sps:$4 sm:$0xff]   ;;  %v6877_v57 = vld [vmem:[%s9026_s5 + $0x1a0] ss:$8 sps:$4 sm:$0xff]  }
 0x4ae   : > { %v2148_v0 = vadd.f32 %v2133_v53, %v2058_v63  ;;  %v2121_v1 = vadd.f32 %v2105_v62, %v1779_v29  ;;  %v2060_v2 = vpop.f32.mrb[7].mxu0  ;;  %v6550_v13 = vpop.f32.mrb[30].mxu1  ;;  %v2154_v15 = vmax.f32 %v2145_v58, 0.0  ;;  %v6874_v58 = vld [vmem:[%s9026_s5 + $0x190] ss:$8 sps:$4 sm:$0xff]  }
 0x4af   : > { %v2153_v3 = vadd.f32 %v2141_v56, %v2127_v60  ;;  %v2149_v4 = vadd.f32 %v2137_v54, %v2060_v2  ;;  %v2108_v14 = vpop.f32.mrb[31].mxu1  ;;  %v2155_v8 = vmax.f32 %v2146_v61, 0.0  ;;  %v6882_v61 = vld [vmem:[%s9026_s5 + $0x1b4] ss:$8 sps:$4 sm:$0xff]   ;;  %v6880_v60 = vld [vmem:[%s9026_s5 + $0x1b0] ss:$8 sps:$4 sm:$0xff]  }
 0x4b0   : > { %v2157_v5 = vmax.f32 %v2148_v0, 0.0  ;;  %v2147_v6 = vadd.f32 %v2141_v56, %v2121_v1  ;;  %v2124_v7 = vadd.f32 %v2108_v14, %v1782_v32  ;;  %v6885_v63 = vld [vmem:[%s9026_s5 + $0x1c4] ss:$8 sps:$4 sm:$0xff]   ;;  %v6883_v62 = vld [vmem:[%s9026_s5 + $0x1c0] ss:$8 sps:$4 sm:$0xff]  }
 0x4b1   : > { %v2158_v9 = vmax.f32 %v2149_v4, 0.0  ;;  %v2162_v12 = vmax.f32 %v2153_v3, 0.0  ;;  %v6888_v0 = vld [vmem:[%s9026_s5 + $0x1d4] ss:$8 sps:$4 sm:$0xff]   ;;  %v6886_v1 = vld [vmem:[%s9026_s5 + $0x1d0] ss:$8 sps:$4 sm:$0xff]  }
 0x4b2   : > { %v7926_v10 = vpack.c.bf16 %v2157_v5, %v2154_v15  ;;  %v2150_v11 = vadd.f32 %v2141_v56, %v2124_v7  ;;  %v2156_v18 = vmax.f32 %v2147_v6, 0.0  ;;  %v6876_v56 = vld [vmem:[%s9026_s5 + $0x194] ss:$8 sps:$4 sm:$0xff]   ;;  %v6891_v2 = vld [vmem:[%s9026_s5 + $0x1e4] ss:$8 sps:$4 sm:$0xff]  }
 0x4b3   : > { %v7928_v16 = vpack.c.bf16 %v2158_v9, %v2155_v8  ;;  %v2064_v17 = vpop.f32.mrb[28].mxu0  ;;  %v2168_v27 = vpack.c.bf16 %v2162_v12, %v2162_v12  ;;  %v6889_v13 = vld [vmem:[%s9026_s5 + $0x1e0] ss:$8 sps:$4 sm:$0xff]   ;;  %v6894_v3 = vld [vmem:[%s9026_s5 + $0x1f4] ss:$8 sps:$4 sm:$0xff]  }
 0x4b4   : > { %v2159_v19 = vmax.f32 %v2150_v11, 0.0  ;;  %v2125_v20 = vadd.f32 %v2064_v17, %v1783_v34  ;;  %v2066_v21 = vpop.f32.mrb[29].mxu0  ;;  %v6897_v4 = vld [vmem:[%s9026_s5 + $0x224] ss:$8 sps:$4 sm:$0xff]   ;;  %v6892_v14 = vld [vmem:[%s9026_s5 + $0x1f0] ss:$8 sps:$4 sm:$0xff]  }
 0x4b5   : > { %v2126_v22 = vadd.f32 %v2066_v21, %v1784_v37  ;;  %v2068_v23 = vpop.f32.mrb[30].mxu0  ;;  %2184 = vmatprep.subr.bf16.mxu0 %v7928_v16  ;;  %v7937_v32 = vsel %vm2174_vm4, %v2168_v27, 0  ;;  %v6855_v37 = vld [vmem:[%s9026_s5 + $0x124] ss:$8 sps:$4 sm:$0xff]   ;;  %v6895_v15 = vld [vmem:[%s9026_s5 + $0x220] ss:$8 sps:$4 sm:$0xff]  }
 0x4b6   : > { %v7931_v24 = vpack.c.bf16 %v2159_v19, %v2156_v18  ;;  %v2151_v25 = vadd.f32 %v2133_v53, %v2125_v20  ;;  %v2069_v26 = vpop.f32.mrb[31].mxu0  ;;  %2185 = vmatpush1.bf16.msra.mxu0 %v7926_v10  ;;  %v6868_v53 = vld [vmem:[%s9026_s5 + $0x170] ss:$8 sps:$4 sm:$0xff]   ;;  %v6898_v5 = vld [vmem:[%s9026_s5 + $0x200] ss:$8 sps:$4 sm:$0xff]  }
 0x4b7   : > { %v2152_v28 = vadd.f32 %v2137_v54, %v2126_v22  ;;  %v6873_v54 = vld [vmem:[%s9026_s5 + $0x184] ss:$8 sps:$4 sm:$0xff]   ;;  %v6901_v7 = vld [vmem:[%s9026_s5 + $0x230] ss:$8 sps:$4 sm:$0xff]   ;;  %v6903_v8 = vld [vmem:[%s9026_s5 + $0x234] ss:$8 sps:$4 sm:$0xff]  }
 0x4b8   : > { %v2160_v29 = vmax.f32 %v2151_v25, 0.0  ;;  %6552 = vmatpush3.bf16.msra.mxu1 %v7931_v24  ;;  %v6900_v6 = vld [vmem:[%s9026_s5 + $0x204] ss:$8 sps:$4 sm:$0xff]   ;;  %v6906_v9 = vld [vmem:[%s9026_s5 + $0x214] ss:$8 sps:$4 sm:$0xff]  }
 0x4b9   : > { %v2161_v30 = vmax.f32 %v2152_v28, 0.0  ;;  %6553 = vmatprep.subr.bf16.mxu1 %v7273_v46  ;;  %v6909_v11 = vld [vmem:[%s9026_s5 + $0x4] ss:$8 sps:$4 sm:$0xff]   ;;  %v6904_v12 = vld [vmem:[%s9026_s5 + $0x210] ss:$8 sps:$4 sm:$0xff]  }
 0x4ba   : > { %v2166_v31 = vpack.c.bf16 %v2160_v29, %v2160_v29  ;;  %v6915_v17 = vld [vmem:[%s9026_s5 + $0x104] ss:$8 sps:$4 sm:$0xff]   ;;  %v6907_v29 = vld [vmem:[%s9026_s5] ss:$8 sps:$4 sm:$0xff]  }
 0x4bb   : > { %v7939_v33 = vpack.c.bf16 %v2161_v30, %v2161_v30 }
 0x4bc   : > { %v7942_v34 = vsel %vm2174_vm4, %v2166_v31, 0  ;;  %6554 = vmatpush3.bf16.msra.mxu1 %v7937_v32 }
 0x4bd   : > { %5735 = vmatprep.subr.msk.bf16.mxu0 %vm2174_vm4, %v7939_v33  ;;  %6559 = vmatprep.subr.bf16.mxu1 %v7273_v46 }
 0x4be   : > { %2187 = vmatpush1.bf16.msra.mxu0 %v7942_v34 }
 0x4bf   : > { %6556 = vmatmul.mubr.msk.bf16.vlgmr.msra.gmra.mrb[32].mxu1 %vm2170_vm5, %v2169_v35  ;;  %2309 = vmatprep.subr.bf16.mxu0 %v7928_v16 }
 0x4c0   : > { %6560 = vmatpush3.bf16.msra.mxu1 %v7931_v24  ;;  %6563 = vmatprep.mubr.msk.bf16.mxu1 %vm7274_vm3, %v7273_v46 }
 0x4c1   : > { %5736 = vmatmul.mubr.msk.bf16.vlgmr.msra.gmra.mrb[32].mxu0 %vm2170_vm5, %v2169_v35  ;;  %6561 = vmatprep.subr.bf16.mxu1 %v7273_v46  ;;  %v6912_v35 = vld [vmem:[%s9026_s5 + $0x14] ss:$8 sps:$4 sm:$0xff]  }
 0x4c2   : > { %2310 = vmatpush1.bf16.msra.mxu0 %v7926_v10  ;;  %2341 = vmatprep.mubr.bf16.mxu0 %v7272_v36 }
 0x4c3   : > { %5739 = vmatprep.subr.msk.bf16.mxu0 %vm2174_vm4, %v7939_v33 }
 0x4c4   : > { %6562 = vmatpush3.bf16.msra.mxu1 %v7937_v32 }
 0x4c5   : > { %2655 = vmatprep.subr.bf16.mxu1 %v6897_v4  ;;  %v6936_v4 = vld [vmem:[%s9026_s5 + $0x74] ss:$8 sps:$4 sm:$0xff]  }
 0x4c6   : > { %2312 = vmatpush1.bf16.msra.mxu0 %v7942_v34 }
 0x4c7   : > { %6564 = vmatmul.mubr.msk.bf16.vlgmr.msra.gmra.mrb[36].mxu1 %vm2170_vm5, %v5738_v38  ;;  %2614 = vmatprep.subr.bf16.mxu0 %v6855_v37 }
 0x4c8   : > { %2687 = vmatprep.mubr.bf16.mxu1 %v7272_v36  ;;  %2656 = vmatpush1.bf16.msra.mxu1 %v6895_v15  ;;  %v6934_v15 = vld [vmem:[%s9026_s5 + $0x70] ss:$8 sps:$4 sm:$0xff]  }
 0x4c9   : > { %5740 = vmatmul.mubr.msk.bf16.vlgmr.msra.gmra.mrb[36].mxu0 %vm2170_vm5, %v5738_v38  ;;  %2657 = vmatprep.subr.bf16.mxu1 %v6903_v8  ;;  %v6937_v8 = vld [vmem:[%s9026_s5 + $0x80] ss:$8 sps:$4 sm:$0xff]  }
 0x4ca   : > { %2615 = vmatpush1.bf16.msra.mxu0 %v6853_v39 }
 0x4cb   : > { %2616 = vmatprep.subr.bf16.mxu0 %v6858_v40 }
 0x4cc   : > { %2658 = vmatpush1.bf16.msra.mxu1 %v6901_v7  ;;  %v6978_v7 = vld [vmem:[%s9026_s5 + $0x274] ss:$8 sps:$4 sm:$0xff]  }
 0x4cd   : > { %2879 = vmatprep.subr.bf16.mxu1 %v6909_v11  ;;  %v6942_v11 = vld [vmem:[%s9026_s5 + $0x94] ss:$8 sps:$4 sm:$0xff]  }
 0x4ce   : > { %2617 = vmatpush1.bf16.msra.mxu0 %v6856_v41 }
 0x4cf   : > { %2618 = vmatprep.subr.bf16.mxu0 %v6861_v42 }
 0x4d2   : > { %2619 = vmatpush1.bf16.msra.mxu0 %v6859_v43  ;;  %v6910_v43 = vld [vmem:[%s9026_s5 + $0x10] ss:$8 sps:$4 sm:$0xff]  }
 0x4d3   : > { %2620 = vmatprep.subr.bf16.mxu0 %v6864_v44  ;;  %v6913_v44 = vld [vmem:[%s9026_s5 + $0x100] ss:$8 sps:$4 sm:$0xff]  }
 0x4d6   : > { %2621 = vmatpush1.bf16.msra.mxu0 %v6862_v45 }
 0x4d7   : > { %2622 = vmatprep.subr.bf16.mxu0 %v6867_v47  ;;  %v6918_v47 = vld [vmem:[%s9026_s5 + $0x24] ss:$8 sps:$4 sm:$0xff]  }
 0x4da   : > { %2623 = vmatpush1.bf16.msra.mxu0 %v6865_v50  ;;  %v6921_v50 = vld [vmem:[%s9026_s5 + $0x114] ss:$8 sps:$4 sm:$0xff]  }
 0x4db   : > { %2624 = vmatprep.subr.bf16.mxu0 %v6870_v52 }
 0x4de   : > { %2625 = vmatpush1.bf16.msra.mxu0 %v6868_v53  ;;  %v6916_v53 = vld [vmem:[%s9026_s5 + $0x20] ss:$8 sps:$4 sm:$0xff]  }
 0x4df   : > { %2626 = vmatprep.subr.bf16.mxu0 %v6873_v54  ;;  %v6919_v54 = vld [vmem:[%s9026_s5 + $0x110] ss:$8 sps:$4 sm:$0xff]  }
 0x4e2   : > { %2627 = vmatpush1.bf16.msra.mxu0 %v6871_v55  ;;  %v6924_v55 = vld [vmem:[%s9026_s5 + $0x34] ss:$8 sps:$4 sm:$0xff]  }
 0x4e3   : > { %2628 = vmatprep.subr.bf16.mxu0 %v6876_v56  ;;  %v6922_v56 = vld [vmem:[%s9026_s5 + $0x30] ss:$8 sps:$4 sm:$0xff]  }
 0x4e6   : > { %2629 = vmatpush1.bf16.msra.mxu0 %v6874_v58 }
 0x4e7   : > { %2630 = vmatprep.subr.bf16.mxu0 %v6879_v59  ;;  %v6927_v59 = vld [vmem:[%s9026_s5 + $0x44] ss:$8 sps:$4 sm:$0xff]  }
 0x4ea   : > { %2631 = vmatpush1.bf16.msra.mxu0 %v6877_v57  ;;  %v6925_v57 = vld [vmem:[%s9026_s5 + $0x40] ss:$8 sps:$4 sm:$0xff]  }
 0x4eb   : > { %2632 = vmatprep.subr.bf16.mxu0 %v6882_v61  ;;  %v6930_v61 = vld [vmem:[%s9026_s5 + $0x54] ss:$8 sps:$4 sm:$0xff]  }
 0x4ee   : > { %2633 = vmatpush1.bf16.msra.mxu0 %v6880_v60  ;;  %v6969_v60 = vld [vmem:[%s9026_s5 + $0x244] ss:$8 sps:$4 sm:$0xff]  }
 0x4ef   : > { %2634 = vmatprep.subr.bf16.mxu0 %v6885_v63  ;;  %v6928_v63 = vld [vmem:[%s9026_s5 + $0x50] ss:$8 sps:$4 sm:$0xff]  }
 0x4f2   : > { %2635 = vmatpush1.bf16.msra.mxu0 %v6883_v62  ;;  %v8144_v62 = vld [vmem:[%s9025_s4 + $0x8] sm:$0xf] }
 0x4f3   : > { %2636 = vmatprep.subr.bf16.mxu0 %v6888_v0  ;;  %v6967_v0 = vld [vmem:[%s9026_s5 + $0x240] ss:$8 sps:$4 sm:$0xff]  }
 0x4f6   : > { %2637 = vmatpush1.bf16.msra.mxu0 %v6886_v1  ;;  %v6933_v1 = vld [vmem:[%s9026_s5 + $0x64] ss:$8 sps:$4 sm:$0xff]  }
 0x4f7   : > { %2638 = vmatprep.subr.bf16.mxu0 %v6891_v2  ;;  %v6972_v2 = vld [vmem:[%s9026_s5 + $0x254] ss:$8 sps:$4 sm:$0xff]  }
 0x4fa   : > { %2639 = vmatpush1.bf16.msra.mxu0 %v6889_v13  ;;  %v6931_v13 = vld [vmem:[%s9026_s5 + $0x60] ss:$8 sps:$4 sm:$0xff]  }
 0x4fb   : > { %2640 = vmatprep.subr.bf16.mxu0 %v6894_v3  ;;  %v6970_v3 = vld [vmem:[%s9026_s5 + $0x250] ss:$8 sps:$4 sm:$0xff]  }
 0x4fe   : > { %2641 = vmatpush1.bf16.msra.mxu0 %v6892_v14  ;;  %v6975_v14 = vld [vmem:[%s9026_s5 + $0x264] ss:$8 sps:$4 sm:$0xff]  }
 0x4ff   : > { %2642 = vmatprep.subr.bf16.mxu0 %v6900_v6  ;;  %v6939_v6 = vld [vmem:[%s9026_s5 + $0x84] ss:$8 sps:$4 sm:$0xff]  }
 0x502   : > { %2643 = vmatpush1.bf16.msra.mxu0 %v6898_v5  ;;  %v6973_v5 = vld [vmem:[%s9026_s5 + $0x260] ss:$8 sps:$4 sm:$0xff]  }
 0x503   : > { %2644 = vmatprep.subr.bf16.mxu0 %v6906_v9  ;;  %v6976_v9 = vld [vmem:[%s9026_s5 + $0x270] ss:$8 sps:$4 sm:$0xff]  }
 0x506   : > { %2645 = vmatpush1.bf16.msra.mxu0 %v6904_v12  ;;  %v6981_v12 = vld [vmem:[%s9026_s5 + $0x284] ss:$8 sps:$4 sm:$0xff]  }
 0x507   : > { %2920 = vmatprep.subr.bf16.mxu0 %v6915_v17  ;;  %v6940_v17 = vld [vmem:[%s9026_s5 + $0x90] ss:$8 sps:$4 sm:$0xff]  }
 0x592   : > { %v2259_v18 = vpop.f32.mrb[32].mxu1 }
 0x593   : > { %v6557_v19 = vpop.f32.mrb[33].mxu1  ;;  %v2267_v58 = vpack.c.bf16 %v2259_v18, %v2259_v18  ;;  %v6979_v18 = vld [vmem:[%s9026_s5 + $0x280] ss:$8 sps:$4 sm:$0xff]  }
 0x594   : > { %v2262_v20 = vpop.f32.mrb[34].mxu1  ;;  %v8085_v21 = vpop.f32.mrb[32].mxu0  ;;  %v6945_v19 = vld [vmem:[%s9026_s5 + $0xa4] ss:$8 sps:$4 sm:$0xff]  }
 0x595   : > { %v6558_v22 = vpop.f32.mrb[35].mxu1  ;;  %v2220_v23 = vpop.f32.mrb[33].mxu0  ;;  %v6984_v20 = vld [vmem:[%s9026_s5 + $0x294] ss:$8 sps:$4 sm:$0xff]  }
 0x596   : > { %v2222_v25 = vpop.f32.mrb[34].mxu0  ;;  %v2266_v27 = vpack.c.bf16 %v2220_v23, %v2220_v23  ;;  %v6943_v22 = vld [vmem:[%s9026_s5 + $0xa0] ss:$8 sps:$4 sm:$0xff]   ;;  %v6982_v23 = vld [vmem:[%s9026_s5 + $0x290] ss:$8 sps:$4 sm:$0xff]  }
 0x597   : > { %v2223_v26 = vpop.f32.mrb[35].mxu0  ;;  %v6948_v25 = vld [vmem:[%s9026_s5 + $0xb4] ss:$8 sps:$4 sm:$0xff]  }
 0x598   : > { %v6987_v26 = vld [vmem:[%s9026_s5 + $0x2a4] ss:$8 sps:$4 sm:$0xff]  }
 0x59a   : > { %v2384_v28 = vpop.f32.mrb[36].mxu1 }
 0x59b   : > { %v2392_v30 = vpack.c.bf16 %v2384_v28, %v2384_v28  ;;  %v6565_v31 = vpop.f32.mrb[37].mxu1  ;;  %v6985_v28 = vld [vmem:[%s9026_s5 + $0x2a0] ss:$8 sps:$4 sm:$0xff]  }
 0x59c   : > { %v2343_v37 = vpop.f32.mrb[36].mxu0  ;;  %v2387_v38 = vpop.f32.mrb[38].mxu1  ;;  %v6949_v31 = vld [vmem:[%s9026_s5 + $0xc0] ss:$8 sps:$4 sm:$0xff]  }
 0x59d   : > { %v2390_v39 = vpack.c.bf16 %v2343_v37, %v2343_v37  ;;  %v2345_v40 = vpop.f32.mrb[37].mxu0  ;;  %v6566_v41 = vpop.f32.mrb[39].mxu1  ;;  %5814 = vmatmul.mubr.msk.bf16.vlgmr.msra.gmra.mrb[40].mxu1 %vm2610_vm6, %v2392_v30  ;;  %v6990_v30 = vld [vmem:[%s9026_s5 + $0x2b4] ss:$8 sps:$4 sm:$0xff]   ;;  %v6993_v38 = vld [vmem:[%s9026_s5 + $0x2c4] ss:$8 sps:$4 sm:$0xff]  }
 0x59e   : > { %v2391_v42 = vpack.c.bf16 %v2345_v40, %v2345_v40  ;;  %2880 = vmatpush1.bf16.msra.mxu1 %v6907_v29  ;;  %2911 = vmatprep.mubr.bf16.mxu1 %v2266_v27  ;;  %v2347_v45 = vpop.f32.mrb[38].mxu0  ;;  %v6946_v27 = vld [vmem:[%s9026_s5 + $0xb0] ss:$8 sps:$4 sm:$0xff]   ;;  %v6951_v29 = vld [vmem:[%s9026_s5 + $0xc4] ss:$8 sps:$4 sm:$0xff]  }
 0x59f   : > { %2881 = vmatprep.subr.bf16.mxu1 %v6912_v35  ;;  %v2348_v52 = vpop.f32.mrb[39].mxu0  ;;  %v6988_v35 = vld [vmem:[%s9026_s5 + $0x2b0] ss:$8 sps:$4 sm:$0xff]   ;;  %v6954_v37 = vld [vmem:[%s9026_s5 + $0xd4] ss:$8 sps:$4 sm:$0xff]  }
 0x5a0   : > { %2646 = vmatprep.mubr.bf16.mxu0 %v2391_v42  ;;  %v6991_v40 = vld [vmem:[%s9026_s5 + $0x2c0] ss:$8 sps:$4 sm:$0xff]   ;;  %v6957_v41 = vld [vmem:[%s9026_s5 + $0xe4] ss:$8 sps:$4 sm:$0xff]   ;;  %v6996_v42 = vld [vmem:[%s9026_s5 + $0x2d4] ss:$8 sps:$4 sm:$0xff]  }
 0x5a1   : > { %2647 = vmatmul.mubr.bf16.vlgmr.msra.gmra.mrb[40].mxu0 %v2390_v39  ;;  %v6952_v39 = vld [vmem:[%s9026_s5 + $0xd0] ss:$8 sps:$4 sm:$0xff]   ;;  %v6960_v45 = vld [vmem:[%s9026_s5 + $0xf4] ss:$8 sps:$4 sm:$0xff]   ;;  %v6963_v52 = vld [vmem:[%s9026_s5 + $0x344] ss:$8 sps:$4 sm:$0xff]  }
 0x5a2   : > { %2882 = vmatpush1.bf16.msra.mxu1 %v6910_v43  ;;  %2921 = vmatpush1.bf16.msra.mxu0 %v6913_v44  ;;  %v6955_v43 = vld [vmem:[%s9026_s5 + $0xe0] ss:$8 sps:$4 sm:$0xff]   ;;  %v6994_v44 = vld [vmem:[%s9026_s5 + $0x2d0] ss:$8 sps:$4 sm:$0xff]  }
 0x5a3   : > { %2883 = vmatprep.subr.bf16.mxu1 %v6918_v47  ;;  %2922 = vmatprep.subr.bf16.mxu0 %v6921_v50  ;;  %v6958_v47 = vld [vmem:[%s9026_s5 + $0xf0] ss:$8 sps:$4 sm:$0xff]   ;;  %v2265_v50 = vpack.c.bf16 %v8085_v21, %v8085_v21  ;;  %v6961_v21 = vld [vmem:[%s9026_s5 + $0x340] ss:$8 sps:$4 sm:$0xff]  }
 0x5a4   : > { %2952 = vmatprep.mubr.bf16.mxu0 %v7272_v36 }
 0x5a6   : > { %2884 = vmatpush1.bf16.msra.mxu1 %v6916_v53  ;;  %2923 = vmatpush1.bf16.msra.mxu0 %v6919_v54  ;;  %v6966_v53 = vld [vmem:[%s9026_s5 + $0x354] ss:$8 sps:$4 sm:$0xff]   ;;  %v6964_v54 = vld [vmem:[%s9026_s5 + $0x350] ss:$8 sps:$4 sm:$0xff]  }
 0x5a7   : > { %2966 = vmatprep.subr.bf16.mxu0 %v7928_v16  ;;  %2885 = vmatprep.subr.bf16.mxu1 %v6924_v55  ;;  %v6999_v55 = vld [vmem:[%s9026_s5 + $0x2e4] ss:$8 sps:$4 sm:$0xff]  }
 0x5a9   : > { %5851 = vmatmul.mubr.msk.bf16.vlgmr.msra.gmra.mrb[44].mxu0 %vm2610_vm6, %v2267_v58  ;;  %v7002_v58 = vld [vmem:[%s9026_s5 + $0x2f4] ss:$8 sps:$4 sm:$0xff]  }
 0x5aa   : > { %2886 = vmatpush1.bf16.msra.mxu1 %v6922_v56  ;;  %2967 = vmatpush1.bf16.msra.mxu0 %v7926_v10  ;;  %v6997_v56 = vld [vmem:[%s9026_s5 + $0x2e0] ss:$8 sps:$4 sm:$0xff]  }
 0x5ab   : > { %5853 = vmatprep.subr.msk.bf16.mxu0 %vm2174_vm4, %v7939_v33  ;;  %2887 = vmatprep.subr.bf16.mxu1 %v6927_v59  ;;  %v7000_v59 = vld [vmem:[%s9026_s5 + $0x2f0] ss:$8 sps:$4 sm:$0xff]  }
 0x5ac   : > { %2998 = vmatprep.mubr.bf16.mxu0 %v7272_v36 }
 0x5ae   : > { %2888 = vmatpush1.bf16.msra.mxu1 %v6925_v57  ;;  %2969 = vmatpush1.bf16.msra.mxu0 %v7942_v34  ;;  %v7003_v57 = vld [vmem:[%s9026_s5 + $0x300] ss:$8 sps:$4 sm:$0xff]  }
 0x5af   : > { %2889 = vmatprep.subr.bf16.mxu1 %v6930_v61  ;;  %3270 = vmatprep.subr.bf16.mxu0 %v6969_v60  ;;  %v7005_v61 = vld [vmem:[%s9026_s5 + $0x304] ss:$8 sps:$4 sm:$0xff]   ;;  %v7008_v60 = vld [vmem:[%s9026_s5 + $0x314] ss:$8 sps:$4 sm:$0xff]  }
 0x5b1   : > { %5854 = vmatmul.mubr.msk.bf16.vlgmr.msra.gmra.mrb[48].mxu0 %vm2170_vm5, %v8144_v62 }
 0x5b2   : > { %2890 = vmatpush1.bf16.msra.mxu1 %v6928_v63  ;;  %3271 = vmatpush1.bf16.msra.mxu0 %v6967_v0  ;;  %v7006_v63 = vld [vmem:[%s9026_s5 + $0x310] ss:$8 sps:$4 sm:$0xff]   ;;  %v7011_v0 = vld [vmem:[%s9026_s5 + $0x324] ss:$8 sps:$4 sm:$0xff]  }
 0x5b3   : > { %2891 = vmatprep.subr.bf16.mxu1 %v6933_v1  ;;  %3272 = vmatprep.subr.bf16.mxu0 %v6972_v2  ;;  %v7014_v1 = vld [vmem:[%s9026_s5 + $0x334] ss:$8 sps:$4 sm:$0xff]   ;;  %v7012_v2 = vld [vmem:[%s9026_s5 + $0x330] ss:$8 sps:$4 sm:$0xff]  }
 0x5b6   : > { %2892 = vmatpush1.bf16.msra.mxu1 %v6931_v13  ;;  %3273 = vmatpush1.bf16.msra.mxu0 %v6970_v3  ;;  %v7017_v13 = vld [vmem:[%s9026_s5 + $0x464] ss:$8 sps:$4 sm:$0xff]  }
 0x5b7   : > { %2893 = vmatprep.subr.bf16.mxu1 %v6936_v4  ;;  %3274 = vmatprep.subr.bf16.mxu0 %v6975_v14 }
 0x5ba   : > { %2894 = vmatpush1.bf16.msra.mxu1 %v6934_v15  ;;  %3275 = vmatpush1.bf16.msra.mxu0 %v6973_v5 }
 0x5bb   : > { %2895 = vmatprep.subr.bf16.mxu1 %v6939_v6  ;;  %3276 = vmatprep.subr.bf16.mxu0 %v6978_v7 }
 0x5be   : > { %2896 = vmatpush1.bf16.msra.mxu1 %v6937_v8  ;;  %3277 = vmatpush1.bf16.msra.mxu0 %v6976_v9 }
 0x5bf   : > { %2897 = vmatprep.subr.bf16.mxu1 %v6942_v11  ;;  %3278 = vmatprep.subr.bf16.mxu0 %v6981_v12 }
 0x5c2   : > { %2898 = vmatpush1.bf16.msra.mxu1 %v6940_v17  ;;  %3279 = vmatpush1.bf16.msra.mxu0 %v6979_v18 }
 0x5c3   : > { %2899 = vmatprep.subr.bf16.mxu1 %v6945_v19  ;;  %3280 = vmatprep.subr.bf16.mxu0 %v6984_v20 }
 0x5c6   : > { %2900 = vmatpush1.bf16.msra.mxu1 %v6943_v22  ;;  %3281 = vmatpush1.bf16.msra.mxu0 %v6982_v23 }
 0x5c7   : > { %2901 = vmatprep.subr.bf16.mxu1 %v6948_v25  ;;  %3282 = vmatprep.subr.bf16.mxu0 %v6987_v26  ;;  %v7015_v26 = vld [vmem:[%s9026_s5 + $0x460] ss:$8 sps:$4 sm:$0xff]  }
 0x5ca   : > { %2902 = vmatpush1.bf16.msra.mxu1 %v6946_v27  ;;  %3283 = vmatpush1.bf16.msra.mxu0 %v6985_v28  ;;  %v7020_v28 = vld [vmem:[%s9026_s5 + $0x474] ss:$8 sps:$4 sm:$0xff]  }
 0x5cb   : > { %2903 = vmatprep.subr.bf16.mxu1 %v6951_v29  ;;  %3284 = vmatprep.subr.bf16.mxu0 %v6990_v30  ;;  %v7018_v30 = vld [vmem:[%s9026_s5 + $0x470] ss:$8 sps:$4 sm:$0xff]  }
 0x5ce   : > { %2904 = vmatpush1.bf16.msra.mxu1 %v6949_v31  ;;  %3285 = vmatpush1.bf16.msra.mxu0 %v6988_v35 }
 0x5cf   : > { %2905 = vmatprep.subr.bf16.mxu1 %v6954_v37  ;;  %3286 = vmatprep.subr.bf16.mxu0 %v6993_v38 }
 0x5d2   : > { %2906 = vmatpush1.bf16.msra.mxu1 %v6952_v39  ;;  %3287 = vmatpush1.bf16.msra.mxu0 %v6991_v40 }
 0x5d3   : > { %2907 = vmatprep.subr.bf16.mxu1 %v6957_v41  ;;  %3288 = vmatprep.subr.bf16.mxu0 %v6996_v42 }
 0x5d6   : > { %2908 = vmatpush1.bf16.msra.mxu1 %v6955_v43  ;;  %3289 = vmatpush1.bf16.msra.mxu0 %v6994_v44 }
 0x5d7   : > { %2909 = vmatprep.subr.bf16.mxu1 %v6960_v45  ;;  %3290 = vmatprep.subr.bf16.mxu0 %v6999_v55  ;;  %v7029_v55 = vld [vmem:[%s9026_s5 + $0x384] ss:$8 sps:$4 sm:$0xff]  }
 0x5da   : > { %2910 = vmatpush1.bf16.msra.mxu1 %v6958_v47  ;;  %3291 = vmatpush1.bf16.msra.mxu0 %v6997_v56  ;;  %v7027_v56 = vld [vmem:[%s9026_s5 + $0x380] ss:$8 sps:$4 sm:$0xff]  }
 0x5db   : > { %6567 = vmatprep.subr.bf16.mxu1 %v7273_v46  ;;  %3292 = vmatprep.subr.bf16.mxu0 %v7002_v58  ;;  %v7032_v58 = vld [vmem:[%s9026_s5 + $0x394] ss:$8 sps:$4 sm:$0xff]  }
 0x5dd   : > { %2912 = vmatmul.mubr.bf16.vlgmr.msra.gmra.mrb[44].mxu1 %v2265_v50 }
 0x5de   : > { %6568 = vmatpush3.bf16.msra.mxu1 %v7931_v24  ;;  %6571 = vmatprep.mubr.msk.bf16.mxu1 %vm7274_vm3, %v7273_v46 }
 0x5df   : > { %6569 = vmatprep.subr.bf16.mxu1 %v7273_v46  ;;  %3293 = vmatpush1.bf16.msra.mxu0 %v7000_v59  ;;  %v7030_v59 = vld [vmem:[%s9026_s5 + $0x390] ss:$8 sps:$4 sm:$0xff]  }
 0x5e0   : > { %3294 = vmatprep.subr.bf16.mxu0 %v7005_v61  ;;  %v7033_v61 = vld [vmem:[%s9026_s5 + $0x3a0] ss:$8 sps:$4 sm:$0xff]  }
 0x5e2   : > { %6570 = vmatpush3.bf16.msra.mxu1 %v7937_v32 }
 0x5e3   : > { %3311 = vmatprep.subr.bf16.mxu1 %v6963_v52  ;;  %3295 = vmatpush1.bf16.msra.mxu0 %v7003_v57  ;;  %v7023_v52 = vld [vmem:[%s9026_s5 + $0x364] ss:$8 sps:$4 sm:$0xff]  }
 0x5e4   : > { %3296 = vmatprep.subr.bf16.mxu0 %v7008_v60  ;;  %v7035_v57 = vld [vmem:[%s9026_s5 + $0x3a4] ss:$8 sps:$4 sm:$0xff]   ;;  %v7038_v60 = vld [vmem:[%s9026_s5 + $0x3b4] ss:$8 sps:$4 sm:$0xff]  }
 0x5e5   : > { %6572 = vmatmul.mubr.msk.bf16.vlgmr.msra.gmra.mrb[48].mxu1 %vm2170_vm5, %v8144_v62  ;;  %v7009_v62 = vld [vmem:[%s9026_s5 + $0x320] ss:$8 sps:$4 sm:$0xff]  }
 0x5e6   : > { %3312 = vmatpush1.bf16.msra.mxu1 %v6961_v21  ;;  %3343 = vmatprep.mubr.bf16.mxu1 %v7272_v36  ;;  %v7021_v21 = vld [vmem:[%s9026_s5 + $0x360] ss:$8 sps:$4 sm:$0xff]  }
 0x5e7   : > { %3313 = vmatprep.subr.bf16.mxu1 %v6966_v53  ;;  %3297 = vmatpush1.bf16.msra.mxu0 %v7006_v63  ;;  %v7026_v53 = vld [vmem:[%s9026_s5 + $0x374] ss:$8 sps:$4 sm:$0xff]   ;;  %v7036_v63 = vld [vmem:[%s9026_s5 + $0x3b0] ss:$8 sps:$4 sm:$0xff]  }
 0x5e8   : > { %3298 = vmatprep.subr.bf16.mxu0 %v7011_v0  ;;  %v7039_v0 = vld [vmem:[%s9026_s5 + $0x3c0] ss:$8 sps:$4 sm:$0xff]  }
 0x5ea   : > { %3314 = vmatpush1.bf16.msra.mxu1 %v6964_v54  ;;  %v7024_v54 = vld [vmem:[%s9026_s5 + $0x370] ss:$8 sps:$4 sm:$0xff]  }
 0x5eb   : > { %3359 = vmatprep.subr.bf16.mxu1 %v7928_v16  ;;  %3299 = vmatpush1.bf16.msra.mxu0 %v7009_v62  ;;  %v7041_v62 = vld [vmem:[%s9026_s5 + $0x3c4] ss:$8 sps:$4 sm:$0xff]  }
 0x5ec   : > { %3300 = vmatprep.subr.bf16.mxu0 %v7014_v1  ;;  %v7044_v1 = vld [vmem:[%s9026_s5 + $0x3d4] ss:$8 sps:$4 sm:$0xff]  }
 0x5ef   : > { %3301 = vmatpush1.bf16.msra.mxu0 %v7012_v2  ;;  %v7042_v2 = vld [vmem:[%s9026_s5 + $0x3d0] ss:$8 sps:$4 sm:$0xff]  }
 0x5f0   : > { %3704 = vmatprep.subr.bf16.mxu0 %v7017_v13  ;;  %v7047_v13 = vld [vmem:[%s9026_s5 + $0x3e4] ss:$8 sps:$4 sm:$0xff]  }
 0x670   : > { %v2689_v3 = vpop.f32.mrb[40].mxu1 }
 0x671   : > { %v2691_v4 = vpop.f32.mrb[41].mxu1 }
 0x672   : > { %v2693_v14 = vpop.f32.mrb[42].mxu1 }
 0x673   : > { %v2694_v15 = vpop.f32.mrb[43].mxu1  ;;  %v7048_v14 = vld [vmem:[%s9026_s5 + $0x3f0] ss:$8 sps:$4 sm:$0xff]  }
 0x674   : > { %v2648_v5 = vpop.f32.mrb[40].mxu0  ;;  %v7053_v15 = vld [vmem:[%s9026_s5 + $0x404] ss:$8 sps:$4 sm:$0xff]  }
 0x675   : > { %v2690_v6 = vadd.f32 %v2689_v3, %v2648_v5  ;;  %v2650_v7 = vpop.f32.mrb[41].mxu0  ;;  %v7045_v3 = vld [vmem:[%s9026_s5 + $0x3e0] ss:$8 sps:$4 sm:$0xff]  }
 0x676   : > { %v2692_v8 = vadd.f32 %v2691_v4, %v2650_v7  ;;  %v2652_v9 = vpop.f32.mrb[42].mxu0  ;;  %v7050_v4 = vld [vmem:[%s9026_s5 + $0x3f4] ss:$8 sps:$4 sm:$0xff]   ;;  %v7051_v5 = vld [vmem:[%s9026_s5 + $0x400] ss:$8 sps:$4 sm:$0xff]  }
 0x677   : > { %v2653_v11 = vpop.f32.mrb[43].mxu0  ;;  %v7054_v7 = vld [vmem:[%s9026_s5 + $0x410] ss:$8 sps:$4 sm:$0xff]   ;;  %v7057_v9 = vld [vmem:[%s9026_s5 + $0x420] ss:$8 sps:$4 sm:$0xff]  }
 0x678   : > { %v7062_v11 = vld [vmem:[%s9026_s5 + $0x434] ss:$8 sps:$4 sm:$0xff]  }
 0x67c   : > { %v2954_v12 = vpop.f32.mrb[44].mxu0 }
 0x67d   : > { %v2956_v17 = vpop.f32.mrb[45].mxu0 }
 0x67e   : > { %v2958_v18 = vpop.f32.mrb[46].mxu0 }
 0x67f   : > { %v2959_v19 = vpop.f32.mrb[47].mxu0  ;;  %v7065_v18 = vld [vmem:[%s9026_s5 + $0x444] ss:$8 sps:$4 sm:$0xff]  }
 0x680   : > { %v7068_v19 = vld [vmem:[%s9026_s5 + $0x454] ss:$8 sps:$4 sm:$0xff]  }
 0x684   : > { %v3000_v20 = vpop.f32.mrb[48].mxu0 }
 0x685   : > { %v3047_v22 = vpack.c.bf16 %v3000_v20, %v3000_v20  ;;  %v3002_v23 = vpop.f32.mrb[49].mxu0  ;;  %v7066_v20 = vld [vmem:[%s9026_s5 + $0x450] ss:$8 sps:$4 sm:$0xff]  }
 0x686   : > { %v3048_v25 = vpack.c.bf16 %v3002_v23, %v3002_v23  ;;  %v3004_v27 = vpop.f32.mrb[50].mxu0 }
 0x687   : > { %v3005_v29 = vpop.f32.mrb[51].mxu0 }
 0x688   : > { %3302 = vmatprep.mubr.bf16.mxu0 %v3048_v25 }
 0x689   : > { %3303 = vmatmul.mubr.bf16.vlgmr.msra.gmra.mrb[52].mxu0 %v3047_v22 }
 0x68a   : > { %3705 = vmatpush1.bf16.msra.mxu0 %v7015_v26  ;;  %3736 = vmatprep.mubr.bf16.mxu0 %v7272_v36 }
 0x68b   : > { %3706 = vmatprep.subr.bf16.mxu0 %v7020_v28 }
 0x68e   : > { %3707 = vmatpush1.bf16.msra.mxu0 %v7018_v30 }
 0x68f   : > { %3752 = vmatprep.subr.bf16.mxu0 %v7928_v16  ;;  %v5929_v16 = vld [vmem:[%s9025_s4 + $0xc] sm:$0xf] }
 0x6b0   : > { %v2913_v31 = vpop.f32.mrb[44].mxu1 }
 0x6b1   : > { %v2914_v35 = vadd.f32 %v2913_v31, %v2690_v6  ;;  %v2915_v37 = vpop.f32.mrb[45].mxu1  ;;  %v7056_v6 = vld [vmem:[%s9026_s5 + $0x414] ss:$8 sps:$4 sm:$0xff]  }
 0x6b2   : > { %v2916_v38 = vadd.f32 %v2915_v37, %v2692_v8  ;;  %v2917_v39 = vpop.f32.mrb[46].mxu1  ;;  %v7059_v8 = vld [vmem:[%s9026_s5 + $0x424] ss:$8 sps:$4 sm:$0xff]  }
 0x6b3   : > { %v8339_v40 = vadd.f32 %v2954_v12, %v2914_v35  ;;  %v2918_v41 = vpop.f32.mrb[47].mxu1  ;;  %v7060_v12 = vld [vmem:[%s9026_s5 + $0x430] ss:$8 sps:$4 sm:$0xff]  }
 0x6b4   : > { %v8341_v42 = vadd.f32 %v2956_v17, %v2916_v38  ;;  %v7063_v17 = vld [vmem:[%s9026_s5 + $0x440] ss:$8 sps:$4 sm:$0xff]  }
 0x6b8   : > { %v3041_v43 = vpop.f32.mrb[48].mxu1 }
 0x6b9   : > { %v3049_v44 = vpack.c.bf16 %v3041_v43, %v3041_v43  ;;  %v6573_v45 = vpop.f32.mrb[49].mxu1 }
 0x6ba   : > { %v3044_v47 = vpop.f32.mrb[50].mxu1 }
 0x6bb   : > { %v6574_v50 = vpop.f32.mrb[51].mxu1  ;;  %5928 = vmatmul.mubr.msk.bf16.vlgmr.msra.gmra.mrb[52].mxu1 %vm2610_vm6, %v3049_v44 }
 0x6bc   : > { %3360 = vmatpush1.bf16.msra.mxu1 %v7926_v10  ;;  %3391 = vmatprep.mubr.bf16.mxu1 %v7272_v36 }
 0x6bd   : > { %5930 = vmatprep.subr.msk.bf16.mxu1 %vm2174_vm4, %v7939_v33 }
 0x6c0   : > { %3362 = vmatpush1.bf16.msra.mxu1 %v7942_v34 }
 0x6c1   : > { %6575 = vmatprep.subr.bf16.mxu1 %v7273_v46 }
 0x6c3   : > { %5931 = vmatmul.mubr.msk.bf16.vlgmr.msra.gmra.mrb[56].mxu1 %vm2170_vm5, %v5929_v16 }
 0x6c4   : > { %6576 = vmatpush3.bf16.msra.mxu1 %v7931_v24  ;;  %6579 = vmatprep.mubr.msk.bf16.mxu1 %vm7274_vm3, %v7273_v46 }
 0x6c5   : > { %6577 = vmatprep.subr.bf16.mxu1 %v7273_v46 }
 0x6c8   : > { %6578 = vmatpush3.bf16.msra.mxu1 %v7937_v32 }
 0x6c9   : > { %3663 = vmatprep.subr.bf16.mxu1 %v7023_v52 }
 0x6cb   : > { %6580 = vmatmul.mubr.msk.bf16.vlgmr.msra.gmra.mrb[60].mxu1 %vm2170_vm5, %v5929_v16 }
 0x6cc   : > { %3664 = vmatpush1.bf16.msra.mxu1 %v7021_v21 }
 0x6cd   : > { %3665 = vmatprep.subr.bf16.mxu1 %v7026_v53  ;;  %v7075_v53 = vld [vmem:[%s9026_s5 + $0x4a0] ss:$8 sps:$4 sm:$0xff]  }
 0x6d0   : > { %3666 = vmatpush1.bf16.msra.mxu1 %v7024_v54  ;;  %v7080_v54 = vld [vmem:[%s9026_s5 + $0x4b4] ss:$8 sps:$4 sm:$0xff]  }
 0x6d1   : > { %3667 = vmatprep.subr.bf16.mxu1 %v7029_v55  ;;  %v7078_v55 = vld [vmem:[%s9026_s5 + $0x4b0] ss:$8 sps:$4 sm:$0xff]  }
 0x6d4   : > { %3668 = vmatpush1.bf16.msra.mxu1 %v7027_v56  ;;  %v7083_v56 = vld [vmem:[%s9026_s5 + $0x4c4] ss:$8 sps:$4 sm:$0xff]  }
 0x6d5   : > { %3669 = vmatprep.subr.bf16.mxu1 %v7032_v58  ;;  %v7081_v58 = vld [vmem:[%s9026_s5 + $0x4c0] ss:$8 sps:$4 sm:$0xff]  }
 0x6d8   : > { %3670 = vmatpush1.bf16.msra.mxu1 %v7030_v59  ;;  %v7086_v59 = vld [vmem:[%s9026_s5 + $0x4d4] ss:$8 sps:$4 sm:$0xff]  }
 0x6d9   : > { %3671 = vmatprep.subr.bf16.mxu1 %v7035_v57  ;;  %v7084_v57 = vld [vmem:[%s9026_s5 + $0x4d0] ss:$8 sps:$4 sm:$0xff]  }
 0x6dc   : > { %3672 = vmatpush1.bf16.msra.mxu1 %v7033_v61  ;;  %v7089_v61 = vld [vmem:[%s9026_s5 + $0x4e4] ss:$8 sps:$4 sm:$0xff]  }
 0x6dd   : > { %3673 = vmatprep.subr.bf16.mxu1 %v7038_v60  ;;  %v7087_v60 = vld [vmem:[%s9026_s5 + $0x4e0] ss:$8 sps:$4 sm:$0xff]  }
 0x6e0   : > { %3674 = vmatpush1.bf16.msra.mxu1 %v7036_v63  ;;  %v7092_v63 = vld [vmem:[%s9026_s5 + $0x4f4] ss:$8 sps:$4 sm:$0xff]  }
 0x6e1   : > { %3675 = vmatprep.subr.bf16.mxu1 %v7041_v62  ;;  %v7090_v62 = vld [vmem:[%s9026_s5 + $0x4f0] ss:$8 sps:$4 sm:$0xff]  }
 0x6e4   : > { %3676 = vmatpush1.bf16.msra.mxu1 %v7039_v0  ;;  %v7095_v0 = vld [vmem:[%s9026_s5 + $0x504] ss:$8 sps:$4 sm:$0xff]  }
 0x6e5   : > { %3677 = vmatprep.subr.bf16.mxu1 %v7044_v1  ;;  %v7093_v1 = vld [vmem:[%s9026_s5 + $0x500] ss:$8 sps:$4 sm:$0xff]  }
 0x6e8   : > { %3678 = vmatpush1.bf16.msra.mxu1 %v7042_v2  ;;  %v7098_v2 = vld [vmem:[%s9026_s5 + $0x514] ss:$8 sps:$4 sm:$0xff]  }
 0x6e9   : > { %3679 = vmatprep.subr.bf16.mxu1 %v7047_v13  ;;  %v7096_v13 = vld [vmem:[%s9026_s5 + $0x510] ss:$8 sps:$4 sm:$0xff]  }
 0x6ec   : > { %3680 = vmatpush1.bf16.msra.mxu1 %v7045_v3  ;;  %v7101_v3 = vld [vmem:[%s9026_s5 + $0x524] ss:$8 sps:$4 sm:$0xff]  }
 0x6ed   : > { %3681 = vmatprep.subr.bf16.mxu1 %v7050_v4  ;;  %v7099_v4 = vld [vmem:[%s9026_s5 + $0x520] ss:$8 sps:$4 sm:$0xff]  }
 0x6f0   : > { %3682 = vmatpush1.bf16.msra.mxu1 %v7048_v14  ;;  %v7104_v14 = vld [vmem:[%s9026_s5 + $0x534] ss:$8 sps:$4 sm:$0xff]  }
 0x6f1   : > { %3683 = vmatprep.subr.bf16.mxu1 %v7053_v15  ;;  %v7102_v15 = vld [vmem:[%s9026_s5 + $0x530] ss:$8 sps:$4 sm:$0xff]  }
 0x6f4   : > { %3684 = vmatpush1.bf16.msra.mxu1 %v7051_v5  ;;  %v7107_v5 = vld [vmem:[%s9026_s5 + $0x544] ss:$8 sps:$4 sm:$0xff]  }
 0x6f5   : > { %3685 = vmatprep.subr.bf16.mxu1 %v7056_v6  ;;  %v7105_v6 = vld [vmem:[%s9026_s5 + $0x540] ss:$8 sps:$4 sm:$0xff]  }
 0x6f8   : > { %3686 = vmatpush1.bf16.msra.mxu1 %v7054_v7  ;;  %v7110_v7 = vld [vmem:[%s9026_s5 + $0x554] ss:$8 sps:$4 sm:$0xff]  }
 0x6f9   : > { %3687 = vmatprep.subr.bf16.mxu1 %v7059_v8  ;;  %v7108_v8 = vld [vmem:[%s9026_s5 + $0x550] ss:$8 sps:$4 sm:$0xff]  }
 0x6fc   : > { %3688 = vmatpush1.bf16.msra.mxu1 %v7057_v9  ;;  %v7111_v9 = vld [vmem:[%s9026_s5 + $0x560] ss:$8 sps:$4 sm:$0xff]  }
 0x6fd   : > { %3689 = vmatprep.subr.bf16.mxu1 %v7062_v11  ;;  %v7113_v11 = vld [vmem:[%s9026_s5 + $0x564] ss:$8 sps:$4 sm:$0xff]  }
 0x700   : > { %3690 = vmatpush1.bf16.msra.mxu1 %v7060_v12  ;;  %v7116_v12 = vld [vmem:[%s9026_s5 + $0x574] ss:$8 sps:$4 sm:$0xff]  }
 0x701   : > { %3691 = vmatprep.subr.bf16.mxu1 %v7065_v18  ;;  %v7119_v18 = vld [vmem:[%s9026_s5 + $0x584] ss:$8 sps:$4 sm:$0xff]  }
 0x704   : > { %3692 = vmatpush1.bf16.msra.mxu1 %v7063_v17  ;;  %v7114_v17 = vld [vmem:[%s9026_s5 + $0x570] ss:$8 sps:$4 sm:$0xff]  }
 0x705   : > { %3693 = vmatprep.subr.bf16.mxu1 %v7068_v19  ;;  %v7117_v19 = vld [vmem:[%s9026_s5 + $0x580] ss:$8 sps:$4 sm:$0xff]  }
 0x708   : > { %3694 = vmatpush1.bf16.msra.mxu1 %v7066_v20  ;;  %v7120_v20 = vld [vmem:[%s9026_s5 + $0x590] ss:$8 sps:$4 sm:$0xff]  }
 0x709   : > { %4097 = vmatprep.subr.bf16.mxu1 %v7119_v18 }
 0x75c   : > { %v3304_v22 = vpop.f32.mrb[52].mxu0 }
 0x75d   : > { %v3306_v23 = vpop.f32.mrb[53].mxu0 }
 0x75e   : > { %v3308_v25 = vpop.f32.mrb[54].mxu0 }
 0x75f   : > { %v3309_v26 = vpop.f32.mrb[55].mxu0 }
 0x78e   : > { %v3345_v27 = vpop.f32.mrb[52].mxu1 }
 0x78f   : > { %v3346_v28 = vadd.f32 %v3345_v27, %v3304_v22  ;;  %v3347_v29 = vpop.f32.mrb[53].mxu1  ;;  %v7122_v22 = vld [vmem:[%s9026_s5 + $0x594] ss:$8 sps:$4 sm:$0xff]  }
 0x790   : > { %v3348_v30 = vadd.f32 %v3347_v29, %v3306_v23  ;;  %v3349_v31 = vpop.f32.mrb[54].mxu1 }
 0x791   : > { %v8457_v35 = vadd.f32 %v3346_v28, %v8339_v40  ;;  %v3350_v37 = vpop.f32.mrb[55].mxu1 }
 0x792   : > { %v8460_v38 = vadd.f32 %v3348_v30, %v8341_v42  ;;  %v6006_v42 = vld [vmem:[%s9025_s4 + $0x10] sm:$0xf] }
 0x796   : > { %v3393_v39 = vpop.f32.mrb[56].mxu1 }
 0x797   : > { %v3395_v41 = vpop.f32.mrb[57].mxu1  ;;  %v3440_v45 = vpack.c.bf16 %v3393_v39, %v3393_v39 }
 0x798   : > { %v3441_v43 = vpack.c.bf16 %v3395_v41, %v3395_v41  ;;  %v3397_v44 = vpop.f32.mrb[58].mxu1 }
 0x799   : > { %v3398_v47 = vpop.f32.mrb[59].mxu1 }
 0x79a   : > { %3695 = vmatprep.mubr.bf16.mxu1 %v3441_v43 }
 0x79b   : > { %3696 = vmatmul.mubr.bf16.vlgmr.msra.gmra.mrb[64].mxu1 %v3440_v45 }
 0x79c   : > { %4129 = vmatprep.mubr.bf16.mxu1 %v7272_v36  ;;  %4098 = vmatpush1.bf16.msra.mxu1 %v7117_v19 }
 0x79d   : > { %4099 = vmatprep.subr.bf16.mxu1 %v7122_v22 }
 0x79e   : > { %v3434_v50 = vpop.f32.mrb[60].mxu1 }
 0x79f   : > { %v3442_v16 = vpack.c.bf16 %v3434_v50, %v3434_v50  ;;  %v6581_v52 = vpop.f32.mrb[61].mxu1 }
 0x7a0   : > { %v3437_v21 = vpop.f32.mrb[62].mxu1  ;;  %4100 = vmatpush1.bf16.msra.mxu1 %v7120_v20 }
 0x7a1   : > { %v6582_v40 = vpop.f32.mrb[63].mxu1  ;;  %6005 = vmatmul.mubr.msk.bf16.vlgmr.msra.gmra.mrb[56].mxu0 %vm2610_vm6, %v3442_v16  ;;  %v7123_v16 = vld [vmem:[%s9029_s8] sm:$0xff]  }
 0x7a2   : > { %3753 = vmatpush1.bf16.msra.mxu0 %v7926_v10  ;;  %3784 = vmatprep.mubr.bf16.mxu0 %v7272_v36  ;;  %v7071_v10 = vld [vmem:[%s9026_s5 + $0x484] ss:$8 sps:$4 sm:$0xff]  }
 0x7a3   : > { %6007 = vmatprep.subr.msk.bf16.mxu0 %vm2174_vm4, %v7939_v33  ;;  %v7069_v33 = vld [vmem:[%s9026_s5 + $0x480] ss:$8 sps:$4 sm:$0xff]  }
 0x7a6   : > { %3755 = vmatpush1.bf16.msra.mxu0 %v7942_v34  ;;  %v7072_v34 = vld [vmem:[%s9026_s5 + $0x490] ss:$8 sps:$4 sm:$0xff]  }
 0x7a7   : > { %6583 = vmatprep.subr.bf16.mxu0 %v7273_v46 }
 0x7a9   : > { %6008 = vmatmul.mubr.msk.bf16.vlgmr.msra.gmra.mrb[60].mxu0 %vm2170_vm5, %v6006_v42 }
 0x7aa   : > { %6584 = vmatpush3.bf16.msra.mxu0 %v7931_v24  ;;  %6587 = vmatprep.mubr.msk.bf16.mxu0 %vm7274_vm3, %v7273_v46  ;;  %v7074_v24 = vld [vmem:[%s9026_s5 + $0x494] ss:$8 sps:$4 sm:$0xff]  }
 0x7ab   : > { %6585 = vmatprep.subr.bf16.mxu0 %v7273_v46 }
 0x7ae   : > { %6586 = vmatpush3.bf16.msra.mxu0 %v7937_v32  ;;  %v7077_v32 = vld [vmem:[%s9026_s5 + $0x4a4] ss:$8 sps:$4 sm:$0xff]  }
 0x7af   : > { %4056 = vmatprep.subr.bf16.mxu0 %v7071_v10 }
 0x7b1   : > { %6588 = vmatmul.mubr.msk.bf16.vlgmr.msra.gmra.mrb[64].mxu0 %vm2170_vm5, %v6006_v42 }
 0x7b2   : > { %4057 = vmatpush1.bf16.msra.mxu0 %v7069_v33  ;;  %v7125_v33 = vld [vmem:[%s9029_s8 + $0x10] sm:$0xff]  }
 0x7b3   : > { %4058 = vmatprep.subr.bf16.mxu0 %v7074_v24 }
 0x7b6   : > { %4059 = vmatpush1.bf16.msra.mxu0 %v7072_v34  ;;  %v7126_v34 = vld [vmem:[%s9029_s8 + $0x18] sm:$0xff]  }
 0x7b7   : > { %4060 = vmatprep.subr.bf16.mxu0 %v7077_v32  ;;  %v7127_v32 = vld [vmem:[%s9029_s8 + $0x20] sm:$0xff]  }
 0x7ba   : > { %4061 = vmatpush1.bf16.msra.mxu0 %v7075_v53  ;;  %v7128_v53 = vld [vmem:[%s9029_s8 + $0x28] sm:$0xff]  }
 0x7bb   : > { %4062 = vmatprep.subr.bf16.mxu0 %v7080_v54  ;;  %v7129_v54 = vld [vmem:[%s9029_s8 + $0x30] sm:$0xff]  }
 0x7be   : > { %4063 = vmatpush1.bf16.msra.mxu0 %v7078_v55  ;;  %v7130_v55 = vld [vmem:[%s9029_s8 + $0x38] sm:$0xff]  }
 0x7bf   : > { %4064 = vmatprep.subr.bf16.mxu0 %v7083_v56  ;;  %v7131_v56 = vld [vmem:[%s9029_s8 + $0x40] sm:$0xff]  }
 0x7c2   : > { %4065 = vmatpush1.bf16.msra.mxu0 %v7081_v58  ;;  %v7132_v58 = vld [vmem:[%s9029_s8 + $0x48] sm:$0xff]  }
 0x7c3   : > { %4066 = vmatprep.subr.bf16.mxu0 %v7086_v59  ;;  %v7133_v59 = vld [vmem:[%s9029_s8 + $0x50] sm:$0xff]  }
 0x7c6   : > { %4067 = vmatpush1.bf16.msra.mxu0 %v7084_v57  ;;  %v7134_v57 = vld [vmem:[%s9029_s8 + $0x58] sm:$0xff]  }
 0x7c7   : > { %4068 = vmatprep.subr.bf16.mxu0 %v7089_v61  ;;  %v7135_v61 = vld [vmem:[%s9029_s8 + $0x60] sm:$0xff]  }
 0x7ca   : > { %4069 = vmatpush1.bf16.msra.mxu0 %v7087_v60  ;;  %v7136_v60 = vld [vmem:[%s9029_s8 + $0x68] sm:$0xff]  }
 0x7cb   : > { %4070 = vmatprep.subr.bf16.mxu0 %v7092_v63 }
 0x7ce   : > { %4071 = vmatpush1.bf16.msra.mxu0 %v7090_v62 }
 0x7cf   : > { %4072 = vmatprep.subr.bf16.mxu0 %v7095_v0 }
 0x7d2   : > { %4073 = vmatpush1.bf16.msra.mxu0 %v7093_v1 }
 0x7d3   : > { %4074 = vmatprep.subr.bf16.mxu0 %v7098_v2  ;;  %v4140_v2 = vld [vmem:[%s9027_s6] sm:$0x3] }
 0x7d6   : > { %4075 = vmatpush1.bf16.msra.mxu0 %v7096_v13 }
 0x7d7   : > { %4076 = vmatprep.subr.bf16.mxu0 %v7101_v3 }
 0x7da   : > { %4077 = vmatpush1.bf16.msra.mxu0 %v7099_v4  ;;  %v4145_v4 = vrot.slane %v4140_v2, %v2132_v49 }
 0x7db   : > { %4078 = vmatprep.subr.bf16.mxu0 %v7104_v14 }
 0x7de   : > { %4079 = vmatpush1.bf16.msra.mxu0 %v7102_v15 }
 0x7df   : > { %4080 = vmatprep.subr.bf16.mxu0 %v7107_v5  ;;  %v4149_v5 = vrot.slane %v4140_v2, %v2136_v51  ;;  %v4158_v51 = vld [vmem:[%s9028_s7] sm:$0x1] }
 0x7e0   : > { %v7155_v2 = vld [vmem:[%s9029_s8 + $0x100] sm:$0xff]  }
 0x7e2   : > { %4081 = vmatpush1.bf16.msra.mxu0 %v7105_v6 }
 0x7e3   : > { %4082 = vmatprep.subr.bf16.mxu0 %v7110_v7 }
 0x7e6   : > { %4083 = vmatpush1.bf16.msra.mxu0 %v7108_v8 }
 0x7e7   : > { %4084 = vmatprep.subr.bf16.mxu0 %v7113_v11 }
 0x7ea   : > { %4085 = vmatpush1.bf16.msra.mxu0 %v7111_v9 }
 0x7eb   : > { %4086 = vmatprep.subr.bf16.mxu0 %v7116_v12  ;;  %v7275_v12 = vmov 65535  }
 0x7ee   : > { %4087 = vmatpush1.bf16.msra.mxu0 %v7114_v17  ;;  %v4164_v17 = vsel %vm4163_vm7, 4294967295, %v7275_v12  ;;  %v7173_v12 = vld [vmem:[%s9029_s8 + $0x190] sm:$0xff]  }
 0x7ef   : > { %4535 = vmatprep.subr.bf16.mxu0 %v7272_v36  ;;  %v4165_v49 = vsel %vm450_vm1, %v4164_v17, 0  ;;  %v7174_v17 = vld [vmem:[%s9029_s8 + $0x198] sm:$0xff]  }
 0x86e   : > { %v3697_v23 = vpop.f32.mrb[64].mxu1 }
 0x86f   : > { %v3699_v25 = vpop.f32.mrb[65].mxu1 }
 0x870   : > { %v3701_v26 = vpop.f32.mrb[66].mxu1 }
 0x871   : > { %v3702_v27 = vpop.f32.mrb[67].mxu1  ;;  %v6084_v26 = vld [vmem:[%s9028_s7 + $0x1] sm:$0x1] }
 0x872   : > { %v7137_v27 = vld [vmem:[%s9029_s8 + $0x70] sm:$0xff]  }
 0x874   : > { %v3738_v28 = vpop.f32.mrb[56].mxu0 }
 0x875   : > { %v3739_v29 = vadd.f32 %v3738_v28, %v3697_v23  ;;  %v3740_v30 = vpop.f32.mrb[57].mxu0  ;;  %v7138_v28 = vld [vmem:[%s9029_s8 + $0x78] sm:$0xff]  }
 0x876   : > { %v3741_v31 = vadd.f32 %v3740_v30, %v3699_v25  ;;  %v3742_v37 = vpop.f32.mrb[58].mxu0  ;;  %v7140_v30 = vld [vmem:[%s9029_s8 + $0x88] sm:$0xff]  }
 0x877   : > { %v8590_v39 = vadd.f32 %v3739_v29, %v8457_v35  ;;  %v3743_v41 = vpop.f32.mrb[59].mxu0  ;;  %v7124_v35 = vld [vmem:[%s9029_s8 + $0x8] sm:$0xff]   ;;  %v7139_v29 = vld [vmem:[%s9029_s8 + $0x80] sm:$0xff]   ;;  %v7142_v37 = vld [vmem:[%s9029_s8 + $0x98] sm:$0xff]  }
 0x878   : > { %v8593_v43 = vadd.f32 %v3741_v31, %v8460_v38  ;;  %v7141_v31 = vld [vmem:[%s9029_s8 + $0x90] sm:$0xff]   ;;  %v7144_v41 = vld [vmem:[%s9029_s8 + $0xa8] sm:$0xff]  }
 0x87c   : > { %v3786_v44 = vpop.f32.mrb[60].mxu0 }
 0x87d   : > { %v3788_v45 = vpop.f32.mrb[61].mxu0  ;;  %v3833_v52 = vpack.c.bf16 %v3786_v44, %v3786_v44  ;;  %v7146_v44 = vld [vmem:[%s9029_s8 + $0xb8] sm:$0xff]  }
 0x87e   : > { %v3834_v47 = vpack.c.bf16 %v3788_v45, %v3788_v45  ;;  %v3790_v50 = vpop.f32.mrb[62].mxu0  ;;  %v7147_v45 = vld [vmem:[%s9029_s8 + $0xc0] sm:$0xff]  }
 0x87f   : > { %v3791_v21 = vpop.f32.mrb[63].mxu0  ;;  %v7149_v50 = vld [vmem:[%s9029_s8 + $0xd0] sm:$0xff]  }
 0x880   : > { %4088 = vmatprep.mubr.bf16.mxu0 %v3834_v47  ;;  %v7148_v47 = vld [vmem:[%s9029_s8 + $0xc8] sm:$0xff]  }
 0x881   : > { %4089 = vmatmul.mubr.bf16.vlgmr.msra.gmra.mrb[68].mxu0 %v3833_v52 }
 0x882   : > { %4536 = vmatpush1.bf16.msra.mxu0 %v7123_v16  ;;  %v7150_v16 = vld [vmem:[%s9029_s8 + $0xd8] sm:$0xff]  }
 0x883   : > { %4537 = vmatprep.subr.bf16.mxu0 %v7272_v36 }
 0x884   : > { %v3827_v38 = vpop.f32.mrb[64].mxu0 }
 0x885   : > { %v3835_v40 = vpack.c.bf16 %v3827_v38, %v3827_v38  ;;  %v6589_v42 = vpop.f32.mrb[65].mxu0 }
 0x886   : > { %v3830_v10 = vpop.f32.mrb[66].mxu0  ;;  %4538 = vmatpush1.bf16.msra.mxu0 %v7124_v35 }
 0x887   : > { %v6590_v24 = vpop.f32.mrb[67].mxu0  ;;  %6082 = vmatmul.mubr.msk.bf16.vlgmr.msra.gmra.mrb[68].mxu1 %vm2610_vm6, %v3835_v40  ;;  %4539 = vmatprep.subr.bf16.mxu0 %v7272_v36 }
 0x888   : > { %4204 = vmatprep.mubr.bf16.mxu1 %v7272_v36 }
 0x88a   : > { %4540 = vmatpush1.bf16.msra.mxu0 %v7125_v33 }
 0x88b   : > { %4541 = vmatprep.subr.bf16.mxu0 %v7272_v36 }
 0x88e   : > { %4542 = vmatpush1.bf16.msra.mxu0 %v7126_v34 }
 0x88f   : > { %4543 = vmatprep.subr.bf16.mxu0 %v7272_v36 }
 0x892   : > { %4544 = vmatpush1.bf16.msra.mxu0 %v7127_v32  ;;  %v6189_v32 = vld [vmem:[%s9028_s7 + $0x3] sm:$0x1] }
 0x893   : > { %4545 = vmatprep.subr.bf16.mxu0 %v7272_v36 }
 0x896   : > { %4546 = vmatpush1.bf16.msra.mxu0 %v7128_v53 }
 0x897   : > { %4547 = vmatprep.subr.bf16.mxu0 %v7272_v36 }
 0x89a   : > { %4548 = vmatpush1.bf16.msra.mxu0 %v7129_v54 }
 0x89b   : > { %4549 = vmatprep.subr.bf16.mxu0 %v7272_v36 }
 0x89e   : > { %4550 = vmatpush1.bf16.msra.mxu0 %v7130_v55  ;;  %v7165_v55 = vld [vmem:[%s9029_s8 + $0x150] sm:$0xff]  }
 0x89f   : > { %4551 = vmatprep.subr.bf16.mxu0 %v7272_v36 }
 0x8a2   : > { %4552 = vmatpush1.bf16.msra.mxu0 %v7131_v56  ;;  %v7166_v56 = vld [vmem:[%s9029_s8 + $0x158] sm:$0xff]  }
 0x8a3   : > { %4553 = vmatprep.subr.bf16.mxu0 %v7272_v36 }
 0x8a6   : > { %4554 = vmatpush1.bf16.msra.mxu0 %v7132_v58  ;;  %v6144_v58 = vld [vmem:[%s9028_s7 + $0x2] sm:$0x1] }
 0x8a7   : > { %4555 = vmatprep.subr.bf16.mxu0 %v7272_v36 }
 0x8aa   : > { %4556 = vmatpush1.bf16.msra.mxu0 %v7133_v59  ;;  %v7151_v59 = vld [vmem:[%s9029_s8 + $0xe0] sm:$0xff]  }
 0x8ab   : > { %4557 = vmatprep.subr.bf16.mxu0 %v7272_v36 }
 0x8ae   : > { %4558 = vmatpush1.bf16.msra.mxu0 %v7134_v57  ;;  %v7167_v57 = vld [vmem:[%s9029_s8 + $0x160] sm:$0xff]  }
 0x8af   : > { %4559 = vmatprep.subr.bf16.mxu0 %v7272_v36 }
 0x8b2   : > { %4560 = vmatpush1.bf16.msra.mxu0 %v7135_v61  ;;  %v7152_v61 = vld [vmem:[%s9029_s8 + $0xe8] sm:$0xff]  }
 0x8b3   : > { %4561 = vmatprep.subr.bf16.mxu0 %v7272_v36 }
 0x8b6   : > { %4562 = vmatpush1.bf16.msra.mxu0 %v7136_v60  ;;  %v7168_v60 = vld [vmem:[%s9029_s8 + $0x168] sm:$0xff]  }
 0x954   : > { %v4090_v63 = vpop.f32.mrb[68].mxu0 }
 0x955   : > { %v4092_v62 = vpop.f32.mrb[69].mxu0 }
 0x956   : > { %v4094_v0 = vpop.f32.mrb[70].mxu0 }
 0x957   : > { %v4095_v1 = vpop.f32.mrb[71].mxu0  ;;  %v7154_v0 = vld [vmem:[%s9029_s8 + $0xf8] sm:$0xff]  }
 0x958   : > { %v7170_v1 = vld [vmem:[%s9029_s8 + $0x178] sm:$0xff]  }
 0x95a   : > { %v4131_v13 = vpop.f32.mrb[68].mxu1 }
 0x95b   : > { %v4132_v3 = vadd.f32 %v4131_v13, %v4090_v63  ;;  %v4133_v14 = vpop.f32.mrb[69].mxu1  ;;  %v7153_v63 = vld [vmem:[%s9029_s8 + $0xf0] sm:$0xff]   ;;  %v7171_v13 = vld [vmem:[%s9029_s8 + $0x180] sm:$0xff]  }
 0x95c   : > { %v4134_v15 = vadd.f32 %v4133_v14, %v4092_v62  ;;  %v4135_v6 = vpop.f32.mrb[70].mxu1  ;;  %v7169_v62 = vld [vmem:[%s9029_s8 + $0x170] sm:$0xff]  }
 0x95d   : > { %v4138_v7 = vadd.f32 %v4132_v3, %v8590_v39  ;;  %v4136_v8 = vpop.f32.mrb[71].mxu1  ;;  %v7143_v39 = vld [vmem:[%s9029_s8 + $0xa0] sm:$0xff]   ;;  %v7156_v3 = vld [vmem:[%s9029_s8 + $0x108] sm:$0xff]   ;;  %v7157_v14 = vld [vmem:[%s9029_s8 + $0x110] sm:$0xff]  }
 0x95e   : > { %v4139_v9 = vadd.f32 %v4134_v15, %v8593_v43  ;;  %v7145_v43 = vld [vmem:[%s9029_s8 + $0xb0] sm:$0xff]   ;;  %v7158_v15 = vld [vmem:[%s9029_s8 + $0x118] sm:$0xff]   ;;  %v7160_v6 = vld [vmem:[%s9029_s8 + $0x128] sm:$0xff]  }
 0x95f   : > { %v4152_v11 = vadd.f32 %v4145_v4, %v4138_v7  ;;  %v7172_v4 = vld [vmem:[%s9029_s8 + $0x188] sm:$0xff]   ;;  %v7161_v7 = vld [vmem:[%s9029_s8 + $0x130] sm:$0xff]   ;;  %v7162_v8 = vld [vmem:[%s9029_s8 + $0x138] sm:$0xff]  }
 0x960   : > { %v4153_v18 = vadd.f32 %v4149_v5, %v4139_v9  ;;  %v7159_v5 = vld [vmem:[%s9029_s8 + $0x120] sm:$0xff]  }
 0x961   : > { %v4154_v19 = vmax.f32 %v4152_v11, 0.0  ;;  %v7163_v9 = vld [vmem:[%s9029_s8 + $0x140] sm:$0xff]   ;;  %v7164_v11 = vld [vmem:[%s9029_s8 + $0x148] sm:$0xff]  }
 0x962   : > { %v4155_v20 = vmax.f32 %v4153_v18, 0.0  ;;  %v7175_v18 = vld [vmem:[%s9029_s8 + $0x1a0] sm:$0xff]  }
 0x963   : > { %v4156_v22 = vpack.c.bf16 %v4154_v19, %v4154_v19  ;;  %v7176_v19 = vld [vmem:[%s9029_s8 + $0x1a8] sm:$0xff]  }
 0x964   : > { %v4157_v23 = vpack.c.bf16 %v4155_v20, %v4155_v20  ;;  %v7177_v20 = vld [vmem:[%s9029_s8 + $0x1b0] sm:$0xff]  }
 0x965   : > { %v8664_v48 = vand.u32 %v4165_v49, %v4156_v22  ;;  %v7178_v22 = vld [vmem:[%s9029_s8 + $0x1b8] sm:$0xff]  }
 0x966   : > { %v8662_v25 = vand.u32 %v4165_v49, %v4157_v23 }
 0x968   : > { %4172 = vmatprep.subr.bf16.mxu1 %v8662_v25  ;;  %4785 = vmatprep.subr.bf16.mxu0 %v8662_v25 }
 0x969   : > { %4173 = vmatpush1.bf16.msra.mxu1 %v8664_v48 }
 0x96a   : > { %4248 = vmatprep.subr.bf16.mxu1 %v8662_v25 }
 0x96c   : > { %6083 = vmatmul.mubr.msk.bf16.vlgmr.msra.gmra.mrb[72].mxu1 %vm4159_vm8, %v4158_v51 }
 0x96d   : > { %4249 = vmatpush1.bf16.msra.mxu1 %v8664_v48  ;;  %4280 = vmatprep.mubr.bf16.mxu1 %v7272_v36 }
 0x96e   : > { %4408 = vmatprep.subr.bf16.mxu1 %v7272_v36 }
 0x974   : > { %6085 = vmatmul.mubr.msk.bf16.vlgmr.msra.gmra.mrb[76].mxu1 %vm4159_vm8, %v6084_v26 }
 0x975   : > { %4409 = vmatpush1.bf16.msra.mxu1 %v7137_v27 }
 0x976   : > { %4410 = vmatprep.subr.bf16.mxu1 %v7272_v36 }
 0x979   : > { %4411 = vmatpush1.bf16.msra.mxu1 %v7138_v28 }
 0x97a   : > { %4412 = vmatprep.subr.bf16.mxu1 %v7272_v36 }
 0x97d   : > { %4413 = vmatpush1.bf16.msra.mxu1 %v7139_v29 }
 0x97e   : > { %4414 = vmatprep.subr.bf16.mxu1 %v7272_v36 }
 0x981   : > { %4415 = vmatpush1.bf16.msra.mxu1 %v7140_v30 }
 0x982   : > { %4416 = vmatprep.subr.bf16.mxu1 %v7272_v36 }
 0x985   : > { %4417 = vmatpush1.bf16.msra.mxu1 %v7141_v31 }
 0x986   : > { %4418 = vmatprep.subr.bf16.mxu1 %v7272_v36 }
 0x989   : > { %4419 = vmatpush1.bf16.msra.mxu1 %v7142_v37 }
 0x98a   : > { %4420 = vmatprep.subr.bf16.mxu1 %v7272_v36 }
 0x98d   : > { %4421 = vmatpush1.bf16.msra.mxu1 %v7143_v39 }
 0x98e   : > { %4422 = vmatprep.subr.bf16.mxu1 %v7272_v36 }
 0x991   : > { %4423 = vmatpush1.bf16.msra.mxu1 %v7144_v41 }
 0x992   : > { %4424 = vmatprep.subr.bf16.mxu1 %v7272_v36 }
 0x995   : > { %4425 = vmatpush1.bf16.msra.mxu1 %v7145_v43 }
 0x996   : > { %4426 = vmatprep.subr.bf16.mxu1 %v7272_v36 }
 0x999   : > { %4427 = vmatpush1.bf16.msra.mxu1 %v7146_v44 }
 0x99a   : > { %4428 = vmatprep.subr.bf16.mxu1 %v7272_v36 }
 0x99d   : > { %4429 = vmatpush1.bf16.msra.mxu1 %v7147_v45 }
 0x99e   : > { %4430 = vmatprep.subr.bf16.mxu1 %v7272_v36 }
 0x9a1   : > { %4431 = vmatpush1.bf16.msra.mxu1 %v7148_v47 }
 0x9a2   : > { %4432 = vmatprep.subr.bf16.mxu1 %v7272_v36 }
 0x9a5   : > { %4433 = vmatpush1.bf16.msra.mxu1 %v7149_v50 }
 0x9a6   : > { %4434 = vmatprep.subr.bf16.mxu1 %v7272_v36 }
 0x9a9   : > { %4435 = vmatpush1.bf16.msra.mxu1 %v7150_v16 }
 0x9aa   : > { %4580 = vmatprep.subr.bf16.mxu1 %v8662_v25 }
 0xa3f   : > { %v4206_v52 = vpop.f32.mrb[72].mxu1 }
 0xa40   : > { %v4208_v21 = vpop.f32.mrb[73].mxu1  ;;  %v4213_v40 = vpack.c.bf16 %v4206_v52, %v4206_v52 }
 0xa41   : > { %v4214_v35 = vpack.c.bf16 %v4208_v21, %v4208_v21  ;;  %v4210_v38 = vpop.f32.mrb[74].mxu1 }
 0xa42   : > { %v4211_v42 = vpop.f32.mrb[75].mxu1  ;;  %v7179_v38 = vld [vmem:[%s9029_s8 + $0x1c0] sm:$0xff]  }
 0xa43   : > { %6143 = vmatprep.mubr.msk.bf16.mxu0 %vm4404_vm9, %v4214_v35  ;;  %v6234_v35 = vld [vmem:[%s9028_s7 + $0x4] sm:$0x1]  ;;  %v7182_v42 = vld [vmem:[%s9029_s8 + $0x1d8] sm:$0xff]  }
 0xa44   : > { %4568 = vmatmul.mubr.bf16.vlgmr.msra.gmra.mrb[72].mxu0 %v4213_v40  ;;  %v7180_v40 = vld [vmem:[%s9029_s8 + $0x1c8] sm:$0xff]  }
 0xa45   : > { %4786 = vmatpush1.bf16.msra.mxu0 %v8664_v48  ;;  %4817 = vmatprep.mubr.bf16.mxu0 %v7272_v36 }
 0xa46   : > { %4944 = vmatprep.subr.bf16.mxu0 %v7272_v36 }
 0xa47   : > { %v4282_v10 = vpop.f32.mrb[76].mxu1 }
 0xa48   : > { %v4284_v33 = vpop.f32.mrb[77].mxu1  ;;  %v4289_v53 = vpack.c.bf16 %v4282_v10, %v4282_v10  ;;  %v7183_v10 = vld [vmem:[%s9029_s8 + $0x1e0] sm:$0xff]  }
 0xa49   : > { %v4290_v24 = vpack.c.bf16 %v4284_v33, %v4284_v33  ;;  %v4286_v34 = vpop.f32.mrb[78].mxu1  ;;  %v7184_v33 = vld [vmem:[%s9029_s8 + $0x1e8] sm:$0xff]  }
 0xa4a   : > { %v4287_v54 = vpop.f32.mrb[79].mxu1  ;;  %v7186_v34 = vld [vmem:[%s9029_s8 + $0x1f8] sm:$0xff]  }
 0xa4b   : > { %6128 = vmatprep.mubr.msk.bf16.mxu1 %vm4404_vm9, %v4290_v24  ;;  %v7185_v24 = vld [vmem:[%s9029_s8 + $0x1f0] sm:$0xff]  }
 0xa4c   : > { %4441 = vmatmul.mubr.bf16.vlgmr.msra.gmra.mrb[80].mxu1 %v4289_v53  ;;  %6190 = vmatmul.mubr.msk.bf16.vlgmr.msra.gmra.mrb[76].mxu0 %vm4159_vm8, %v6189_v32  ;;  %v7187_v32 = vld [vmem:[%s9029_s8 + $0x200] sm:$0xff]   ;;  %v7188_v53 = vld [vmem:[%s9029_s8 + $0x208] sm:$0xff]   ;;  %v7189_v54 = vld [vmem:[%s9029_s8 + $0x210] sm:$0xff]  }
 0xa4d   : > { %4581 = vmatpush1.bf16.msra.mxu1 %v8664_v48  ;;  %4612 = vmatprep.mubr.bf16.mxu1 %v7272_v36 }
 0xa4e   : > { %4739 = vmatprep.subr.bf16.mxu1 %v7272_v36  ;;  %4945 = vmatpush1.bf16.msra.mxu0 %v7165_v55  ;;  %v7190_v55 = vld [vmem:[%s9029_s8 + $0x218] sm:$0xff]  }
 0xa4f   : > { %4946 = vmatprep.subr.bf16.mxu0 %v7272_v36 }
 0xa52   : > { %4947 = vmatpush1.bf16.msra.mxu0 %v7166_v56  ;;  %v7191_v56 = vld [vmem:[%s9029_s8 + $0x220] sm:$0xff]  }
 0xa53   : > { %4948 = vmatprep.subr.bf16.mxu0 %v7272_v36 }
 0xa54   : > { %6145 = vmatmul.mubr.msk.bf16.vlgmr.msra.gmra.mrb[84].mxu1 %vm4159_vm8, %v6144_v58  ;;  %v7192_v58 = vld [vmem:[%s9029_s8 + $0x228] sm:$0xff]  }
 0xa55   : > { %4740 = vmatpush1.bf16.msra.mxu1 %v7151_v59  ;;  %v7193_v59 = vld [vmem:[%s9031_s10 + $0x20] sm:$0xff]  }
 0xa56   : > { %4741 = vmatprep.subr.bf16.mxu1 %v7272_v36  ;;  %4949 = vmatpush1.bf16.msra.mxu0 %v7167_v57  ;;  %v7194_v57 = vld [vmem:[%s9031_s10 + $0x28] sm:$0xff]  }
 0xa57   : > { %4950 = vmatprep.subr.bf16.mxu0 %v7272_v36 }
 0xa59   : > { %4742 = vmatpush1.bf16.msra.mxu1 %v7152_v61 }
 0xa5a   : > { %4743 = vmatprep.subr.bf16.mxu1 %v7272_v36  ;;  %4951 = vmatpush1.bf16.msra.mxu0 %v7168_v60 }
 0xa5b   : > { %4952 = vmatprep.subr.bf16.mxu0 %v7272_v36 }
 0xa5d   : > { %4744 = vmatpush1.bf16.msra.mxu1 %v7153_v63 }
 0xa5e   : > { %4745 = vmatprep.subr.bf16.mxu1 %v7272_v36  ;;  %4953 = vmatpush1.bf16.msra.mxu0 %v7169_v62 }
 0xa5f   : > { %4954 = vmatprep.subr.bf16.mxu0 %v7272_v36 }
 0xa61   : > { %4746 = vmatpush1.bf16.msra.mxu1 %v7154_v0 }
 0xa62   : > { %4747 = vmatprep.subr.bf16.mxu1 %v7272_v36  ;;  %4955 = vmatpush1.bf16.msra.mxu0 %v7170_v1 }
 0xa63   : > { %4956 = vmatprep.subr.bf16.mxu0 %v7272_v36 }
 0xa65   : > { %4748 = vmatpush1.bf16.msra.mxu1 %v7155_v2 }
 0xa66   : > { %4749 = vmatprep.subr.bf16.mxu1 %v7272_v36  ;;  %4957 = vmatpush1.bf16.msra.mxu0 %v7171_v13 }
 0xa67   : > { %4958 = vmatprep.subr.bf16.mxu0 %v7272_v36 }
 0xa69   : > { %4750 = vmatpush1.bf16.msra.mxu1 %v7156_v3 }
 0xa6a   : > { %4751 = vmatprep.subr.bf16.mxu1 %v7272_v36  ;;  %4959 = vmatpush1.bf16.msra.mxu0 %v7172_v4 }
 0xa6b   : > { %4960 = vmatprep.subr.bf16.mxu0 %v7272_v36 }
 0xa6d   : > { %4752 = vmatpush1.bf16.msra.mxu1 %v7157_v14 }
 0xa6e   : > { %4753 = vmatprep.subr.bf16.mxu1 %v7272_v36  ;;  %4961 = vmatpush1.bf16.msra.mxu0 %v7173_v12  ;;  %v6279_v12 = vld [vmem:[%s9030_s9] ss:$0 sm:$0xff] }
 0xa6f   : > { %4962 = vmatprep.subr.bf16.mxu0 %v7272_v36 }
 0xa71   : > { %4754 = vmatpush1.bf16.msra.mxu1 %v7158_v15 }
 0xa72   : > { %4755 = vmatprep.subr.bf16.mxu1 %v7272_v36  ;;  %4963 = vmatpush1.bf16.msra.mxu0 %v7174_v17 }
 0xa73   : > { %4964 = vmatprep.subr.bf16.mxu0 %v7272_v36 }
 0xa75   : > { %4756 = vmatpush1.bf16.msra.mxu1 %v7159_v5 }
 0xa76   : > { %4757 = vmatprep.subr.bf16.mxu1 %v7272_v36  ;;  %4965 = vmatpush1.bf16.msra.mxu0 %v7175_v18 }
 0xa77   : > { %4966 = vmatprep.subr.bf16.mxu0 %v7272_v36 }
 0xa79   : > { %4758 = vmatpush1.bf16.msra.mxu1 %v7160_v6 }
 0xa7a   : > { %4759 = vmatprep.subr.bf16.mxu1 %v7272_v36  ;;  %4967 = vmatpush1.bf16.msra.mxu0 %v7176_v19 }
 0xa7b   : > { %4968 = vmatprep.subr.bf16.mxu0 %v7272_v36 }
 0xa7d   : > { %4760 = vmatpush1.bf16.msra.mxu1 %v7161_v7 }
 0xa7e   : > { %4761 = vmatprep.subr.bf16.mxu1 %v7272_v36  ;;  %4969 = vmatpush1.bf16.msra.mxu0 %v7177_v20 }
 0xa7f   : > { %4970 = vmatprep.subr.bf16.mxu0 %v7272_v36 }
 0xa81   : > { %4762 = vmatpush1.bf16.msra.mxu1 %v7162_v8  ;;  %v7195_v8 = vld [vmem:[%s9031_s10 + $0x30] sm:$0xff]  }
 0xa82   : > { %4763 = vmatprep.subr.bf16.mxu1 %v7272_v36  ;;  %4971 = vmatpush1.bf16.msra.mxu0 %v7178_v22 }
 0xa83   : > { %6591 = vmatprep.subr.bf16.mxu0 %v7273_v46 }
 0xa85   : > { %4764 = vmatpush1.bf16.msra.mxu1 %v7163_v9  ;;  %v7196_v9 = vld [vmem:[%s9031_s10 + $0x38] sm:$0xff]  }
 0xa86   : > { %4765 = vmatprep.subr.bf16.mxu1 %v7272_v36 }
 0xa89   : > { %4766 = vmatpush1.bf16.msra.mxu1 %v7164_v11 }
 0xa8a   : > { %4990 = vmatprep.subr.bf16.mxu1 %v8662_v25 }
 0xb17   : > { %v4569_v49 = vpop.f32.mrb[72].mxu0 }
 0xb18   : > { %v4571_v23 = vpop.f32.mrb[73].mxu0 }
 0xb19   : > { %v4572_v25 = vpop.f32.mrb[74].mxu0 }
 0xb1a   : > { %v4573_v51 = vpop.f32.mrb[75].mxu0  ;;  %v7197_v25 = vld [vmem:[%s9031_s10] sm:$0xff]  }
 0xb1f   : > { %v4442_v26 = vpop.f32.mrb[80].mxu1  ;;  %v4819_v27 = vpop.f32.mrb[76].mxu0 }
 0xb20   : > { %v8865_v28 = vadd.f32 %v4569_v49, %v4442_v26  ;;  %v4444_v29 = vpop.f32.mrb[81].mxu1  ;;  %v4826_v30 = vpack.c.bf16 %v4819_v27, %v4819_v27  ;;  %v4821_v31 = vpop.f32.mrb[77].mxu0  ;;  %v7198_v26 = vld [vmem:[%s9031_s10 + $0x8] sm:$0xff]   ;;  %v7199_v27 = vld [vmem:[%s9031_s10 + $0x10] sm:$0xff]  }
 0xb21   : > { %v4445_v37 = vpop.f32.mrb[82].mxu1  ;;  %v4827_v39 = vpack.c.bf16 %v4821_v31, %v4821_v31  ;;  %v4823_v41 = vpop.f32.mrb[78].mxu0 }
 0xb22   : > { %v4446_v43 = vpop.f32.mrb[83].mxu1  ;;  %v4824_v44 = vpop.f32.mrb[79].mxu0  ;;  %v5354_v41 = vld [vmem:[%s9032_s11] sm:$0x1] }
 0xb23   : > { %6233 = vmatprep.mubr.msk.bf16.mxu0 %vm4404_vm9, %v4827_v39 }
 0xb24   : > { %4977 = vmatmul.mubr.bf16.vlgmr.msra.gmra.mrb[80].mxu0 %v4826_v30 }
 0xb25   : > { %6599 = vmatprep.mubr.msk.bf16.mxu0 %vm7274_vm3, %v7273_v46  ;;  %6592 = vmatpush3.bf16.msra.mxu0 %v7193_v59 }
 0xb26   : > { %6593 = vmatprep.subr.bf16.mxu0 %v7273_v46 }
 0xb27   : > { %v4614_v45 = vpop.f32.mrb[84].mxu1 }
 0xb28   : > { %v4616_v47 = vpop.f32.mrb[85].mxu1  ;;  %v4621_v52 = vpack.c.bf16 %v4614_v45, %v4614_v45 }
 0xb29   : > { %v4622_v50 = vpack.c.bf16 %v4616_v47, %v4616_v47  ;;  %v4618_v16 = vpop.f32.mrb[86].mxu1  ;;  %6594 = vmatpush3.bf16.msra.mxu0 %v7194_v57 }
 0xb2a   : > { %v4619_v21 = vpop.f32.mrb[87].mxu1  ;;  %6595 = vmatprep.subr.bf16.mxu0 %v7273_v46 }
 0xb2b   : > { %6188 = vmatprep.mubr.msk.bf16.mxu1 %vm4404_vm9, %v4622_v50 }
 0xb2c   : > { %4772 = vmatmul.mubr.bf16.vlgmr.msra.gmra.mrb[88].mxu1 %v4621_v52 }
 0xb2d   : > { %4991 = vmatpush1.bf16.msra.mxu1 %v8664_v48  ;;  %5022 = vmatprep.mubr.bf16.mxu1 %v7272_v36  ;;  %v7181_v48 = vld [vmem:[%s9029_s8 + $0x1d0] sm:$0xff]  }
 0xb2e   : > { %5149 = vmatprep.subr.bf16.mxu1 %v7272_v36  ;;  %6596 = vmatpush3.bf16.msra.mxu0 %v7195_v8 }
 0xb2f   : > { %6597 = vmatprep.subr.bf16.mxu0 %v7273_v46 }
 0xb32   : > { %6598 = vmatpush3.bf16.msra.mxu0 %v7196_v9 }
 0xb33   : > { %6603 = vmatprep.subr.bf16.mxu0 %v7273_v46 }
 0xb34   : > { %6235 = vmatmul.mubr.msk.bf16.vlgmr.msra.gmra.mrb[92].mxu1 %vm4159_vm8, %v6234_v35 }
 0xb35   : > { %5150 = vmatpush1.bf16.msra.mxu1 %v7179_v38 }
 0xb36   : > { %5151 = vmatprep.subr.bf16.mxu1 %v7272_v36 }
 0xb39   : > { %5152 = vmatpush1.bf16.msra.mxu1 %v7180_v40 }
 0xb3a   : > { %5153 = vmatprep.subr.bf16.mxu1 %v7272_v36 }
 0xb3d   : > { %5154 = vmatpush1.bf16.msra.mxu1 %v7181_v48 }
 0xb3e   : > { %5155 = vmatprep.subr.bf16.mxu1 %v7272_v36 }
 0xb41   : > { %5156 = vmatpush1.bf16.msra.mxu1 %v7182_v42 }
 0xb42   : > { %5157 = vmatprep.subr.bf16.mxu1 %v7272_v36 }
 0xb45   : > { %5158 = vmatpush1.bf16.msra.mxu1 %v7183_v10 }
 0xb46   : > { %5159 = vmatprep.subr.bf16.mxu1 %v7272_v36 }
 0xb49   : > { %5160 = vmatpush1.bf16.msra.mxu1 %v7184_v33 }
 0xb4a   : > { %5161 = vmatprep.subr.bf16.mxu1 %v7272_v36 }
 0xb4d   : > { %5162 = vmatpush1.bf16.msra.mxu1 %v7185_v24 }
 0xb4e   : > { %5163 = vmatprep.subr.bf16.mxu1 %v7272_v36 }
 0xb51   : > { %5164 = vmatpush1.bf16.msra.mxu1 %v7186_v34 }
 0xb52   : > { %5165 = vmatprep.subr.bf16.mxu1 %v7272_v36 }
 0xb55   : > { %5166 = vmatpush1.bf16.msra.mxu1 %v7187_v32 }
 0xb56   : > { %5167 = vmatprep.subr.bf16.mxu1 %v7272_v36 }
 0xb59   : > { %5168 = vmatpush1.bf16.msra.mxu1 %v7188_v53 }
 0xb5a   : > { %5169 = vmatprep.subr.bf16.mxu1 %v7272_v36 }
 0xb5d   : > { %5170 = vmatpush1.bf16.msra.mxu1 %v7189_v54 }
 0xb5e   : > { %5171 = vmatprep.subr.bf16.mxu1 %v7272_v36 }
 0xb61   : > { %5172 = vmatpush1.bf16.msra.mxu1 %v7190_v55 }
 0xb62   : > { %5173 = vmatprep.subr.bf16.mxu1 %v7272_v36 }
 0xb65   : > { %5174 = vmatpush1.bf16.msra.mxu1 %v7191_v56 }
 0xb66   : > { %5175 = vmatprep.subr.bf16.mxu1 %v7272_v36 }
 0xb69   : > { %5176 = vmatpush1.bf16.msra.mxu1 %v7192_v58 }
 0xbf7   : > { %v4978_v36 = vpop.f32.mrb[80].mxu0 }
 0xbf8   : > { %v4980_v61 = vpop.f32.mrb[81].mxu0 }
 0xbf9   : > { %v4981_v60 = vpop.f32.mrb[82].mxu0 }
 0xbfa   : > { %v4982_v63 = vpop.f32.mrb[83].mxu0 }
 0xbff   : > { %v4773_v62 = vpop.f32.mrb[88].mxu1 }
 0xc00   : > { %v4779_v0 = vadd.f32 %v4773_v62, %v8865_v28  ;;  %v4775_v1 = vpop.f32.mrb[89].mxu1  ;;  %v7200_v28 = vld [vmem:[%s9031_s10 + $0x18] sm:$0xff]  }
 0xc01   : > { %v4776_v2 = vpop.f32.mrb[90].mxu1 }
 0xc02   : > { %v4984_v13 = vadd.f32 %v4978_v36, %v4779_v0  ;;  %v4777_v3 = vpop.f32.mrb[91].mxu1 }
 0xc07   : > { %v5024_v4 = vpop.f32.mrb[92].mxu1 }
 0xc08   : > { %v5026_v14 = vpop.f32.mrb[93].mxu1  ;;  %v5031_v6 = vpack.c.bf16 %v5024_v4, %v5024_v4 }
 0xc09   : > { %v5032_v15 = vpack.c.bf16 %v5026_v14, %v5026_v14  ;;  %v5028_v5 = vpop.f32.mrb[94].mxu1 }
 0xc0a   : > { %v5029_v7 = vpop.f32.mrb[95].mxu1 }
 0xc0b   : > { %6278 = vmatprep.mubr.msk.bf16.mxu1 %vm4404_vm9, %v5032_v15 }
 0xc0c   : > { %5182 = vmatmul.mubr.bf16.vlgmr.msra.gmra.mrb[96].mxu1 %v5031_v6 }
 0xcdf   : > { %v5183_v11 = vpop.f32.mrb[96].mxu1 }
 0xce0   : > { %v5189_v17 = vadd.f32 %v5183_v11, %v4984_v13  ;;  %v5185_v18 = vpop.f32.mrb[97].mxu1 }
 0xce1   : > { %v5186_v19 = vpop.f32.mrb[98].mxu1 }
 0xce2   : > { %v5197_v20 = vadd.f32 %v6279_v12, %v5189_v17  ;;  %v5187_v22 = vpop.f32.mrb[99].mxu1 }
 0xce4   : > { %v5198_v49 = vmax.f32 %v5197_v20, 0.0 }
 0xce6   : > { %v5199_v23 = vpack.c.bf16 %v5198_v49, %v5198_v49 }
 0xce8   : > { %v5218_v51 = vshrl.u32 %v5199_v23, 16 }
 0xcea   : > { %6600 = vmatmul.mubr.msk.bf16.vlgmr.msra.gmra.mrb[84].mxu0 %vm5244_vm10, %v5218_v51 }
 0xceb   : > { %6604 = vmatpush3.bf16.msra.mxu0 %v7197_v25  ;;  %6611 = vmatprep.mubr.msk.bf16.mxu0 %vm7274_vm3, %v7273_v46 }
 0xcec   : > { %6605 = vmatprep.subr.bf16.mxu0 %v7273_v46 }
 0xcef   : > { %6606 = vmatpush3.bf16.msra.mxu0 %v7198_v26 }
 0xcf0   : > { %6607 = vmatprep.subr.bf16.mxu0 %v7273_v46 }
 0xcf3   : > { %6608 = vmatpush3.bf16.msra.mxu0 %v7199_v27 }
 0xcf4   : > { %6609 = vmatprep.subr.bf16.mxu0 %v7273_v46 }
 0xcf7   : > { %6610 = vmatpush3.bf16.msra.mxu0 %v7200_v28 }
 0xcfa   : > { %6612 = vmatmul.mubr.msk.bf16.vlgmr.msra.gmra.mrb[88].mxu0 %vm5244_vm10, %v5199_v23 }
 0xdbd   : > { %v5282_v29 = vpop.f32.mrb[84].mxu0 }
 0xdbe   : > { %v6601_v30 = vpop.f32.mrb[85].mxu0 }
 0xdbf   : > { %v5285_v31 = vpop.f32.mrb[86].mxu0 }
 0xdc0   : > { %v6602_v37 = vpop.f32.mrb[87].mxu0 }
 0xdcd   : > { %v5348_v39 = vpop.f32.mrb[88].mxu0 }
 0xdce   : > { %v5349_v43 = vadd.f32 %v5348_v39, %v5282_v29  ;;  %v6613_v44 = vpop.f32.mrb[89].mxu0 }
 0xdcf   : > { %v5351_v45 = vpop.f32.mrb[90].mxu0 }
 0xdd0   : > { %v5355_v47 = vadd.f32 %v5354_v41, %v5349_v43  ;;  %v6614_v50 = vpop.f32.mrb[91].mxu0 }
 0xdd2   : > { %v5356_v16 = vsub.f32 0.0, %v5355_v47 }
 0xdd4   : > { %v5357_v46 = vmul.f32 1.442695, %v5356_v16 }
 0xdd6   : > { %7201 = vpow2.f32 %v5357_v46 }
 0xde0   : > { %v7202_v52 = vpop.eup %7201 }
 0xde1   : > { %v5359_v21 = vadd.f32 1.0, %v7202_v52 }
 0xde3   : > { %7203 = vrcp.f32 %v5359_v21 }
 0xded   : > { %v7204_v35 = vpop.eup %7203 }
 0xdee   : > { %5361 = vst [vmem:[%s405_s18] sm:$0x1] %v7204_v35 }
 0xdef   : > { %7221 = shalt.err (!%p7218_p3)
}
 0xdf0   : > { %s7222_s16 = scalar_lea.hbm %s8979_s0, 16  ;;  %s7226_s20 = scalar_lea.hbm %s9033_s12, 32 }
 0xdf1   : > { %p7223_p4 = scmp.ne.s32.totalorder %s8979_s0, %s7222_s16  ;;  %p7227_p9 = scmp.lt.u32.totalorder %s8979_s0, %s9033_s12 }
 0xdf2   : > { %p7228_p10 = scmp.lt.u32.totalorder %s7226_s20, %s7222_s16  ;;  %p7230_p12 = scmp.lt.u32.totalorder %s7222_s16, %s8979_s0 }
 0xdf3   : > { %p7224_p7 = pnand %p7223_p4, %p7380_p5 }
 0xdf4   : > { %p7229_p11 = por %p7228_p10, %p7227_p9 }
 0xdf5   : > { %p7225_p8 = pneg %p7224_p7 }
 0xdf6   : > { %p7231_p13 = por %p7230_p12, %p7229_p11 }
 0xdf8   : > { %p7232_p0 = pnand %p7231_p13, %p7225_p8 }
 0xdfa   : > { %7235 = shalt.err (!%p7232_p0)
}
 0xdfb   : > { %6642 = dma.vmem_to_hbm [thread:$0]  (%p7380_p5), %s8981_s19, 16, %s8979_s0, %s5363_s30  }
 0xdfc PF: > { %p6648_p1 = scmp.ge.s32.totalorder %s7270_s24, 2  ;;  %s5387_s26 = sand.u32 1, %s7258_s21  }
 0xdfd   : > { %s5388_s28 = scalar_lea.sflag [#allocation3], %s5387_s26 }
 0xdfe   : > { %p6645_p2 = pnand %p6648_p1, %p7384_p6 }
 0xe00   : > { %7253 = dma.done.wait (!%p6645_p2), %s5388_s28, 16  }
 0xe01   : > { %7255 = vsyncadd (!%p6645_p2), %s5388_s28, 4294967280  ;;  %s9039_s15 = sld [smem:[#allocation5_spill]]  ;;  %p22_p3 = scmp.ge.s32.totalorder %s7367_s27, 4  }
 0xe02   : > { %s9040_s21 = smov %s7262_s22  ;;  %s9041_s22 = smov %s7266_s23 }
 0xe03   : > { %s9043_s24 = smov %s7367_s27  ;;  %24 = sbr.rel (!%p22_p3) target bundleno = 5 (0x5), region = 128 }
 0xe07   : > { %s9042_s23 = smov %s9039_s15 }
 0xe0a   :  { %5392 = vsyncpa [#allocation3], 1 }
 0xe0b   :  { %5394 = vsyncpa [#allocation3 + $0x1], 1 }

</bundles_post_ra>
